<compile_context>
chip_gen: v6e
topology: v6e:2x2x1
jax: 0.10.0
libtpu: 0.0.40
codegen_flags: <defaults>
</compile_context>

<pallas_src>
import jax
import jax.numpy as jnp
from jax.experimental import pallas as pl
from jax.experimental.pallas import tpu as pltpu

POS_L = 10
CAM_L = 4
ENC_POS = POS_L * 6 + 3          # 63
ENC_DIR = CAM_L * 6 + 3          # 27
ENC_POS_PAD = 64                 # padded K for the MXU
ENC_DIR_PAD = 32
HID = 256
C_COLS = 12 * HID                # width of the packed f32 constants slab (3072)


def _round_up(x, m):
    return ((x + m - 1) // m) * m


def _tile_cap():
    """Per-generation batch-tile cap (2048 on 128-MiB VMEM chips, 1024 on v7x)."""
    try:
        info_fn = getattr(pltpu, "get_tpu_info", None)
        if info_fn is not None:
            info = info_fn()
            vmem = (getattr(info, "vmem_capacity_bytes", 0)
                    or getattr(info, "vmem_bytes", 0))
            if vmem:
                return 1024 if vmem <= 96 * 1024 * 1024 else 2048
    except Exception:
        pass
    return 1024                  # safe default on unknown generations


TILE_CAP = _tile_cap()


def positional_encoding(x, L):
    """[x, sin(2^1 pi x), cos(2^1 pi x), ..., sin(2^L pi x), cos(2^L pi x)]."""
    parts = [x]
    for power in range(L):
        freq = (2.0 ** (power + 1)) * jnp.pi
        parts.append(jnp.sin(freq * x))
        parts.append(jnp.cos(freq * x))
    return jnp.concatenate(parts, axis=1)


# ---------------------------------------------------------------------------
# Pallas kernel: full MLP (block_1 .. block_4) for one batch tile.
# Constants slab layout (1, 3072) f32:
#   [0:2048]    b1..b7, b8h      (8 x 256)
#   [2048:2176] b9               (128)
#   [2304:2560] w8 sigma row     (256)   (column 256 of w8, transposed)
#   [2560:2564] b10 padded to 4
#   [2816:2817] b8 sigma bias
# Hidden weight slab (256, 1920) bf16: [w2|w3|w4|w5h|w6|w7|w8h | w9h(128)]
# ---------------------------------------------------------------------------
def nerf_kernel(ep_ref, ed_ref, w_in_ref, w_hid_ref, w9d_ref, w10_ref, c_ref,
                out_ref):
    f32 = jnp.float32
    bf16 = jnp.bfloat16

    def mm(x, w):
        # bf16 MXU matmul with f32 accumulation.
        return jnp.dot(x, w, preferred_element_type=f32)

    def hw(j):                       # 256-wide hidden weight chunk j (aligned view)
        return w_hid_ref[:, j * HID:(j + 1) * HID]

    def cc(lo, hi):                  # slice of the f32 constants slab, shape (1, hi-lo)
        return c_ref[:, lo:hi]

    ep = ep_ref[...]                 # (T, 64) bf16, cols 63.. are zero
    ed = ed_ref[...]                 # (T, 32) bf16 = relu(encoded_dir), cols 27.. zero

    # Prologue: one matmul gives both the block_1 input pre-activation and the
    # block_2 skip contribution:  ep @ [w1 | w5e] -> (T, 512) f32.
    pre = mm(ep, w_in_ref[...])
    skip = pre[:, HID:2 * HID]                                    # ep @ w5e (f32)

    # block_1: 4 x (Linear + ReLU), activations kept bf16 after each ReLU
    h = jax.nn.relu(pre[:, :HID] + cc(0, 256)).astype(bf16)
    h = jax.nn.relu(mm(h, hw(0)) + cc(256, 512)).astype(bf16)
    h = jax.nn.relu(mm(h, hw(1)) + cc(512, 768)).astype(bf16)
    h = jax.nn.relu(mm(h, hw(2)) + cc(768, 1024)).astype(bf16)

    # block_2: skip-connection concat folded into the prologue matmul
    g = jax.nn.relu(mm(h, hw(3)) + skip + cc(1024, 1280)).astype(bf16)
    g = jax.nn.relu(mm(g, hw(4)) + cc(1280, 1536)).astype(bf16)
    g = jax.nn.relu(mm(g, hw(5)) + cc(1536, 1792)).astype(bf16)
    hid2 = mm(g, hw(6)) + cc(1792, 2048)                          # (T, 256) f32
    # 257th output column (sigma pre-activation): cheap VPU mul + XLU reduce
    sigma = jax.nn.relu(
        jnp.sum(g.astype(f32) * cc(2304, 2560), axis=1, keepdims=True)
        + cc(2816, 2817))                                         # (T, 1) f32

    # block_3: ReLU(cat(hid2, encoded_dir)) @ w9 as split matmuls, then Sigmoid
    # (ReLU of the direction encoding was already applied in the wrapper, f32)
    h3 = jax.nn.sigmoid(mm(jax.nn.relu(hid2).astype(bf16),
                           w_hid_ref[:, 7 * HID:7 * HID + 128])   # w9h view
                        + mm(ed, w9d_ref[...])
                        + cc(2048, 2176))                         # (T, 128) f32

    # block_4: Linear(128, 3) + Sigmoid; w10 padded to 4 columns, col 3 -> sigma
    color4 = jax.nn.sigmoid(mm(h3.astype(bf16), w10_ref[...]) + cc(2560, 2564))
    lane = jax.lax.broadcasted_iota(jnp.int32, color4.shape, 1)
    out_ref[...] = jnp.where(lane == 3, sigma, color4)            # [r, g, b, sigma]


# ---------------------------------------------------------------------------
# Parameter preprocessing (call ONCE and reuse): split / pad / pack / cast.
# ---------------------------------------------------------------------------
def prepare_params(params):
    (w1, b1), (w2, b2), (w3, b3), (w4, b4), (w5, b5), (w6, b6), (w7, b7), \
        (w8, b8), (w9, b9), (w10, b10) = params

    def bf(x):
        return x.astype(jnp.bfloat16)

    def pad_rows(w, k):
        return jnp.pad(w, ((0, k - w.shape[0]), (0, 0)))

    # input slab [w1 | w5e]  (64, 512) bf16
    w1p = pad_rows(w1, ENC_POS_PAD)                    # (64, 256)
    w5e = pad_rows(w5[HID:], ENC_POS_PAD)              # (64, 256)
    w_in = bf(jnp.concatenate([w1p, w5e], axis=1))     # (64, 512)

    # hidden slab [w2|w3|w4|w5h|w6|w7|w8h|w9h]  (256, 1920) bf16
    w_hid = bf(jnp.concatenate(
        [w2, w3, w4, w5[:HID], w6, w7, w8[:, :HID], w9[:HID]], axis=1))

    w9d = bf(pad_rows(w9[HID:], ENC_DIR_PAD))          # (32, 128)
    w10p = bf(jnp.pad(w10, ((0, 0), (0, 1))))          # (128, 4), col 3 zero

    # f32 constants slab (1, 3072)
    def row(x):
        x = x.reshape(1, -1)
        return jnp.pad(x, ((0, 0), (0, HID - x.shape[1])))

    consts = jnp.concatenate(
        [b1, b2, b3, b4, b5, b6, b7, b8[:, :HID],      # 8 x 256
         row(b9),                                      # b9 (128) + zeros
         w8[:, HID:].T,                                # sigma weight row (256)
         row(b10),                                     # b10 (3) + zeros
         row(b8[:, HID:])],                            # sigma bias (1) + zeros
        axis=1).astype(jnp.float32)                    # (1, 3072)

    return (w_in, w_hid, w9d, w10p, consts)


@jax.jit
def nerf_forward(position, direction, prepared):
    """position, direction: (N, 3) f32; prepared = prepare_params(params).

    Returns (color (N, 3), sigma (N,)).
    """
    n = position.shape[0]
    w_in, w_hid, w9d, w10p, consts = prepared

    # Positional encoding in the wrapper (cheap elementwise, fused by XLA).
    # ReLU of the direction encoding is applied here in f32 (block_3 semantics)
    # so no bf16 elementwise ReLU runs in-kernel (v5e has no bf16 VPU path).
    ep = positional_encoding(position, POS_L)                      # (n, 63) f32
    ed = jax.nn.relu(positional_encoding(direction, CAM_L))        # (n, 27) f32

    # Tile selection: per-generation cap, and guarantee >= 2 grid steps so the
    # "parallel" batch axis can shard across both v7x TensorCores.
    n16 = _round_up(max(n, 1), 16)
    tile = min(TILE_CAP, n16)
    if tile == n16 and n16 >= 32:
        tile = _round_up((n16 + 1) // 2, 16)
    n_pad = _round_up(n16, tile)

    ep = jnp.pad(ep, ((0, n_pad - n), (0, ENC_POS_PAD - ENC_POS))).astype(jnp.bfloat16)
    ed = jnp.pad(ed, ((0, n_pad - n), (0, ENC_DIR_PAD - ENC_DIR))).astype(jnp.bfloat16)

    def batch_spec(width):
        return pl.BlockSpec((tile, width), lambda i: (i, 0))

    def const_spec(a):
        # whole (small) array resident in VMEM, same block for every grid step
        return pl.BlockSpec(a.shape, lambda i: (0, 0))

    flat = (w_in, w_hid, w9d, w10p, consts)
    in_specs = ([batch_spec(ENC_POS_PAD), batch_spec(ENC_DIR_PAD)]
                + [const_spec(a) for a in flat])
    out_specs = pl.BlockSpec((tile, 4), lambda i: (i, 0))

    macs = (ENC_POS_PAD * 2 * HID                    # prologue [w1|w5e]
            + 7 * HID * HID                          # hidden slab matmuls
            + HID                                    # sigma VPU row
            + HID * 128 + ENC_DIR_PAD * 128          # block_3
            + 128 * 4)                               # block_4
    param_bytes = sum(int(a.size) * a.dtype.itemsize for a in flat)
    cost = pl.CostEstimate(
        flops=2 * macs * n_pad,
        transcendentals=(128 + 4) * n_pad,           # in-kernel sigmoids
        bytes_accessed=n_pad * (2 * (ENC_POS_PAD + ENC_DIR_PAD) + 4 * 4) + param_bytes)

    out = pl.pallas_call(
        nerf_kernel,
        out_shape=jax.ShapeDtypeStruct((n_pad, 4), jnp.float32),
        grid_spec=pltpu.PrefetchScalarGridSpec(
            num_scalar_prefetch=0,
            grid=(n_pad // tile,),
            in_specs=in_specs,
            out_specs=out_specs,
        ),
        compiler_params=pltpu.CompilerParams(
            dimension_semantics=("parallel",),       # batch axis shards across v7x's 2 TCs
            vmem_limit_bytes=48 * 1024 * 1024,       # fits tile<=2048 (v5e/v6e) and v7x's 64 MiB
        ),
        cost_estimate=cost,
    )(ep, ed, *flat)

    return out[:n, 0:3], out[:n, 3]


# ---------------------------------------------------------------------------
# Deterministic parameter init (PyTorch nn.Linear-style uniform bounds),
# stored as (in_features, out_features) / (1, out_features).
# ---------------------------------------------------------------------------
def init_params(key):
    dims = [
        (ENC_POS, HID), (HID, HID), (HID, HID), (HID, HID),              # block_1
        (POS_L * 6 + 259, HID), (HID, HID), (HID, HID), (HID, HID + 1),  # block_2
        (CAM_L * 6 + 259, 128),                                          # block_3
        (128, 3),                                                        # block_4
    ]
    params = []
    for fan_in, fan_out in dims:
        key, kw, kb = jax.random.split(key, 3)
        bound = 1.0 / (fan_in ** 0.5)
        w = jax.random.uniform(kw, (fan_in, fan_out), jnp.float32, -bound, bound)
        b = jax.random.uniform(kb, (1, fan_out), jnp.float32, -bound, bound)
        params.append((w, b))
    return params


# ---------------------------------------------------------------------------
# Pure-JAX f32 reference (sanity check for the Pallas kernel)
# ---------------------------------------------------------------------------
def nerf_reference(position, direction, params):
    ep = positional_encoding(position, POS_L)
    ed = positional_encoding(direction, CAM_L)
    (w1, b1), (w2, b2), (w3, b3), (w4, b4), (w5, b5), (w6, b6), (w7, b7), \
        (w8, b8), (w9, b9), (w10, b10) = params
    h = jax.nn.relu(ep @ w1 + b1)
    h = jax.nn.relu(h @ w2 + b2)
    h = jax.nn.relu(h @ w3 + b3)
    h = jax.nn.relu(h @ w4 + b4)
    hi1 = jnp.concatenate([h, ep], axis=1)
    h2 = jax.nn.relu(hi1 @ w5 + b5)
    h2 = jax.nn.relu(h2 @ w6 + b6)
    h2 = jax.nn.relu(h2 @ w7 + b7)
    ho1 = h2 @ w8 + b8
    sigma = jax.nn.relu(ho1[:, HID])
    hi3 = jax.nn.relu(jnp.concatenate([ho1[:, :HID], ed], axis=1))
    h3 = jax.nn.sigmoid(hi3 @ w9 + b9)
    color = jax.nn.sigmoid(h3 @ w10 + b10)
    return color, sigma


if __name__ == "__main__":
    key = jax.random.PRNGKey(0)
    kp, kd, kparams = jax.random.split(key, 3)

    N = 256  # small batch of rays/samples
    position = jax.random.uniform(kp, (N, 3), jnp.float32, -1.0, 1.0)
    direction = jax.random.uniform(kd, (N, 3), jnp.float32, -1.0, 1.0)

    params = init_params(kparams)
    prepared = prepare_params(params)   # hoisted: preprocess weights ONCE, reuse per call

    color, sigma = nerf_forward(position, direction, prepared)
    jax.block_until_ready((color, sigma))

    ref_color, ref_sigma = nerf_reference(position, direction, params)
    assert color.shape == (N, 3) and sigma.shape == (N,)
    # bf16 matmuls / bf16 activations (f32 accumulation) -> loosened tolerance
    assert jnp.allclose(color, ref_color, atol=2e-2, rtol=2e-2), \
        float(jnp.max(jnp.abs(color - ref_color)))
    assert jnp.allclose(sigma, ref_sigma, atol=2e-2, rtol=2e-2), \
        float(jnp.max(jnp.abs(sigma - ref_sigma)))

    print("KERNEL_OK")
</pallas_src>

<mosaic_0001>
module attributes {stable_mosaic.version = 11 : i64} {
  func.func @nerf_kernel(%arg0: i32, %arg1: memref<128x64xbf16, #tpu.memory_space<vmem>>, %arg2: memref<128x32xbf16, #tpu.memory_space<vmem>>, %arg3: memref<64x512xbf16, #tpu.memory_space<vmem>>, %arg4: memref<256x1920xbf16, #tpu.memory_space<vmem>>, %arg5: memref<32x128xbf16, #tpu.memory_space<vmem>>, %arg6: memref<128x4xbf16, #tpu.memory_space<vmem>>, %arg7: memref<1x3072xf32, #tpu.memory_space<vmem>>, %arg8: memref<128x4xf32, #tpu.memory_space<vmem>>) attributes {dimension_semantics = [#tpu.dimension_semantics<parallel>], iteration_bounds = array<i64: 2>, scalar_prefetch = 0 : i64, scratch_operands = 0 : i64, tpu.core_type = #tpu.core_type<tc>, window_params = [{transform_indices = @transform_0, window_bounds = array<i64: 128, 64>}, {transform_indices = @transform_1, window_bounds = array<i64: 128, 32>}, {pipeline_mode = #tpu.pipeline_mode<synchronous>, transform_indices = @transform_2, window_bounds = array<i64: 64, 512>}, {pipeline_mode = #tpu.pipeline_mode<synchronous>, transform_indices = @transform_3, window_bounds = array<i64: 256, 1920>}, {pipeline_mode = #tpu.pipeline_mode<synchronous>, transform_indices = @transform_4, window_bounds = array<i64: 32, 128>}, {pipeline_mode = #tpu.pipeline_mode<synchronous>, transform_indices = @transform_5, window_bounds = array<i64: 128, 4>}, {pipeline_mode = #tpu.pipeline_mode<synchronous>, transform_indices = @transform_6, window_bounds = array<i64: 1, 3072>}, {transform_indices = @transform_7, window_bounds = array<i64: 128, 4>}]} {
    %c0 = arith.constant 0 : index
    %c0_0 = arith.constant 0 : index
    %0 = vector.load %arg1[%c0, %c0_0] : memref<128x64xbf16, #tpu.memory_space<vmem>>, vector<128x64xbf16>
    %c0_1 = arith.constant 0 : index
    %c0_2 = arith.constant 0 : index
    %1 = vector.load %arg2[%c0_1, %c0_2] : memref<128x32xbf16, #tpu.memory_space<vmem>>, vector<128x32xbf16>
    %c0_3 = arith.constant 0 : index
    %c0_4 = arith.constant 0 : index
    %2 = vector.load %arg3[%c0_3, %c0_4] : memref<64x512xbf16, #tpu.memory_space<vmem>>, vector<64x512xbf16>
    %cst = arith.constant dense<0.000000e+00> : vector<128x512xf32>
    %3 = tpu.matmul %0, %2, %cst {dimension_numbers = #tpu.dot_dimension_numbers<[1], [0], [0], [1], [0, 0, 1, 1], [], []>} : vector<128x64xbf16>, vector<64x512xbf16>, vector<128x512xf32> -> vector<128x512xf32>
    %4 = vector.extract_strided_slice %3 {offsets = [0, 256], sizes = [128, 256], strides = [1, 1]} : vector<128x512xf32> to vector<128x256xf32>
    %5 = vector.extract_strided_slice %3 {offsets = [0, 0], sizes = [128, 256], strides = [1, 1]} : vector<128x512xf32> to vector<128x256xf32>
    %c0_5 = arith.constant 0 : index
    %c0_6 = arith.constant 0 : index
    %6 = vector.load %arg7[%c0_5, %c0_6] : memref<1x3072xf32, #tpu.memory_space<vmem>>, vector<1x256xf32>
    %7 = vector.broadcast %6 : vector<1x256xf32> to vector<128x256xf32>
    %8 = arith.addf %5, %7 : vector<128x256xf32>
    %cst_7 = arith.constant 0.000000e+00 : f32
    %9 = vector.broadcast %cst_7 : f32 to vector<128x256xf32>
    %10 = arith.maximumf %8, %9 : vector<128x256xf32>
    %11 = arith.truncf %10 : vector<128x256xf32> to vector<128x256xbf16>
    %c0_8 = arith.constant 0 : index
    %c0_9 = arith.constant 0 : index
    %12 = vector.load %arg4[%c0_8, %c0_9] : memref<256x1920xbf16, #tpu.memory_space<vmem>>, vector<256x256xbf16>
    %cst_10 = arith.constant dense<0.000000e+00> : vector<128x256xf32>
    %13 = tpu.matmul %11, %12, %cst_10 {dimension_numbers = #tpu.dot_dimension_numbers<[1], [0], [0], [1], [0, 0, 1, 1], [], []>} : vector<128x256xbf16>, vector<256x256xbf16>, vector<128x256xf32> -> vector<128x256xf32>
    %c0_11 = arith.constant 0 : index
    %c256 = arith.constant 256 : index
    %14 = vector.load %arg7[%c0_11, %c256] : memref<1x3072xf32, #tpu.memory_space<vmem>>, vector<1x256xf32>
    %15 = vector.broadcast %14 : vector<1x256xf32> to vector<128x256xf32>
    %16 = arith.addf %13, %15 : vector<128x256xf32>
    %cst_12 = arith.constant 0.000000e+00 : f32
    %17 = vector.broadcast %cst_12 : f32 to vector<128x256xf32>
    %18 = arith.maximumf %16, %17 : vector<128x256xf32>
    %19 = arith.truncf %18 : vector<128x256xf32> to vector<128x256xbf16>
    %c0_13 = arith.constant 0 : index
    %c256_14 = arith.constant 256 : index
    %20 = vector.load %arg4[%c0_13, %c256_14] : memref<256x1920xbf16, #tpu.memory_space<vmem>>, vector<256x256xbf16>
    %cst_15 = arith.constant dense<0.000000e+00> : vector<128x256xf32>
    %21 = tpu.matmul %19, %20, %cst_15 {dimension_numbers = #tpu.dot_dimension_numbers<[1], [0], [0], [1], [0, 0, 1, 1], [], []>} : vector<128x256xbf16>, vector<256x256xbf16>, vector<128x256xf32> -> vector<128x256xf32>
    %c0_16 = arith.constant 0 : index
    %c512 = arith.constant 512 : index
    %22 = vector.load %arg7[%c0_16, %c512] : memref<1x3072xf32, #tpu.memory_space<vmem>>, vector<1x256xf32>
    %23 = vector.broadcast %22 : vector<1x256xf32> to vector<128x256xf32>
    %24 = arith.addf %21, %23 : vector<128x256xf32>
    %cst_17 = arith.constant 0.000000e+00 : f32
    %25 = vector.broadcast %cst_17 : f32 to vector<128x256xf32>
    %26 = arith.maximumf %24, %25 : vector<128x256xf32>
    %27 = arith.truncf %26 : vector<128x256xf32> to vector<128x256xbf16>
    %c0_18 = arith.constant 0 : index
    %c512_19 = arith.constant 512 : index
    %28 = vector.load %arg4[%c0_18, %c512_19] : memref<256x1920xbf16, #tpu.memory_space<vmem>>, vector<256x256xbf16>
    %cst_20 = arith.constant dense<0.000000e+00> : vector<128x256xf32>
    %29 = tpu.matmul %27, %28, %cst_20 {dimension_numbers = #tpu.dot_dimension_numbers<[1], [0], [0], [1], [0, 0, 1, 1], [], []>} : vector<128x256xbf16>, vector<256x256xbf16>, vector<128x256xf32> -> vector<128x256xf32>
    %c0_21 = arith.constant 0 : index
    %c768 = arith.constant 768 : index
    %30 = vector.load %arg7[%c0_21, %c768] : memref<1x3072xf32, #tpu.memory_space<vmem>>, vector<1x256xf32>
    %31 = vector.broadcast %30 : vector<1x256xf32> to vector<128x256xf32>
    %32 = arith.addf %29, %31 : vector<128x256xf32>
    %cst_22 = arith.constant 0.000000e+00 : f32
    %33 = vector.broadcast %cst_22 : f32 to vector<128x256xf32>
    %34 = arith.maximumf %32, %33 : vector<128x256xf32>
    %35 = arith.truncf %34 : vector<128x256xf32> to vector<128x256xbf16>
    %c0_23 = arith.constant 0 : index
    %c768_24 = arith.constant 768 : index
    %36 = vector.load %arg4[%c0_23, %c768_24] : memref<256x1920xbf16, #tpu.memory_space<vmem>>, vector<256x256xbf16>
    %cst_25 = arith.constant dense<0.000000e+00> : vector<128x256xf32>
    %37 = tpu.matmul %35, %36, %cst_25 {dimension_numbers = #tpu.dot_dimension_numbers<[1], [0], [0], [1], [0, 0, 1, 1], [], []>} : vector<128x256xbf16>, vector<256x256xbf16>, vector<128x256xf32> -> vector<128x256xf32>
    %38 = arith.addf %37, %4 : vector<128x256xf32>
    %c0_26 = arith.constant 0 : index
    %c1024 = arith.constant 1024 : index
    %39 = vector.load %arg7[%c0_26, %c1024] : memref<1x3072xf32, #tpu.memory_space<vmem>>, vector<1x256xf32>
    %40 = vector.broadcast %39 : vector<1x256xf32> to vector<128x256xf32>
    %41 = arith.addf %38, %40 : vector<128x256xf32>
    %cst_27 = arith.constant 0.000000e+00 : f32
    %42 = vector.broadcast %cst_27 : f32 to vector<128x256xf32>
    %43 = arith.maximumf %41, %42 : vector<128x256xf32>
    %44 = arith.truncf %43 : vector<128x256xf32> to vector<128x256xbf16>
    %c0_28 = arith.constant 0 : index
    %c1024_29 = arith.constant 1024 : index
    %45 = vector.load %arg4[%c0_28, %c1024_29] : memref<256x1920xbf16, #tpu.memory_space<vmem>>, vector<256x256xbf16>
    %cst_30 = arith.constant dense<0.000000e+00> : vector<128x256xf32>
    %46 = tpu.matmul %44, %45, %cst_30 {dimension_numbers = #tpu.dot_dimension_numbers<[1], [0], [0], [1], [0, 0, 1, 1], [], []>} : vector<128x256xbf16>, vector<256x256xbf16>, vector<128x256xf32> -> vector<128x256xf32>
    %c0_31 = arith.constant 0 : index
    %c1280 = arith.constant 1280 : index
    %47 = vector.load %arg7[%c0_31, %c1280] : memref<1x3072xf32, #tpu.memory_space<vmem>>, vector<1x256xf32>
    %48 = vector.broadcast %47 : vector<1x256xf32> to vector<128x256xf32>
    %49 = arith.addf %46, %48 : vector<128x256xf32>
    %cst_32 = arith.constant 0.000000e+00 : f32
    %50 = vector.broadcast %cst_32 : f32 to vector<128x256xf32>
    %51 = arith.maximumf %49, %50 : vector<128x256xf32>
    %52 = arith.truncf %51 : vector<128x256xf32> to vector<128x256xbf16>
    %c0_33 = arith.constant 0 : index
    %c1280_34 = arith.constant 1280 : index
    %53 = vector.load %arg4[%c0_33, %c1280_34] : memref<256x1920xbf16, #tpu.memory_space<vmem>>, vector<256x256xbf16>
    %cst_35 = arith.constant dense<0.000000e+00> : vector<128x256xf32>
    %54 = tpu.matmul %52, %53, %cst_35 {dimension_numbers = #tpu.dot_dimension_numbers<[1], [0], [0], [1], [0, 0, 1, 1], [], []>} : vector<128x256xbf16>, vector<256x256xbf16>, vector<128x256xf32> -> vector<128x256xf32>
    %c0_36 = arith.constant 0 : index
    %c1536 = arith.constant 1536 : index
    %55 = vector.load %arg7[%c0_36, %c1536] : memref<1x3072xf32, #tpu.memory_space<vmem>>, vector<1x256xf32>
    %56 = vector.broadcast %55 : vector<1x256xf32> to vector<128x256xf32>
    %57 = arith.addf %54, %56 : vector<128x256xf32>
    %cst_37 = arith.constant 0.000000e+00 : f32
    %58 = vector.broadcast %cst_37 : f32 to vector<128x256xf32>
    %59 = arith.maximumf %57, %58 : vector<128x256xf32>
    %60 = arith.truncf %59 : vector<128x256xf32> to vector<128x256xbf16>
    %c0_38 = arith.constant 0 : index
    %c1536_39 = arith.constant 1536 : index
    %61 = vector.load %arg4[%c0_38, %c1536_39] : memref<256x1920xbf16, #tpu.memory_space<vmem>>, vector<256x256xbf16>
    %cst_40 = arith.constant dense<0.000000e+00> : vector<128x256xf32>
    %62 = tpu.matmul %60, %61, %cst_40 {dimension_numbers = #tpu.dot_dimension_numbers<[1], [0], [0], [1], [0, 0, 1, 1], [], []>} : vector<128x256xbf16>, vector<256x256xbf16>, vector<128x256xf32> -> vector<128x256xf32>
    %c0_41 = arith.constant 0 : index
    %c1792 = arith.constant 1792 : index
    %63 = vector.load %arg7[%c0_41, %c1792] : memref<1x3072xf32, #tpu.memory_space<vmem>>, vector<1x256xf32>
    %64 = vector.broadcast %63 : vector<1x256xf32> to vector<128x256xf32>
    %65 = arith.addf %62, %64 : vector<128x256xf32>
    %66 = arith.extf %60 : vector<128x256xbf16> to vector<128x256xf32>
    %c0_42 = arith.constant 0 : index
    %c2304 = arith.constant 2304 : index
    %67 = vector.load %arg7[%c0_42, %c2304] : memref<1x3072xf32, #tpu.memory_space<vmem>>, vector<1x256xf32>
    %68 = vector.broadcast %67 : vector<1x256xf32> to vector<128x256xf32>
    %69 = arith.mulf %66, %68 : vector<128x256xf32>
    %cst_43 = arith.constant dense<0.000000e+00> : vector<128xf32>
    %70 = vector.multi_reduction <add>, %69, %cst_43 [1] : vector<128x256xf32> to vector<128xf32>
    %71 = vector.shape_cast %70 : vector<128xf32> to vector<128x1xf32>
    %c0_44 = arith.constant 0 : index
    %c2816 = arith.constant 2816 : index
    %72 = vector.load %arg7[%c0_44, %c2816] : memref<1x3072xf32, #tpu.memory_space<vmem>>, vector<1x1xf32>
    %73 = vector.broadcast %72 : vector<1x1xf32> to vector<128x1xf32>
    %74 = arith.addf %71, %73 : vector<128x1xf32>
    %cst_45 = arith.constant 0.000000e+00 : f32
    %75 = vector.broadcast %cst_45 : f32 to vector<128x1xf32>
    %76 = arith.maximumf %74, %75 : vector<128x1xf32>
    %cst_46 = arith.constant 0.000000e+00 : f32
    %77 = vector.broadcast %cst_46 : f32 to vector<128x256xf32>
    %78 = arith.maximumf %65, %77 : vector<128x256xf32>
    %79 = arith.truncf %78 : vector<128x256xf32> to vector<128x256xbf16>
    %c0_47 = arith.constant 0 : index
    %c1792_48 = arith.constant 1792 : index
    %80 = vector.load %arg4[%c0_47, %c1792_48] : memref<256x1920xbf16, #tpu.memory_space<vmem>>, vector<256x128xbf16>
    %cst_49 = arith.constant dense<0.000000e+00> : vector<128x128xf32>
    %81 = tpu.matmul %79, %80, %cst_49 {dimension_numbers = #tpu.dot_dimension_numbers<[1], [0], [0], [1], [0, 0, 1, 1], [], []>} : vector<128x256xbf16>, vector<256x128xbf16>, vector<128x128xf32> -> vector<128x128xf32>
    %c0_50 = arith.constant 0 : index
    %c0_51 = arith.constant 0 : index
    %82 = vector.load %arg5[%c0_50, %c0_51] : memref<32x128xbf16, #tpu.memory_space<vmem>>, vector<32x128xbf16>
    %cst_52 = arith.constant dense<0.000000e+00> : vector<128x128xf32>
    %83 = tpu.matmul %1, %82, %cst_52 {dimension_numbers = #tpu.dot_dimension_numbers<[1], [0], [0], [1], [0, 0, 1, 1], [], []>} : vector<128x32xbf16>, vector<32x128xbf16>, vector<128x128xf32> -> vector<128x128xf32>
    %84 = arith.addf %81, %83 : vector<128x128xf32>
    %c0_53 = arith.constant 0 : index
    %c2048 = arith.constant 2048 : index
    %85 = vector.load %arg7[%c0_53, %c2048] : memref<1x3072xf32, #tpu.memory_space<vmem>>, vector<1x128xf32>
    %86 = vector.broadcast %85 : vector<1x128xf32> to vector<128x128xf32>
    %87 = arith.addf %84, %86 : vector<128x128xf32>
    %88 = arith.negf %87 : vector<128x128xf32>
    %89 = math.exp %88 : vector<128x128xf32>
    %cst_54 = arith.constant 1.000000e+00 : f32
    %90 = vector.broadcast %cst_54 : f32 to vector<128x128xf32>
    %91 = arith.addf %90, %89 : vector<128x128xf32>
    %92 = arith.divf %90, %91 : vector<128x128xf32>
    %93 = arith.truncf %92 : vector<128x128xf32> to vector<128x128xbf16>
    %c0_55 = arith.constant 0 : index
    %c0_56 = arith.constant 0 : index
    %94 = vector.load %arg6[%c0_55, %c0_56] : memref<128x4xbf16, #tpu.memory_space<vmem>>, vector<128x4xbf16>
    %cst_57 = arith.constant dense<0.000000e+00> : vector<128x4xf32>
    %95 = tpu.matmul %93, %94, %cst_57 {dimension_numbers = #tpu.dot_dimension_numbers<[1], [0], [0], [1], [0, 0, 1, 1], [], []>} : vector<128x128xbf16>, vector<128x4xbf16>, vector<128x4xf32> -> vector<128x4xf32>
    %c0_58 = arith.constant 0 : index
    %c2560 = arith.constant 2560 : index
    %96 = vector.load %arg7[%c0_58, %c2560] : memref<1x3072xf32, #tpu.memory_space<vmem>>, vector<1x4xf32>
    %97 = vector.broadcast %96 : vector<1x4xf32> to vector<128x4xf32>
    %98 = arith.addf %95, %97 : vector<128x4xf32>
    %99 = arith.negf %98 : vector<128x4xf32>
    %100 = math.exp %99 : vector<128x4xf32>
    %cst_59 = arith.constant 1.000000e+00 : f32
    %101 = vector.broadcast %cst_59 : f32 to vector<128x4xf32>
    %102 = arith.addf %101, %100 : vector<128x4xf32>
    %103 = arith.divf %101, %102 : vector<128x4xf32>
    %104 = tpu.iota {dimensions = array<i32: 1>} : vector<128x4xi32>
    %c3_i32 = arith.constant 3 : i32
    %105 = vector.broadcast %c3_i32 : i32 to vector<128x4xi32>
    %106 = arith.cmpi eq, %104, %105 : vector<128x4xi32>
    %107 = vector.shape_cast %76 : vector<128x1xf32> to vector<128x1xf32>
    %108 = vector.broadcast %107 : vector<128x1xf32> to vector<128x4xf32>
    %109 = arith.select %106, %108, %103 : vector<128x4xi1>, vector<128x4xf32>
    %c0_60 = arith.constant 0 : index
    %c0_61 = arith.constant 0 : index
    %110 = vector.load %arg8[%c0_60, %c0_61] : memref<128x4xf32, #tpu.memory_space<vmem>>, vector<128x4xf32>
    tpu.vector_store %arg8[%c0_60, %c0_61], %109 {strides = array<i32>} : memref<128x4xf32, #tpu.memory_space<vmem>>, vector<128x4xf32>,
    return
  }
  func.func @transform_0(%arg0: i32) -> (i32, i32) {
    %c0_i32 = arith.constant 0 : i32
    %c0_i32_0 = arith.constant 0 : i32
    return %arg0, %c0_i32 : i32, i32
  }
  func.func @transform_1(%arg0: i32) -> (i32, i32) {
    %c0_i32 = arith.constant 0 : i32
    %c0_i32_0 = arith.constant 0 : i32
    return %arg0, %c0_i32 : i32, i32
  }
  func.func @transform_2(%arg0: i32) -> (i32, i32) {
    %c0_i32 = arith.constant 0 : i32
    %c0_i32_0 = arith.constant 0 : i32
    %c0_i32_1 = arith.constant 0 : i32
    return %c0_i32, %c0_i32_0 : i32, i32
  }
  func.func @transform_3(%arg0: i32) -> (i32, i32) {
    %c0_i32 = arith.constant 0 : i32
    %c0_i32_0 = arith.constant 0 : i32
    %c0_i32_1 = arith.constant 0 : i32
    return %c0_i32, %c0_i32_0 : i32, i32
  }
  func.func @transform_4(%arg0: i32) -> (i32, i32) {
    %c0_i32 = arith.constant 0 : i32
    %c0_i32_0 = arith.constant 0 : i32
    %c0_i32_1 = arith.constant 0 : i32
    return %c0_i32, %c0_i32_0 : i32, i32
  }
  func.func @transform_5(%arg0: i32) -> (i32, i32) {
    %c0_i32 = arith.constant 0 : i32
    %c0_i32_0 = arith.constant 0 : i32
    %c0_i32_1 = arith.constant 0 : i32
    return %c0_i32, %c0_i32_0 : i32, i32
  }
  func.func @transform_6(%arg0: i32) -> (i32, i32) {
    %c0_i32 = arith.constant 0 : i32
    %c0_i32_0 = arith.constant 0 : i32
    %c0_i32_1 = arith.constant 0 : i32
    return %c0_i32, %c0_i32_0 : i32, i32
  }
  func.func @transform_7(%arg0: i32) -> (i32, i32) {
    %c0_i32 = arith.constant 0 : i32
    %c0_i32_0 = arith.constant 0 : i32
    return %arg0, %c0_i32 : i32, i32
  }
}

</mosaic_0001>

<bundles_post_ra>
// kernel: nerf_forward.1
= control target key start
LH: loop header
LB: loop body
LE: loop exit
PB: predicated region body
PF: predicated region fallthrough
CT: control target
= control target key end

     0   :  { %s5630_s24 = smov 0   ;;  %s7183_s0 = inlined_call_operand.vmem [shape: bf16[256,64], index: 0, kind: input, shape index: {}]   ;;  %s7184_s1 = inlined_call_operand.vmem [shape: bf16[256,32], index: 1, kind: input, shape index: {}]   ;;  %s7185_s2 = inlined_call_operand.vmem [shape: bf16[64,512], index: 2, kind: input, shape index: {}]   ;;  %s7186_s3 = inlined_call_operand.vmem [shape: bf16[256,1920], index: 3, kind: input, shape index: {}]   ;;  %s7187_s4 = inlined_call_operand.vmem [shape: bf16[32,128], index: 4, kind: input, shape index: {}]   ;;  %s7188_s5 = inlined_call_operand.vmem [shape: bf16[128,4], index: 5, kind: input, shape index: {}]   ;;  %s7189_s6 = inlined_call_operand.vmem [shape: f32[1,3072], index: 6, kind: input, shape index: {}]   ;;  %s7190_s7 = inlined_call_operand.vmem [shape: f32[256,4], index: 7, kind: output, shape index: {}]  }
   0x1 LB: > { %s4544_s25 = sadd.s32 4294967295, %s5587_s24   ;;  %p4548_p0 = scmp.ge.s32.totalorder %s5587_s24, 1  ;;  %s5587_s24 = sphi %s5630_s24, %s17_s24  }
   0x2   : > { %p249_p1 = scmp.lt.s32.totalorder %s5587_s24, 3 }
   0x4   : > { %p250_p2 = pnand %p4548_p0, %p249_p1 }
   0x5   : > { %s4549_s28 = sshll.u32 (!%p250_p2), %s4544_s25, 4 }
   0x6   : > { %253 = sbr.rel (%p250_p2) target bundleno = 2210 (0x8a2), region = 48  ;;  %p287_p3 = scmp.lt.s32.totalorder (!%p250_p2), %s4549_s28, 31 }
   0xb   : > { %v5051_v0 = vld [vmem:[%s7185_s2 + $0x64] ss:$16 sps:$4 sm:$0xff]   ;;  %v5053_v1 = vld [vmem:[%s7185_s2 + $0x60] ss:$16 sps:$4 sm:$0xff]   ;;  %v5589_v2 = vmov 0   ;;  %s7192_s28 = smov (!%p287_p3, %s4549_s28), 31 }
   0xc   : > { %530 = vmatprep.mubr.bf16.mxu0 %v5589_v2  ;;  %643 = vmatprep.mubr.bf16.mxu1 %v5589_v2  ;;  %v5054_v3 = vld [vmem:[%s7185_s2 + $0x44] ss:$16 sps:$4 sm:$0xff]   ;;  %v5056_v4 = vld [vmem:[%s7185_s2 + $0x40] ss:$16 sps:$4 sm:$0xff]   ;;  %s4550_s14 = sshll.u32 %s7192_s28, 2  ;;  %vm473_vm0 = vcmask 523264  }
   0xd   : > { %506 = vmatprep.subr.bf16.mxu0 %v5051_v0  ;;  %5049 = vset.pattern.permute.xlu0 %v5589_v2  ;;  %v5057_v5 = vld [vmem:[%s7185_s2 + $0x24] ss:$16 sps:$4 sm:$0xff]   ;;  %s5665_s17 = scalar_lea.vmem %s7183_s0, %s4550_s14  ;;  %v5059_v6 = vld [vmem:[%s7185_s2 + $0x20] ss:$16 sps:$4 sm:$0xff]   ;;  %v5073_v9 = vld [vmem:[%s7186_s3 + $0x34c] ss:$60 sps:$4 sm:$0xff]   ;;  %s6863_s11 = scalar_lea.vmem %s7184_s1, %s4550_s14 }
   0xe   : > { %507 = vmatpush1.bf16.msra.mxu0 %v5053_v1  ;;  %5050 = vset.pattern.permute.xlu1 %v5589_v2  ;;  %v5060_v7 = vld [vmem:[%s7185_s2 + $0x4] ss:$16 sps:$4 sm:$0xff]   ;;  %v5062_v8 = vld [vmem:[%s7185_s2] ss:$16 sps:$4 sm:$0xff]   ;;  %v5079_v14 = vld [vmem:[%s7186_s3 + $0x25c] ss:$60 sps:$4 sm:$0xff]  }
   0xf   : > { %508 = vmatprep.subr.bf16.mxu0 %v5054_v3  ;;  %v5680_v10 = vld [vmem:[%s5665_s17] sm:$0xff]   ;;  %v5076_v12 = vld [vmem:[%s7186_s3 + $0x2d4] ss:$60 sps:$4 sm:$0xff]   ;;  %v5698_v15 = vld [vmem:[%s5665_s17 + $0x8] sm:$0xff]   ;;  %vm3654_vm1 = vcmask 261120   ;;  %s4554_s27 = sshll.u32 %s7192_s28, 3 }
  0x10   : > { %v5071_v11 = vld [vmem:[%s7186_s3 + $0x348] ss:$60 sps:$4 sm:$0xff]   ;;  %v5074_v13 = vld [vmem:[%s7186_s3 + $0x2d0] ss:$60 sps:$4 sm:$0xff]   ;;  %v5077_v16 = vld [vmem:[%s7186_s3 + $0x258] ss:$60 sps:$4 sm:$0xff]   ;;  %s7105_s8 = scalar_lea.vmem %s7190_s7, %s4554_s27 }
  0x11   : > { %v5082_v17 = vld [vmem:[%s7186_s3 + $0x1e4] ss:$60 sps:$4 sm:$0xff]   ;;  %v5085_v19 = vld [vmem:[%s7186_s3 + $0x16c] ss:$60 sps:$4 sm:$0xff]   ;;  %v5716_v20 = vld [vmem:[%s5665_s17 + $0x10] sm:$0xff]   ;;  %vm4459_vm3 = vcmask 31744  }
  0x12   : > { %509 = vmatpush1.bf16.msra.mxu0 %v5056_v4  ;;  %v5080_v18 = vld [vmem:[%s7186_s3 + $0x1e0] ss:$60 sps:$4 sm:$0xff]   ;;  %v5083_v21 = vld [vmem:[%s7186_s3 + $0x168] ss:$60 sps:$4 sm:$0xff]   ;;  %v5088_v22 = vld [vmem:[%s7186_s3 + $0xf4] ss:$60 sps:$4 sm:$0xff]  }
  0x13   : > { %510 = vmatprep.subr.bf16.mxu0 %v5057_v5  ;;  %v5086_v23 = vld [vmem:[%s7186_s3 + $0xf0] ss:$60 sps:$4 sm:$0xff]   ;;  %v5091_v24 = vld [vmem:[%s7186_s3 + $0x7c] ss:$60 sps:$4 sm:$0xff]   ;;  %v5094_v27 = vld [vmem:[%s7186_s3 + $0x4] ss:$60 sps:$4 sm:$0xff]  }
  0x14   : > { %v5734_v25 = vld [vmem:[%s5665_s17 + $0x18] sm:$0xff]   ;;  %v5097_v29 = vld [vmem:[%s7186_s3 + $0x70c] ss:$60 sps:$4 sm:$0xff]   ;;  %v5752_v30 = vld [vmem:[%s5665_s17 + $0x20] sm:$0xff]  }
  0x15   : > { %v5089_v26 = vld [vmem:[%s7186_s3 + $0x78] ss:$60 sps:$4 sm:$0xff]   ;;  %v5092_v28 = vld [vmem:[%s7186_s3] ss:$60 sps:$4 sm:$0xff]   ;;  %v5095_v31 = vld [vmem:[%s7186_s3 + $0x708] ss:$60 sps:$4 sm:$0xff]  }
  0x16   : > { %511 = vmatpush1.bf16.msra.mxu0 %v5059_v6  ;;  %v5100_v32 = vld [vmem:[%s7186_s3 + $0x694] ss:$60 sps:$4 sm:$0xff]   ;;  %v5103_v34 = vld [vmem:[%s7186_s3 + $0x61c] ss:$60 sps:$4 sm:$0xff]   ;;  %v5770_v35 = vld [vmem:[%s5665_s17 + $0x28] sm:$0xff]  }
  0x17   : > { %512 = vmatprep.subr.bf16.mxu0 %v5060_v7  ;;  %v5098_v33 = vld [vmem:[%s7186_s3 + $0x690] ss:$60 sps:$4 sm:$0xff]   ;;  %v5101_v36 = vld [vmem:[%s7186_s3 + $0x618] ss:$60 sps:$4 sm:$0xff]   ;;  %v5106_v37 = vld [vmem:[%s7186_s3 + $0x5a4] ss:$60 sps:$4 sm:$0xff]  }
  0x18   : > { %v5104_v38 = vld [vmem:[%s7186_s3 + $0x5a0] ss:$60 sps:$4 sm:$0xff]   ;;  %v5109_v39 = vld [vmem:[%s7186_s3 + $0x52c] ss:$60 sps:$4 sm:$0xff]   ;;  %v5788_v40 = vld [vmem:[%s5665_s17 + $0x30] sm:$0xff]  }
  0x19   : > { %v5107_v41 = vld [vmem:[%s7186_s3 + $0x528] ss:$60 sps:$4 sm:$0xff]   ;;  %v5797_v42 = vld [vmem:[%s5665_s17 + $0x38] sm:$0xff]   ;;  %v5112_v43 = vld [vmem:[%s7186_s3 + $0x4b4] ss:$60 sps:$4 sm:$0xff]  }
  0x1a   : > { %513 = vmatpush1.bf16.msra.mxu0 %v5062_v8  ;;  %v5110_v44 = vld [vmem:[%s7186_s3 + $0x4b0] ss:$60 sps:$4 sm:$0xff]   ;;  %v5115_v45 = vld [vmem:[%s7186_s3 + $0x43c] ss:$60 sps:$4 sm:$0xff]   ;;  %v5118_v47 = vld [vmem:[%s7186_s3 + $0x3c4] ss:$60 sps:$4 sm:$0xff]  }
  0x1b   : > { %1020 = vmatprep.subr.bf16.mxu0 %v5073_v9  ;;  %v5113_v46 = vld [vmem:[%s7186_s3 + $0x438] ss:$60 sps:$4 sm:$0xff]   ;;  %v5116_v48 = vld [vmem:[%s7186_s3 + $0x3c0] ss:$60 sps:$4 sm:$0xff]   ;;  %v5131_v58 = vld [vmem:[%s7186_s3 + $0x350] ss:$60 sps:$4 sm:$0xff]  }
  0x1c   : > { %v5119_v49 = vld [vmem:[%s7185_s2 + $0x6c] ss:$16 sps:$4 sm:$0xff]   ;;  %v5121_v50 = vld [vmem:[%s7185_s2 + $0x68] ss:$16 sps:$4 sm:$0xff]   ;;  %v5133_v57 = vld [vmem:[%s7186_s3 + $0x354] ss:$60 sps:$4 sm:$0xff]  }
  0x1d   : > { %4579 = vmatmul.mubr.msk.bf16.vlgmr.msra.gmra.mxu0 %vm473_vm0, %v5680_v10  ;;  %v5122_v51 = vld [vmem:[%s7185_s2 + $0x4c] ss:$16 sps:$4 sm:$0xff]   ;;  %619 = vmatprep.subr.bf16.mxu1 %v5119_v49  ;;  %v5124_v52 = vld [vmem:[%s7185_s2 + $0x48] ss:$16 sps:$4 sm:$0xff]   ;;  %v5139_v61 = vld [vmem:[%s7186_s3 + $0x264] ss:$60 sps:$4 sm:$0xff]  }
  0x1e   : > { %540 = vmatprep.mubr.bf16.mxu0 %v5589_v2  ;;  %1021 = vmatpush1.bf16.msra.mxu0 %v5071_v11  ;;  %v5125_v53 = vld [vmem:[%s7185_s2 + $0x2c] ss:$16 sps:$4 sm:$0xff]   ;;  %v5127_v54 = vld [vmem:[%s7185_s2 + $0x28] ss:$16 sps:$4 sm:$0xff]   ;;  %v5145_v1 = vld [vmem:[%s7186_s3 + $0x174] ss:$60 sps:$4 sm:$0xff]  }
  0x1f   : > { %1022 = vmatprep.subr.bf16.mxu0 %v5076_v12  ;;  %620 = vmatpush1.bf16.msra.mxu1 %v5121_v50  ;;  %v5128_v55 = vld [vmem:[%s7185_s2 + $0xc] ss:$16 sps:$4 sm:$0xff]   ;;  %v5130_v56 = vld [vmem:[%s7185_s2 + $0x8] ss:$16 sps:$4 sm:$0xff]   ;;  %v5151_v6 = vld [vmem:[%s7186_s3 + $0x84] ss:$60 sps:$4 sm:$0xff]   ;;  %v726_v12 = vlaneseq }
  0x20   : > { %621 = vmatprep.subr.bf16.mxu1 %v5122_v51  ;;  %v5136_v59 = vld [vmem:[%s7186_s3 + $0x2dc] ss:$60 sps:$4 sm:$0xff]   ;;  %v5142_v63 = vld [vmem:[%s7186_s3 + $0x1ec] ss:$60 sps:$4 sm:$0xff]  }
  0x21   : > { %v5134_v60 = vld [vmem:[%s7186_s3 + $0x2d8] ss:$60 sps:$4 sm:$0xff]   ;;  %v5137_v62 = vld [vmem:[%s7186_s3 + $0x260] ss:$60 sps:$4 sm:$0xff]   ;;  %v5140_v0 = vld [vmem:[%s7186_s3 + $0x1e8] ss:$60 sps:$4 sm:$0xff]  }
  0x22   : > { %1023 = vmatpush1.bf16.msra.mxu0 %v5074_v13  ;;  %v5143_v3 = vld [vmem:[%s7186_s3 + $0x170] ss:$60 sps:$4 sm:$0xff]   ;;  %v5148_v4 = vld [vmem:[%s7186_s3 + $0xfc] ss:$60 sps:$4 sm:$0xff]   ;;  %v5152_v9 = vld [vmem:[%s7186_s3 + $0x8] ss:$60 sps:$4 sm:$0xff]  }
  0x23   : > { %1024 = vmatprep.subr.bf16.mxu0 %v5079_v14  ;;  %622 = vmatpush1.bf16.msra.mxu1 %v5124_v52  ;;  %v5146_v5 = vld [vmem:[%s7186_s3 + $0xf8] ss:$60 sps:$4 sm:$0xff]   ;;  %v5149_v7 = vld [vmem:[%s7186_s3 + $0x80] ss:$60 sps:$4 sm:$0xff]   ;;  %v5154_v8 = vld [vmem:[%s7186_s3 + $0xc] ss:$60 sps:$4 sm:$0xff]  }
  0x24   : > { %623 = vmatprep.subr.bf16.mxu1 %v5125_v53  ;;  %v5155_v11 = vld [vmem:[%s7186_s3 + $0x710] ss:$60 sps:$4 sm:$0xff]   ;;  %v5160_v13 = vld [vmem:[%s7186_s3 + $0x69c] ss:$60 sps:$4 sm:$0xff]  }
  0x25   : > { %4580 = vmatmul.mubr.msk.bf16.gmra.mxu0 %vm473_vm0, %v5698_v15  ;;  %v5158_v14 = vld [vmem:[%s7186_s3 + $0x698] ss:$60 sps:$4 sm:$0xff]  }
  0x26   : > { %550 = vmatprep.mubr.bf16.mxu0 %v5589_v2  ;;  %1025 = vmatpush1.bf16.msra.mxu0 %v5077_v16  ;;  %v5163_v16 = vld [vmem:[%s7186_s3 + $0x624] ss:$60 sps:$4 sm:$0xff]  }
  0x27   : > { %1026 = vmatprep.subr.bf16.mxu0 %v5082_v17  ;;  %624 = vmatpush1.bf16.msra.mxu1 %v5127_v54 }
  0x28   : > { %625 = vmatprep.subr.bf16.mxu1 %v5128_v55 }
  0x2a   : > { %1027 = vmatpush1.bf16.msra.mxu0 %v5080_v18  ;;  %v5161_v18 = vld [vmem:[%s7186_s3 + $0x620] ss:$60 sps:$4 sm:$0xff]  }
  0x2b   : > { %1028 = vmatprep.subr.bf16.mxu0 %v5085_v19  ;;  %626 = vmatpush1.bf16.msra.mxu1 %v5130_v56 }
  0x2c   : > { %1385 = vmatprep.subr.bf16.mxu1 %v5133_v57 }
  0x2d   : > { %4581 = vmatmul.mubr.msk.bf16.gmra.mxu0 %vm473_vm0, %v5716_v20 }
  0x2e   : > { %560 = vmatprep.mubr.bf16.mxu0 %v5589_v2  ;;  %1029 = vmatpush1.bf16.msra.mxu0 %v5083_v21  ;;  %v724_v21 = vld [vmem:[%s7189_s6] sm:$0x3] }
  0x2f   : > { %1030 = vmatprep.subr.bf16.mxu0 %v5088_v22  ;;  %4587 = vmatmul.mubr.msk.bf16.vlgmr.msra.gmra.mxu1 %vm473_vm0, %v5680_v10  ;;  %v5157_v10 = vld [vmem:[%s7186_s3 + $0x714] ss:$60 sps:$4 sm:$0xff]  }
  0x30   : > { %1386 = vmatpush1.bf16.msra.mxu1 %v5131_v58  ;;  %653 = vmatprep.mubr.bf16.mxu1 %v5589_v2 }
  0x31   : > { %1387 = vmatprep.subr.bf16.mxu1 %v5136_v59 }
  0x32   : > { %1031 = vmatpush1.bf16.msra.mxu0 %v5086_v23 }
  0x33   : > { %1032 = vmatprep.subr.bf16.mxu0 %v5091_v24  ;;  %v5164_v24 = vld [vmem:[%s7186_s3 + $0x5a8] ss:$60 sps:$4 sm:$0xff]  }
  0x34   : > { %1388 = vmatpush1.bf16.msra.mxu1 %v5134_v60 }
  0x35   : > { %4582 = vmatmul.mubr.msk.bf16.gmra.mxu0 %vm473_vm0, %v5734_v25  ;;  %1389 = vmatprep.subr.bf16.mxu1 %v5139_v61 }
  0x36   : > { %570 = vmatprep.mubr.bf16.mxu0 %v5589_v2  ;;  %1033 = vmatpush1.bf16.msra.mxu0 %v5089_v26 }
  0x37   : > { %1034 = vmatprep.subr.bf16.mxu0 %v5094_v27  ;;  %4588 = vmatmul.mubr.msk.bf16.gmra.mxu1 %vm473_vm0, %v5698_v15  ;;  %v727_v15 = vshrl.u32 %v726_v12, 7  ;;  %v5169_v27 = vld [vmem:[%s7186_s3 + $0x534] ss:$60 sps:$4 sm:$0xff]  }
  0x38   : > { %1390 = vmatpush1.bf16.msra.mxu1 %v5137_v62  ;;  %663 = vmatprep.mubr.bf16.mxu1 %v5589_v2 }
  0x39   : > { %1391 = vmatprep.subr.bf16.mxu1 %v5142_v63  ;;  %v5922_v17 = vsub.s32 1, %v727_v15  ;;  %v5927_v19 = vsub.s32 0, %v727_v15 }
  0x3a   : > { %1035 = vmatpush1.bf16.msra.mxu0 %v5092_v28 }
  0x3b   : > { %1036 = vmatprep.subr.bf16.mxu0 %v5097_v29  ;;  %v5938_v23 = vrot.slane %v724_v21, %v5922_v17 }
  0x3c   : > { %1392 = vmatpush1.bf16.msra.mxu1 %v5140_v0 }
  0x3d   : > { %4583 = vmatmul.mubr.msk.bf16.gmra.mxu0 %vm473_vm0, %v5752_v30  ;;  %1393 = vmatprep.subr.bf16.mxu1 %v5145_v1 }
  0x3e   : > { %580 = vmatprep.mubr.bf16.mxu0 %v5589_v2  ;;  %1037 = vmatpush2.bf16.msra.mxu0 %v5095_v31  ;;  %v5167_v31 = vld [vmem:[%s7186_s3 + $0x530] ss:$60 sps:$4 sm:$0xff]  }
  0x3f   : > { %1038 = vmatprep.subr.bf16.mxu0 %v5100_v32  ;;  %4589 = vmatmul.mubr.msk.bf16.gmra.mxu1 %vm473_vm0, %v5716_v20  ;;  %v5166_v20 = vld [vmem:[%s7186_s3 + $0x5ac] ss:$60 sps:$4 sm:$0xff]  }
  0x40   : > { %1394 = vmatpush1.bf16.msra.mxu1 %v5143_v3  ;;  %673 = vmatprep.mubr.bf16.mxu1 %v5589_v2 }
  0x41   : > { %1395 = vmatprep.subr.bf16.mxu1 %v5148_v4 }
  0x42   : > { %1039 = vmatpush2.bf16.msra.mxu0 %v5098_v33 }
  0x43   : > { %1040 = vmatprep.subr.bf16.mxu0 %v5103_v34 }
  0x44   : > { %1396 = vmatpush1.bf16.msra.mxu1 %v5146_v5 }
  0x45   : > { %4584 = vmatmul.mubr.msk.bf16.gmra.mxu0 %vm473_vm0, %v5770_v35  ;;  %1397 = vmatprep.subr.bf16.mxu1 %v5151_v6 }
  0x46   : > { %590 = vmatprep.mubr.bf16.mxu0 %v5589_v2  ;;  %1041 = vmatpush2.bf16.msra.mxu0 %v5101_v36 }
  0x47   : > { %1042 = vmatprep.subr.bf16.mxu0 %v5106_v37  ;;  %4590 = vmatmul.mubr.msk.bf16.gmra.mxu1 %vm473_vm0, %v5734_v25  ;;  %v5945_v25 = vrot.slane %v724_v21, %v5927_v19 }
  0x48   : > { %1398 = vmatpush1.bf16.msra.mxu1 %v5149_v7  ;;  %683 = vmatprep.mubr.bf16.mxu1 %v5589_v2 }
  0x49   : > { %1399 = vmatprep.subr.bf16.mxu1 %v5154_v8 }
  0x4a   : > { %1043 = vmatpush2.bf16.msra.mxu0 %v5104_v38 }
  0x4b   : > { %1044 = vmatprep.subr.bf16.mxu0 %v5109_v39 }
  0x4c   : > { %1400 = vmatpush1.bf16.msra.mxu1 %v5152_v9 }
  0x4d   : > { %4585 = vmatmul.mubr.msk.bf16.gmra.mxu0 %vm473_vm0, %v5788_v40  ;;  %1401 = vmatprep.subr.bf16.mxu1 %v5157_v10 }
  0x4e   : > { %600 = vmatprep.mubr.bf16.mxu0 %v5589_v2  ;;  %1045 = vmatpush2.bf16.msra.mxu0 %v5107_v41 }
  0x4f   : > { %1046 = vmatprep.subr.bf16.mxu0 %v5112_v43  ;;  %4591 = vmatmul.mubr.msk.bf16.gmra.mxu1 %vm473_vm0, %v5752_v30 }
  0x50   : > { %1402 = vmatpush2.bf16.msra.mxu1 %v5155_v11  ;;  %693 = vmatprep.mubr.bf16.mxu1 %v5589_v2 }
  0x51   : > { %1403 = vmatprep.subr.bf16.mxu1 %v5160_v13 }
  0x52   : > { %1047 = vmatpush2.bf16.msra.mxu0 %v5110_v44 }
  0x53   : > { %1048 = vmatprep.subr.bf16.mxu0 %v5115_v45 }
  0x54   : > { %1404 = vmatpush2.bf16.msra.mxu1 %v5158_v14 }
  0x55   : > { %4586 = vmatmul.mubr.msk.bf16.gmra.mxu0 %vm473_vm0, %v5797_v42  ;;  %1405 = vmatprep.subr.bf16.mxu1 %v5163_v16 }
  0x56   : > { %1049 = vmatpush2.bf16.msra.mxu0 %v5113_v46 }
  0x57   : > { %1050 = vmatprep.subr.bf16.mxu0 %v5118_v47  ;;  %4592 = vmatmul.mubr.msk.bf16.gmra.mxu1 %vm473_vm0, %v5770_v35 }
  0x58   : > { %1406 = vmatpush2.bf16.msra.mxu1 %v5161_v18  ;;  %703 = vmatprep.mubr.bf16.mxu1 %v5589_v2 }
  0x59   : > { %1407 = vmatprep.subr.bf16.mxu1 %v5166_v20 }
  0x5a   : > { %1051 = vmatpush2.bf16.msra.mxu0 %v5116_v48 }
  0x5c   : > { %1408 = vmatpush2.bf16.msra.mxu1 %v5164_v24 }
  0x5d   : > { %1409 = vmatprep.subr.bf16.mxu1 %v5169_v27 }
  0x5f   : > { %4593 = vmatmul.mubr.msk.bf16.gmra.mxu1 %vm473_vm0, %v5788_v40 }
  0x60   : > { %1410 = vmatpush2.bf16.msra.mxu1 %v5167_v31  ;;  %713 = vmatprep.mubr.bf16.mxu1 %v5589_v2 }
  0x67   : > { %4594 = vmatmul.mubr.msk.bf16.gmra.mxu1 %vm473_vm0, %v5797_v42 }
  0xdd   : > { %v532_v22 = vpop.f32.mrf.mxu0 }
  0xde   : > { %v736_v32 = vadd.f32 %v5945_v25, %v532_v22 }
  0xdf   : > { %v534_v26 = vpop.f32.mrf.mxu0 }
  0xe0   : > { %v737_v29 = vadd.f32 %v5938_v23, %v534_v26  ;;  %v768_v39 = vmax.f32 %v736_v32, 0.0 }
  0xe1   : > { %v536_v28 = vpop.f32.mrf.mxu0 }
  0xe2   : > { %v738_v30 = vadd.f32 %v5945_v25, %v536_v28  ;;  %v769_v37 = vmax.f32 %v737_v29, 0.0 }
  0xe3   : > { %v538_v33 = vpop.f32.mrf.mxu0 }
  0xe4   : > { %v739_v34 = vadd.f32 %v5938_v23, %v538_v33  ;;  %v770_v35 = vmax.f32 %v738_v30, 0.0 }
  0xe5   : > { %v542_v36 = vpop.f32.mrf.mxu0 }
  0xe6   : > { %v771_v38 = vmax.f32 %v739_v34, 0.0  ;;  %v800_v44 = vpack.c.bf16 %v770_v35, %v768_v39  ;;  %v740_v48 = vadd.f32 %v5945_v25, %v542_v36 }
  0xe7   : > { %v544_v41 = vpop.f32.mrf.mxu0 }
  0xe8   : > { %v801_v43 = vpack.c.bf16 %v771_v38, %v769_v37  ;;  %v741_v46 = vadd.f32 %v5938_v23, %v544_v41  ;;  %v772_v53 = vmax.f32 %v740_v48, 0.0 }
  0xe9   : > { %v546_v45 = vpop.f32.mrf.mxu0 }
  0xea   : > { %v742_v47 = vadd.f32 %v5945_v25, %v546_v45  ;;  %1052 = vmatprep.mubr.bf16.mxu0 %v801_v43  ;;  %v773_v2 = vmax.f32 %v741_v46, 0.0 }
  0xeb   : > { %v548_v49 = vpop.f32.mrf.mxu0  ;;  %1053 = vmatmul.mubr.bf16.vlgmr.msra.gmra.mxu0 %v800_v44 }
  0xec   : > { %v743_v40 = vadd.f32 %v5938_v23, %v548_v49  ;;  %v774_v50 = vmax.f32 %v742_v47, 0.0 }
  0xed   : > { %v552_v51 = vpop.f32.mrf.mxu0 }
  0xee   : > { %v775_v52 = vmax.f32 %v743_v40, 0.0  ;;  %v802_v56 = vpack.c.bf16 %v774_v50, %v772_v53  ;;  %v744_v60 = vadd.f32 %v5945_v25, %v552_v51 }
  0xef   : > { %v554_v54 = vpop.f32.mrf.mxu0 }
  0xf0   : > { %v803_v55 = vpack.c.bf16 %v775_v52, %v773_v2  ;;  %v745_v58 = vadd.f32 %v5938_v23, %v554_v54  ;;  %v776_v3 = vmax.f32 %v744_v60, 0.0 }
  0xf1   : > { %v556_v57 = vpop.f32.mrf.mxu0 }
  0xf2   : > { %v746_v59 = vadd.f32 %v5945_v25, %v556_v57  ;;  %1062 = vmatprep.mubr.bf16.mxu0 %v803_v55  ;;  %v777_v0 = vmax.f32 %v745_v58, 0.0 }
  0xf3   : > { %v558_v61 = vpop.f32.mrf.mxu0  ;;  %1063 = vmatmul.mubr.bf16.gmra.mxu0 %v802_v56 }
  0xf4   : > { %v747_v62 = vadd.f32 %v5938_v23, %v558_v61  ;;  %v778_v63 = vmax.f32 %v746_v59, 0.0 }
  0xf5   : > { %v562_v42 = vpop.f32.mrf.mxu0 }
  0xf6   : > { %v779_v1 = vmax.f32 %v747_v62, 0.0  ;;  %v804_v6 = vpack.c.bf16 %v778_v63, %v776_v3  ;;  %v748_v10 = vadd.f32 %v5945_v25, %v562_v42 }
  0xf7   : > { %v564_v4 = vpop.f32.mrf.mxu0 }
  0xf8   : > { %v805_v5 = vpack.c.bf16 %v779_v1, %v777_v0  ;;  %v749_v8 = vadd.f32 %v5938_v23, %v564_v4  ;;  %v780_v20 = vmax.f32 %v748_v10, 0.0 }
  0xf9   : > { %v566_v7 = vpop.f32.mrf.mxu0 }
  0xfa   : > { %v750_v9 = vadd.f32 %v5945_v25, %v566_v7  ;;  %1072 = vmatprep.mubr.bf16.mxu0 %v805_v5  ;;  %v781_v16 = vmax.f32 %v749_v8, 0.0 }
  0xfb   : > { %v568_v11 = vpop.f32.mrf.mxu0  ;;  %1073 = vmatmul.mubr.bf16.gmra.mxu0 %v804_v6 }
  0xfc   : > { %v751_v13 = vadd.f32 %v5938_v23, %v568_v11  ;;  %v782_v14 = vmax.f32 %v750_v9, 0.0 }
  0xfd   : > { %v572_v15 = vpop.f32.mrf.mxu0 }
  0xfe   : > { %v783_v18 = vmax.f32 %v751_v13, 0.0  ;;  %v806_v24 = vpack.c.bf16 %v782_v14, %v780_v20  ;;  %v752_v29 = vadd.f32 %v5945_v25, %v572_v15  ;;  %v5173_v20 = vld [vmem:[%s7186_s3 + $0x440] ss:$60 sps:$4 sm:$0xff]  }
  0xff   : > { %v574_v21 = vpop.f32.mrf.mxu0 }
 0x100   : > { %v807_v22 = vpack.c.bf16 %v783_v18, %v781_v16  ;;  %v753_v27 = vadd.f32 %v5938_v23, %v574_v21  ;;  %v784_v36 = vmax.f32 %v752_v29, 0.0  ;;  %v5172_v18 = vld [vmem:[%s7186_s3 + $0x4bc] ss:$60 sps:$4 sm:$0xff]   ;;  %v5178_v21 = vld [vmem:[%s7186_s3 + $0x3cc] ss:$60 sps:$4 sm:$0xff]  }
 0x101   : > { %v576_v26 = vpop.f32.mrf.mxu0  ;;  %1411 = vmatprep.subr.bf16.mxu1 %v5172_v18  ;;  %v5187_v29 = vld [vmem:[%s7186_s3 + $0x26c] ss:$60 sps:$4 sm:$0xff]  }
 0x102   : > { %v754_v28 = vadd.f32 %v5945_v25, %v576_v26  ;;  %1082 = vmatprep.mubr.bf16.mxu0 %v807_v22  ;;  %v785_v34 = vmax.f32 %v753_v27, 0.0  ;;  %v5176_v22 = vld [vmem:[%s7186_s3 + $0x3c8] ss:$60 sps:$4 sm:$0xff]   ;;  %v5181_v26 = vld [vmem:[%s7186_s3 + $0x35c] ss:$60 sps:$4 sm:$0xff]  }
 0x103   : > { %v578_v30 = vpop.f32.mrf.mxu0  ;;  %1083 = vmatmul.mubr.bf16.gmra.mxu0 %v806_v24  ;;  %v5179_v24 = vld [vmem:[%s7186_s3 + $0x358] ss:$60 sps:$4 sm:$0xff]   ;;  %v5184_v27 = vld [vmem:[%s7186_s3 + $0x2e4] ss:$60 sps:$4 sm:$0xff]   ;;  %1750 = vmatprep.subr.bf16.mxu0 %v5181_v26 }
 0x104   : > { %v755_v31 = vadd.f32 %v5938_v23, %v578_v30  ;;  %v786_v32 = vmax.f32 %v754_v28, 0.0  ;;  %1751 = vmatpush1.bf16.msra.mxu0 %v5179_v24  ;;  %v5182_v28 = vld [vmem:[%s7186_s3 + $0x2e0] ss:$60 sps:$4 sm:$0xff]   ;;  %v5185_v30 = vld [vmem:[%s7186_s3 + $0x268] ss:$60 sps:$4 sm:$0xff]  }
 0x105   : > { %v582_v33 = vpop.f32.mrf.mxu0  ;;  %1752 = vmatprep.subr.bf16.mxu0 %v5184_v27 }
 0x106   : > { %v787_v35 = vmax.f32 %v755_v31, 0.0  ;;  %v808_v39 = vpack.c.bf16 %v786_v32, %v784_v36  ;;  %v756_v45 = vadd.f32 %v5945_v25, %v582_v33  ;;  %v5190_v31 = vld [vmem:[%s7186_s3 + $0x1f4] ss:$60 sps:$4 sm:$0xff]   ;;  %v5193_v33 = vld [vmem:[%s7186_s3 + $0x17c] ss:$60 sps:$4 sm:$0xff]  }
 0x107   : > { %v584_v37 = vpop.f32.mrf.mxu0  ;;  %v5188_v32 = vld [vmem:[%s7186_s3 + $0x1f0] ss:$60 sps:$4 sm:$0xff]   ;;  %v5194_v36 = vld [vmem:[%s7186_s3 + $0x100] ss:$60 sps:$4 sm:$0xff]  }
 0x108   : > { %v809_v38 = vpack.c.bf16 %v787_v35, %v785_v34  ;;  %v757_v43 = vadd.f32 %v5938_v23, %v584_v37  ;;  %v788_v51 = vmax.f32 %v756_v45, 0.0  ;;  %1753 = vmatpush1.bf16.msra.mxu0 %v5182_v28  ;;  %v5191_v34 = vld [vmem:[%s7186_s3 + $0x178] ss:$60 sps:$4 sm:$0xff]   ;;  %v5196_v35 = vld [vmem:[%s7186_s3 + $0x104] ss:$60 sps:$4 sm:$0xff]  }
 0x109   : > { %v586_v41 = vpop.f32.mrf.mxu0  ;;  %1754 = vmatprep.subr.bf16.mxu0 %v5187_v29  ;;  %v5199_v37 = vld [vmem:[%s7186_s3 + $0x8c] ss:$60 sps:$4 sm:$0xff]   ;;  %v5208_v45 = vld [vmem:[%s7186_s3 + $0x6a4] ss:$60 sps:$4 sm:$0xff]  }
 0x10a   : > { %v758_v44 = vadd.f32 %v5945_v25, %v586_v41  ;;  %1092 = vmatprep.mubr.bf16.mxu0 %v809_v38  ;;  %v789_v40 = vmax.f32 %v757_v43, 0.0  ;;  %v5197_v38 = vld [vmem:[%s7186_s3 + $0x88] ss:$60 sps:$4 sm:$0xff]   ;;  %v5200_v41 = vld [vmem:[%s7186_s3 + $0x10] ss:$60 sps:$4 sm:$0xff]  }
 0x10b   : > { %v588_v46 = vpop.f32.mrf.mxu0  ;;  %1093 = vmatmul.mubr.bf16.gmra.mxu0 %v808_v39  ;;  %v5202_v39 = vld [vmem:[%s7186_s3 + $0x14] ss:$60 sps:$4 sm:$0xff]   ;;  %v5205_v43 = vld [vmem:[%s7186_s3 + $0x71c] ss:$60 sps:$4 sm:$0xff]  }
 0x10c   : > { %v759_v47 = vadd.f32 %v5938_v23, %v588_v46  ;;  %v790_v48 = vmax.f32 %v758_v44, 0.0  ;;  %1755 = vmatpush1.bf16.msra.mxu0 %v5185_v30  ;;  %v5203_v44 = vld [vmem:[%s7186_s3 + $0x718] ss:$60 sps:$4 sm:$0xff]   ;;  %v5206_v46 = vld [vmem:[%s7186_s3 + $0x6a0] ss:$60 sps:$4 sm:$0xff]  }
 0x10d   : > { %v592_v49 = vpop.f32.mrf.mxu0  ;;  %1756 = vmatprep.subr.bf16.mxu0 %v5190_v31 }
 0x10e   : > { %v791_v50 = vmax.f32 %v759_v47, 0.0  ;;  %v810_v53 = vpack.c.bf16 %v790_v48, %v788_v51  ;;  %v760_v57 = vadd.f32 %v5945_v25, %v592_v49  ;;  %v5211_v47 = vld [vmem:[%s7186_s3 + $0x62c] ss:$60 sps:$4 sm:$0xff]   ;;  %v5214_v49 = vld [vmem:[%s7186_s3 + $0x5b4] ss:$60 sps:$4 sm:$0xff]  }
 0x10f   : > { %v594_v2 = vpop.f32.mrf.mxu0  ;;  %v5209_v48 = vld [vmem:[%s7186_s3 + $0x628] ss:$60 sps:$4 sm:$0xff]   ;;  %v5215_v51 = vld [vmem:[%s7186_s3 + $0x538] ss:$60 sps:$4 sm:$0xff]  }
 0x110   : > { %v811_v52 = vpack.c.bf16 %v791_v50, %v789_v40  ;;  %v761_v55 = vadd.f32 %v5938_v23, %v594_v2  ;;  %v792_v42 = vmax.f32 %v760_v57, 0.0  ;;  %1757 = vmatpush1.bf16.msra.mxu0 %v5188_v32  ;;  %v5212_v40 = vld [vmem:[%s7186_s3 + $0x5b0] ss:$60 sps:$4 sm:$0xff]   ;;  %v5217_v50 = vld [vmem:[%s7186_s3 + $0x53c] ss:$60 sps:$4 sm:$0xff]  }
 0x111   : > { %v596_v54 = vpop.f32.mrf.mxu0  ;;  %1758 = vmatprep.subr.bf16.mxu0 %v5193_v33  ;;  %v848_v2 = vld [vmem:[%s7189_s6 + $0x2] sm:$0x3] }
 0x112   : > { %v762_v56 = vadd.f32 %v5945_v25, %v596_v54  ;;  %1102 = vmatprep.mubr.bf16.mxu0 %v811_v52  ;;  %v793_v62 = vmax.f32 %v761_v55, 0.0  ;;  %v6093_v54 = vrot.slane %v848_v2, %v5927_v19 }
 0x113   : > { %v598_v58 = vpop.f32.mrf.mxu0  ;;  %1103 = vmatmul.mubr.bf16.gmra.mxu0 %v810_v53  ;;  %v6090_v53 = vrot.slane %v848_v2, %v5922_v17 }
 0x114   : > { %v763_v59 = vadd.f32 %v5938_v23, %v598_v58  ;;  %v794_v60 = vmax.f32 %v762_v56, 0.0  ;;  %1759 = vmatpush1.bf16.msra.mxu0 %v5191_v34 }
 0x115   : > { %v602_v61 = vpop.f32.mrf.mxu0  ;;  %1760 = vmatprep.subr.bf16.mxu0 %v5196_v35 }
 0x116   : > { %v795_v63 = vmax.f32 %v763_v59, 0.0  ;;  %v812_v3 = vpack.c.bf16 %v794_v60, %v792_v42  ;;  %v764_v7 = vadd.f32 %v5945_v25, %v602_v61 }
 0x117   : > { %v604_v0 = vpop.f32.mrf.mxu0 }
 0x118   : > { %v813_v1 = vpack.c.bf16 %v795_v63, %v793_v62  ;;  %v765_v5 = vadd.f32 %v5938_v23, %v604_v0  ;;  %v796_v14 = vmax.f32 %v764_v7, 0.0  ;;  %1761 = vmatpush1.bf16.msra.mxu0 %v5194_v36 }
 0x119   : > { %v606_v4 = vpop.f32.mrf.mxu0  ;;  %1762 = vmatprep.subr.bf16.mxu0 %v5199_v37 }
 0x11a   : > { %v766_v6 = vadd.f32 %v5945_v25, %v606_v4  ;;  %1112 = vmatprep.mubr.bf16.mxu0 %v813_v1  ;;  %v797_v11 = vmax.f32 %v765_v5, 0.0  ;;  %v5170_v25 = vld [vmem:[%s7186_s3 + $0x4b8] ss:$60 sps:$4 sm:$0xff]  }
 0x11b   : > { %v608_v8 = vpop.f32.mrf.mxu0  ;;  %1113 = vmatmul.mubr.bf16.gmra.mxu0 %v812_v3  ;;  %1412 = vmatpush2.bf16.msra.mxu1 %v5170_v25 }
 0x11c   : > { %v767_v9 = vadd.f32 %v5938_v23, %v608_v8  ;;  %v798_v10 = vmax.f32 %v766_v6, 0.0  ;;  %v5175_v23 = vld [vmem:[%s7186_s3 + $0x444] ss:$60 sps:$4 sm:$0xff]   ;;  %1763 = vmatpush1.bf16.msra.mxu0 %v5197_v38 }
 0x11d   : > { %1413 = vmatprep.subr.bf16.mxu1 %v5175_v23  ;;  %1764 = vmatprep.subr.bf16.mxu0 %v5202_v39 }
 0x11e   : > { %v799_v13 = vmax.f32 %v767_v9, 0.0  ;;  %v814_v16 = vpack.c.bf16 %v798_v10, %v796_v14 }
 0x11f   : > { %1414 = vmatpush2.bf16.msra.mxu1 %v5173_v20 }
 0x120   : > { %v815_v15 = vpack.c.bf16 %v799_v13, %v797_v11  ;;  %1415 = vmatprep.subr.bf16.mxu1 %v5178_v21  ;;  %1765 = vmatpush1.bf16.msra.mxu0 %v5200_v41 }
 0x121   : > { %1766 = vmatprep.subr.bf16.mxu0 %v5205_v43 }
 0x122   : > { %1122 = vmatprep.mubr.bf16.mxu0 %v815_v15 }
 0x123   : > { %1123 = vmatmul.mubr.bf16.gmra.mxu0 %v814_v16  ;;  %1416 = vmatpush2.bf16.msra.mxu1 %v5176_v22 }
 0x124   : > { %1767 = vmatpush2.bf16.msra.mxu0 %v5203_v44 }
 0x125   : > { %1768 = vmatprep.subr.bf16.mxu0 %v5208_v45 }
 0x128   : > { %1769 = vmatpush2.bf16.msra.mxu0 %v5206_v46 }
 0x129   : > { %1770 = vmatprep.subr.bf16.mxu0 %v5211_v47 }
 0x12c   : > { %1771 = vmatpush2.bf16.msra.mxu0 %v5209_v48 }
 0x12d   : > { %1772 = vmatprep.subr.bf16.mxu0 %v5214_v49 }
 0x130   : > { %1773 = vmatpush2.bf16.msra.mxu0 %v5212_v40 }
 0x131   : > { %1774 = vmatprep.subr.bf16.mxu0 %v5217_v50 }
 0x134   : > { %1775 = vmatpush2.bf16.msra.mxu0 %v5215_v51 }
 0x1ab   : > { %v1054_v52 = vpop.f32.mrf.mxu0 }
 0x1ac   : > { %v1055_v59 = vadd.f32 %v1054_v52, %v6093_v54 }
 0x1ad   : > { %v1056_v55 = vpop.f32.mrf.mxu0 }
 0x1ae   : > { %v1057_v57 = vadd.f32 %v1056_v55, %v6090_v53  ;;  %v1133_v1 = vmax.f32 %v1055_v59, 0.0 }
 0x1af   : > { %v1058_v56 = vpop.f32.mrf.mxu0 }
 0x1b0   : > { %v1059_v58 = vadd.f32 %v1058_v56, %v6093_v54  ;;  %v1134_v42 = vmax.f32 %v1057_v57, 0.0 }
 0x1b1   : > { %v1060_v60 = vpop.f32.mrf.mxu0 }
 0x1b2   : > { %v1061_v61 = vadd.f32 %v1060_v60, %v6090_v53  ;;  %v1135_v62 = vmax.f32 %v1059_v58, 0.0 }
 0x1b3   : > { %v1064_v63 = vpop.f32.mrf.mxu0 }
 0x1b4   : > { %v1136_v0 = vmax.f32 %v1061_v61, 0.0  ;;  %v1165_v5 = vpack.c.bf16 %v1135_v62, %v1133_v1  ;;  %v1065_v9 = vadd.f32 %v1064_v63, %v6093_v54 }
 0x1b5   : > { %v1066_v3 = vpop.f32.mrf.mxu0 }
 0x1b6   : > { %v1166_v4 = vpack.c.bf16 %v1136_v0, %v1134_v42  ;;  %v1067_v7 = vadd.f32 %v1066_v3, %v6090_v53  ;;  %v1137_v18 = vmax.f32 %v1065_v9, 0.0 }
 0x1b7   : > { %v1068_v6 = vpop.f32.mrf.mxu0 }
 0x1b8   : > { %v1069_v8 = vadd.f32 %v1068_v6, %v6093_v54  ;;  %1417 = vmatprep.mubr.bf16.mxu1 %v1166_v4  ;;  %v1138_v15 = vmax.f32 %v1067_v7, 0.0 }
 0x1b9   : > { %v1070_v10 = vpop.f32.mrf.mxu0  ;;  %1418 = vmatmul.mubr.bf16.vlgmr.msra.gmra.mxu1 %v1165_v5 }
 0x1ba   : > { %v1071_v11 = vadd.f32 %v1070_v10, %v6090_v53  ;;  %v1139_v13 = vmax.f32 %v1069_v8, 0.0 }
 0x1bb   : > { %v1074_v14 = vpop.f32.mrf.mxu0 }
 0x1bc   : > { %v1140_v16 = vmax.f32 %v1071_v11, 0.0  ;;  %v1167_v20 = vpack.c.bf16 %v1139_v13, %v1137_v18  ;;  %v1075_v26 = vadd.f32 %v1074_v14, %v6093_v54 }
 0x1bd   : > { %v1076_v25 = vpop.f32.mrf.mxu0 }
 0x1be   : > { %v1168_v23 = vpack.c.bf16 %v1140_v16, %v1138_v15  ;;  %v1077_v22 = vadd.f32 %v1076_v25, %v6090_v53  ;;  %v1141_v33 = vmax.f32 %v1075_v26, 0.0 }
 0x1bf   : > { %v1078_v21 = vpop.f32.mrf.mxu0 }
 0x1c0   : > { %v1079_v24 = vadd.f32 %v1078_v21, %v6093_v54  ;;  %1427 = vmatprep.mubr.bf16.mxu1 %v1168_v23  ;;  %v1142_v31 = vmax.f32 %v1077_v22, 0.0 }
 0x1c1   : > { %v1080_v27 = vpop.f32.mrf.mxu0  ;;  %1428 = vmatmul.mubr.bf16.gmra.mxu1 %v1167_v20 }
 0x1c2   : > { %v1081_v28 = vadd.f32 %v1080_v27, %v6090_v53  ;;  %v1143_v29 = vmax.f32 %v1079_v24, 0.0 }
 0x1c3   : > { %v1084_v30 = vpop.f32.mrf.mxu0 }
 0x1c4   : > { %v1144_v32 = vmax.f32 %v1081_v28, 0.0  ;;  %v1169_v36 = vpack.c.bf16 %v1143_v29, %v1141_v33  ;;  %v1085_v41 = vadd.f32 %v1084_v30, %v6093_v54 }
 0x1c5   : > { %v1086_v34 = vpop.f32.mrf.mxu0 }
 0x1c6   : > { %v1170_v35 = vpack.c.bf16 %v1144_v32, %v1142_v31  ;;  %v1087_v38 = vadd.f32 %v1086_v34, %v6090_v53  ;;  %v1145_v49 = vmax.f32 %v1085_v41, 0.0 }
 0x1c7   : > { %v1088_v37 = vpop.f32.mrf.mxu0 }
 0x1c8   : > { %v1089_v39 = vadd.f32 %v1088_v37, %v6093_v54  ;;  %1437 = vmatprep.mubr.bf16.mxu1 %v1170_v35  ;;  %v1146_v47 = vmax.f32 %v1087_v38, 0.0 }
 0x1c9   : > { %v1090_v43 = vpop.f32.mrf.mxu0  ;;  %1438 = vmatmul.mubr.bf16.gmra.mxu1 %v1169_v36 }
 0x1ca   : > { %v1091_v44 = vadd.f32 %v1090_v43, %v6090_v53  ;;  %v1147_v45 = vmax.f32 %v1089_v39, 0.0 }
 0x1cb   : > { %v1094_v46 = vpop.f32.mrf.mxu0 }
 0x1cc   : > { %v1148_v48 = vmax.f32 %v1091_v44, 0.0  ;;  %v1171_v51 = vpack.c.bf16 %v1147_v45, %v1145_v49  ;;  %v1095_v56 = vadd.f32 %v1094_v46, %v6093_v54  ;;  %v6133_v49 = vpop.f32.mrf.mxu1 }
 0x1cd   : > { %v1096_v40 = vpop.f32.mrf.mxu0 }
 0x1ce   : > { %v1172_v50 = vpack.c.bf16 %v1148_v48, %v1146_v47  ;;  %v1097_v52 = vadd.f32 %v1096_v40, %v6090_v53  ;;  %v1149_v63 = vmax.f32 %v1095_v56, 0.0  ;;  %v5220_v48 = vld [vmem:[%s7186_s3 + $0x4c4] ss:$60 sps:$4 sm:$0xff]  }
 0x1cf   : > { %v1098_v2 = vpop.f32.mrf.mxu0  ;;  %1776 = vmatprep.subr.bf16.mxu0 %v5220_v48  ;;  %v5221_v40 = vld [vmem:[%s7186_s3 + $0x448] ss:$60 sps:$4 sm:$0xff]  }
 0x1d0   : > { %v1099_v55 = vadd.f32 %v1098_v2, %v6093_v54  ;;  %1447 = vmatprep.mubr.bf16.mxu1 %v1172_v50  ;;  %v1150_v61 = vmax.f32 %v1097_v52, 0.0  ;;  %v6141_v50 = vpop.f32.mrf.mxu1  ;;  %v5224_v2 = vld [vmem:[%s7186_s3 + $0x3d0] ss:$60 sps:$4 sm:$0xff]  }
 0x1d1   : > { %v1100_v57 = vpop.f32.mrf.mxu0  ;;  %1448 = vmatmul.mubr.bf16.gmra.mxu1 %v1171_v51  ;;  %v5226_v51 = vld [vmem:[%s7186_s3 + $0x3d4] ss:$60 sps:$4 sm:$0xff]  }
 0x1d2   : > { %v1101_v58 = vadd.f32 %v1100_v57, %v6090_v53  ;;  %v1151_v59 = vmax.f32 %v1099_v55, 0.0  ;;  %v6149_v52 = vpop.f32.mrf.mxu1 }
 0x1d3   : > { %v1104_v60 = vpop.f32.mrf.mxu0 }
 0x1d4   : > { %v1152_v62 = vmax.f32 %v1101_v58, 0.0  ;;  %v1173_v1 = vpack.c.bf16 %v1151_v59, %v1149_v63  ;;  %v1105_v6 = vadd.f32 %v1104_v60, %v6093_v54  ;;  %v6151_v55 = vpop.f32.mrf.mxu1 }
 0x1d5   : > { %v1106_v42 = vpop.f32.mrf.mxu0 }
 0x1d6   : > { %v1174_v0 = vpack.c.bf16 %v1152_v62, %v1150_v61  ;;  %v1107_v4 = vadd.f32 %v1106_v42, %v6090_v53  ;;  %v1153_v14 = vmax.f32 %v1105_v6, 0.0  ;;  %v6153_v56 = vpop.f32.mrf.mxu1  ;;  %v5227_v6 = vld [vmem:[%s7186_s3 + $0x360] ss:$60 sps:$4 sm:$0xff]  }
 0x1d7   : > { %v1108_v3 = vpop.f32.mrf.mxu0 }
 0x1d8   : > { %v1109_v5 = vadd.f32 %v1108_v3, %v6093_v54  ;;  %1457 = vmatprep.mubr.bf16.mxu1 %v1174_v0  ;;  %v1154_v11 = vmax.f32 %v1107_v4, 0.0  ;;  %v6155_v57 = vpop.f32.mrf.mxu1 }
 0x1d9   : > { %v1110_v7 = vpop.f32.mrf.mxu0  ;;  %1458 = vmatmul.mubr.bf16.gmra.mxu1 %v1173_v1 }
 0x1da   : > { %v1111_v8 = vadd.f32 %v1110_v7, %v6090_v53  ;;  %v1155_v9 = vmax.f32 %v1109_v5, 0.0  ;;  %v6157_v58 = vpop.f32.mrf.mxu1  ;;  %v5229_v7 = vld [vmem:[%s7186_s3 + $0x364] ss:$60 sps:$4 sm:$0xff]  }
 0x1db   : > { %v1114_v10 = vpop.f32.mrf.mxu0  ;;  %2103 = vmatprep.subr.bf16.mxu1 %v5229_v7 }
 0x1dc   : > { %v1156_v13 = vmax.f32 %v1111_v8, 0.0  ;;  %v1175_v18 = vpack.c.bf16 %v1155_v9, %v1153_v14  ;;  %v1115_v21 = vadd.f32 %v1114_v10, %v6093_v54  ;;  %v6159_v59 = vpop.f32.mrf.mxu1  ;;  %v5232_v8 = vld [vmem:[%s7186_s3 + $0x2ec] ss:$60 sps:$4 sm:$0xff]   ;;  %2104 = vmatpush1.bf16.msra.mxu1 %v5227_v6 }
 0x1dd   : > { %v1116_v15 = vpop.f32.mrf.mxu0  ;;  %v5230_v9 = vld [vmem:[%s7186_s3 + $0x2e8] ss:$60 sps:$4 sm:$0xff]   ;;  %2105 = vmatprep.subr.bf16.mxu1 %v5232_v8 }
 0x1de   : > { %v1176_v16 = vpack.c.bf16 %v1156_v13, %v1154_v11  ;;  %v1117_v23 = vadd.f32 %v1116_v15, %v6090_v53  ;;  %v1157_v30 = vmax.f32 %v1115_v21, 0.0  ;;  %v6161_v60 = vpop.f32.mrf.mxu1  ;;  %v5235_v11 = vld [vmem:[%s7186_s3 + $0x274] ss:$60 sps:$4 sm:$0xff]   ;;  %v5238_v15 = vld [vmem:[%s7186_s3 + $0x1fc] ss:$60 sps:$4 sm:$0xff]  }
 0x1df   : > { %v1118_v25 = vpop.f32.mrf.mxu0  ;;  %v5233_v13 = vld [vmem:[%s7186_s3 + $0x270] ss:$60 sps:$4 sm:$0xff]  }
 0x1e0   : > { %v1119_v20 = vadd.f32 %v1118_v25, %v6093_v54  ;;  %1467 = vmatprep.mubr.bf16.mxu1 %v1176_v16  ;;  %v1158_v28 = vmax.f32 %v1117_v23, 0.0  ;;  %v6163_v61 = vpop.f32.mrf.mxu1  ;;  %2106 = vmatpush1.bf16.msra.mxu1 %v5230_v9  ;;  %v5236_v16 = vld [vmem:[%s7186_s3 + $0x1f8] ss:$60 sps:$4 sm:$0xff]   ;;  %v5241_v25 = vld [vmem:[%s7186_s3 + $0x184] ss:$60 sps:$4 sm:$0xff]  }
 0x1e1   : > { %v1120_v22 = vpop.f32.mrf.mxu0  ;;  %1468 = vmatmul.mubr.bf16.gmra.mxu1 %v1175_v18  ;;  %2107 = vmatprep.subr.bf16.mxu1 %v5235_v11  ;;  %v5239_v23 = vld [vmem:[%s7186_s3 + $0x180] ss:$60 sps:$4 sm:$0xff]   ;;  %v5244_v21 = vld [vmem:[%s7186_s3 + $0x10c] ss:$60 sps:$4 sm:$0xff]  }
 0x1e2   : > { %v1121_v24 = vadd.f32 %v1120_v22, %v6090_v53  ;;  %v1159_v26 = vmax.f32 %v1119_v20, 0.0  ;;  %v6165_v62 = vpop.f32.mrf.mxu1  ;;  %v5242_v22 = vld [vmem:[%s7186_s3 + $0x108] ss:$60 sps:$4 sm:$0xff]  }
 0x1e3   : > { %v1124_v27 = vpop.f32.mrf.mxu0 }
 0x1e4   : > { %v1160_v29 = vmax.f32 %v1121_v24, 0.0  ;;  %v1177_v33 = vpack.c.bf16 %v1159_v26, %v1157_v30  ;;  %v1125_v37 = vadd.f32 %v1124_v27, %v6093_v54  ;;  %v6167_v63 = vpop.f32.mrf.mxu1  ;;  %2108 = vmatpush1.bf16.msra.mxu1 %v5233_v13  ;;  %v5247_v26 = vld [vmem:[%s7186_s3 + $0x94] ss:$60 sps:$4 sm:$0xff]  }
 0x1e5   : > { %v1126_v31 = vpop.f32.mrf.mxu0  ;;  %2109 = vmatprep.subr.bf16.mxu1 %v5238_v15  ;;  %v5245_v27 = vld [vmem:[%s7186_s3 + $0x90] ss:$60 sps:$4 sm:$0xff]   ;;  %v5248_v30 = vld [vmem:[%s7186_s3 + $0x18] ss:$60 sps:$4 sm:$0xff]  }
 0x1e6   : > { %v1178_v32 = vpack.c.bf16 %v1160_v29, %v1158_v28  ;;  %v1127_v35 = vadd.f32 %v1126_v31, %v6090_v53  ;;  %v1161_v45 = vmax.f32 %v1125_v37, 0.0  ;;  %v6169_v42 = vpop.f32.mrf.mxu1  ;;  %v5250_v29 = vld [vmem:[%s7186_s3 + $0x1c] ss:$60 sps:$4 sm:$0xff]  }
 0x1e7   : > { %v1128_v34 = vpop.f32.mrf.mxu0 }
 0x1e8   : > { %v1129_v36 = vadd.f32 %v1128_v34, %v6093_v54  ;;  %1477 = vmatprep.mubr.bf16.mxu1 %v1178_v32  ;;  %v1162_v43 = vmax.f32 %v1127_v35, 0.0  ;;  %v5218_v54 = vld [vmem:[%s7186_s3 + $0x4c0] ss:$60 sps:$4 sm:$0xff]   ;;  %v6171_v0 = vpop.f32.mrf.mxu1  ;;  %2110 = vmatpush1.bf16.msra.mxu1 %v5236_v16  ;;  %v5256_v35 = vld [vmem:[%s7186_s3 + $0x6ac] ss:$60 sps:$4 sm:$0xff]  }
 0x1e9   : > { %v1130_v38 = vpop.f32.mrf.mxu0  ;;  %1478 = vmatmul.mubr.bf16.gmra.mxu1 %v1177_v33  ;;  %1777 = vmatpush2.bf16.msra.mxu0 %v5218_v54  ;;  %v5253_v32 = vld [vmem:[%s7186_s3 + $0x724] ss:$60 sps:$4 sm:$0xff]  }
 0x1ea   : > { %v1131_v39 = vadd.f32 %v1130_v38, %v6090_v53  ;;  %v1163_v41 = vmax.f32 %v1129_v36, 0.0  ;;  %v5223_v53 = vld [vmem:[%s7186_s3 + $0x44c] ss:$60 sps:$4 sm:$0xff]   ;;  %v6173_v1 = vpop.f32.mrf.mxu1  ;;  %2111 = vmatprep.subr.bf16.mxu1 %v5241_v25  ;;  %v5251_v33 = vld [vmem:[%s7186_s3 + $0x720] ss:$60 sps:$4 sm:$0xff]  }
 0x1eb   : > { %1778 = vmatprep.subr.bf16.mxu0 %v5223_v53  ;;  %v5254_v36 = vld [vmem:[%s7186_s3 + $0x6a8] ss:$60 sps:$4 sm:$0xff]   ;;  %v5259_v38 = vld [vmem:[%s7186_s3 + $0x634] ss:$60 sps:$4 sm:$0xff]  }
 0x1ec   : > { %v1164_v44 = vmax.f32 %v1131_v39, 0.0  ;;  %v1179_v47 = vpack.c.bf16 %v1163_v41, %v1161_v45  ;;  %v6175_v3 = vpop.f32.mrf.mxu1  ;;  %2112 = vmatpush1.bf16.msra.mxu1 %v5239_v23  ;;  %v5257_v39 = vld [vmem:[%s7186_s3 + $0x630] ss:$60 sps:$4 sm:$0xff]  }
 0x1ed   : > { %1779 = vmatpush2.bf16.msra.mxu0 %v5221_v40  ;;  %2113 = vmatprep.subr.bf16.mxu1 %v5244_v21  ;;  %v1213_v40 = vld [vmem:[%s7189_s6 + $0x4] sm:$0x3] }
 0x1ee   : > { %v1180_v46 = vpack.c.bf16 %v1164_v44, %v1162_v43  ;;  %1780 = vmatprep.subr.bf16.mxu0 %v5226_v51  ;;  %v6177_v4 = vpop.f32.mrf.mxu1  ;;  %v5262_v43 = vld [vmem:[%s7186_s3 + $0x5bc] ss:$60 sps:$4 sm:$0xff]   ;;  %v6294_v6 = vrot.slane %v1213_v40, %v5927_v19 }
 0x1ef   : > { %v5260_v44 = vld [vmem:[%s7186_s3 + $0x5b8] ss:$60 sps:$4 sm:$0xff]  }
 0x1f0   : > { %1487 = vmatprep.mubr.bf16.mxu1 %v1180_v46  ;;  %v6179_v5 = vpop.f32.mrf.mxu1  ;;  %2114 = vmatpush1.bf16.msra.mxu1 %v5242_v22  ;;  %v5265_v46 = vld [vmem:[%s7186_s3 + $0x544] ss:$60 sps:$4 sm:$0xff]  }
 0x1f1   : > { %1488 = vmatmul.mubr.bf16.gmra.mxu1 %v1179_v47  ;;  %1781 = vmatpush2.bf16.msra.mxu0 %v5224_v2  ;;  %v5263_v47 = vld [vmem:[%s7186_s3 + $0x540] ss:$60 sps:$4 sm:$0xff]   ;;  %v6291_v2 = vrot.slane %v1213_v40, %v5922_v17 }
 0x1f2   : > { %v6193_v10 = vpop.f32.mrf.mxu1  ;;  %2115 = vmatprep.subr.bf16.mxu1 %v5247_v26 }
 0x1f4   : > { %v6201_v14 = vpop.f32.mrf.mxu1  ;;  %2116 = vmatpush1.bf16.msra.mxu1 %v5245_v27 }
 0x1f5   : > { %2117 = vmatprep.subr.bf16.mxu1 %v5250_v29 }
 0x1f6   : > { %v6209_v18 = vpop.f32.mrf.mxu1 }
 0x1f8   : > { %v6217_v20 = vpop.f32.mrf.mxu1  ;;  %2118 = vmatpush1.bf16.msra.mxu1 %v5248_v30 }
 0x1f9   : > { %2119 = vmatprep.subr.bf16.mxu1 %v5253_v32 }
 0x1fa   : > { %v6225_v24 = vpop.f32.mrf.mxu1 }
 0x1fc   : > { %v6233_v28 = vpop.f32.mrf.mxu1  ;;  %2120 = vmatpush2.bf16.msra.mxu1 %v5251_v33 }
 0x1fd   : > { %2121 = vmatprep.subr.bf16.mxu1 %v5256_v35 }
 0x1fe   : > { %v6241_v31 = vpop.f32.mrf.mxu1 }
 0x200   : > { %v6249_v34 = vpop.f32.mrf.mxu1  ;;  %2122 = vmatpush2.bf16.msra.mxu1 %v5254_v36 }
 0x201   : > { %2123 = vmatprep.subr.bf16.mxu1 %v5259_v38 }
 0x202   : > { %v6257_v37 = vpop.f32.mrf.mxu1 }
 0x204   : > { %v6265_v41 = vpop.f32.mrf.mxu1  ;;  %2124 = vmatpush2.bf16.msra.mxu1 %v5257_v39 }
 0x205   : > { %2125 = vmatprep.subr.bf16.mxu1 %v5262_v43 }
 0x206   : > { %v6273_v45 = vpop.f32.mrf.mxu1 }
 0x208   : > { %2126 = vmatpush2.bf16.msra.mxu1 %v5260_v44  ;;  %v6281_v48 = vpop.f32.mrf.mxu1 }
 0x209   : > { %2127 = vmatprep.subr.bf16.mxu1 %v5265_v46 }
 0x20a   : > { %v6283_v54 = vpop.f32.mrf.mxu1 }
 0x20c   : > { %2128 = vmatpush2.bf16.msra.mxu1 %v5263_v47  ;;  %v6285_v53 = vpop.f32.mrf.mxu1 }
 0x279   : > { %v1419_v51 = vpop.f32.mrf.mxu1 }
 0x27a   : > { %v1420_v13 = vadd.f32 %v1419_v51, %v6294_v6 }
 0x27b   : > { %v1421_v7 = vpop.f32.mrf.mxu1 }
 0x27c   : > { %v1422_v9 = vadd.f32 %v1421_v7, %v6291_v2  ;;  %v1498_v26 = vmax.f32 %v1420_v13, 0.0 }
 0x27d   : > { %v1423_v8 = vpop.f32.mrf.mxu1 }
 0x27e   : > { %v1424_v11 = vadd.f32 %v1423_v8, %v6294_v6  ;;  %v1499_v21 = vmax.f32 %v1422_v9, 0.0 }
 0x27f   : > { %v1425_v15 = vpop.f32.mrf.mxu1 }
 0x280   : > { %v1426_v16 = vadd.f32 %v1425_v15, %v6291_v2  ;;  %v1500_v25 = vmax.f32 %v1424_v11, 0.0 }
 0x281   : > { %v1429_v23 = vpop.f32.mrf.mxu1 }
 0x282   : > { %v1501_v22 = vmax.f32 %v1426_v16, 0.0  ;;  %v1530_v30 = vpack.c.bf16 %v1500_v25, %v1498_v26  ;;  %v1430_v36 = vadd.f32 %v1429_v23, %v6294_v6 }
 0x283   : > { %v1431_v27 = vpop.f32.mrf.mxu1 }
 0x284   : > { %v1531_v29 = vpack.c.bf16 %v1501_v22, %v1499_v21  ;;  %v1432_v33 = vadd.f32 %v1431_v27, %v6291_v2  ;;  %v1502_v40 = vmax.f32 %v1430_v36, 0.0 }
 0x285   : > { %v1433_v32 = vpop.f32.mrf.mxu1 }
 0x286   : > { %v1434_v35 = vadd.f32 %v1433_v32, %v6294_v6  ;;  %1782 = vmatprep.mubr.bf16.mxu0 %v1531_v29  ;;  %v1503_v46 = vmax.f32 %v1432_v33, 0.0 }
 0x287   : > { %v1435_v38 = vpop.f32.mrf.mxu1  ;;  %1783 = vmatmul.mubr.bf16.vlgmr.msra.gmra.mxu0 %v1530_v30 }
 0x288   : > { %v1436_v39 = vadd.f32 %v1435_v38, %v6291_v2  ;;  %v1504_v43 = vmax.f32 %v1434_v35, 0.0 }
 0x289   : > { %v1439_v44 = vpop.f32.mrf.mxu1 }
 0x28a   : > { %v1505_v47 = vmax.f32 %v1436_v39, 0.0  ;;  %v1532_v8 = vpack.c.bf16 %v1504_v43, %v1502_v40  ;;  %v1440_v15 = vadd.f32 %v1439_v44, %v6294_v6 }
 0x28b   : > { %v1441_v51 = vpop.f32.mrf.mxu1 }
 0x28c   : > { %v1533_v7 = vpack.c.bf16 %v1505_v47, %v1503_v46  ;;  %v1442_v11 = vadd.f32 %v1441_v51, %v6291_v2  ;;  %v1506_v27 = vmax.f32 %v1440_v15, 0.0 }
 0x28d   : > { %v1443_v9 = vpop.f32.mrf.mxu1 }
 0x28e   : > { %v1444_v13 = vadd.f32 %v1443_v9, %v6294_v6  ;;  %1792 = vmatprep.mubr.bf16.mxu0 %v1533_v7  ;;  %v1507_v22 = vmax.f32 %v1442_v11, 0.0 }
 0x28f   : > { %v1445_v16 = vpop.f32.mrf.mxu1  ;;  %1793 = vmatmul.mubr.bf16.gmra.mxu0 %v1532_v8 }
 0x290   : > { %v1446_v25 = vadd.f32 %v1445_v16, %v6291_v2  ;;  %v1508_v23 = vmax.f32 %v1444_v13, 0.0 }
 0x291   : > { %v1449_v21 = vpop.f32.mrf.mxu1 }
 0x292   : > { %v1509_v26 = vmax.f32 %v1446_v25, 0.0  ;;  %v1534_v32 = vpack.c.bf16 %v1508_v23, %v1506_v27  ;;  %v1450_v38 = vadd.f32 %v1449_v21, %v6294_v6 }
 0x293   : > { %v1451_v29 = vpop.f32.mrf.mxu1 }
 0x294   : > { %v1535_v30 = vpack.c.bf16 %v1509_v26, %v1507_v22  ;;  %v1452_v35 = vadd.f32 %v1451_v29, %v6291_v2  ;;  %v1510_v51 = vmax.f32 %v1450_v38, 0.0 }
 0x295   : > { %v1453_v33 = vpop.f32.mrf.mxu1 }
 0x296   : > { %v1454_v36 = vadd.f32 %v1453_v33, %v6294_v6  ;;  %1802 = vmatprep.mubr.bf16.mxu0 %v1535_v30  ;;  %v1511_v47 = vmax.f32 %v1452_v35, 0.0 }
 0x297   : > { %v1455_v39 = vpop.f32.mrf.mxu1  ;;  %1803 = vmatmul.mubr.bf16.gmra.mxu0 %v1534_v32 }
 0x298   : > { %v1456_v43 = vadd.f32 %v1455_v39, %v6291_v2  ;;  %v1512_v44 = vmax.f32 %v1454_v36, 0.0 }
 0x299   : > { %v1459_v46 = vpop.f32.mrf.mxu1 }
 0x29a   : > { %v1513_v40 = vmax.f32 %v1456_v43, 0.0  ;;  %v1536_v9 = vpack.c.bf16 %v1512_v44, %v1510_v51  ;;  %v1460_v16 = vadd.f32 %v1459_v46, %v6294_v6 }
 0x29b   : > { %v1461_v7 = vpop.f32.mrf.mxu1 }
 0x29c   : > { %v1537_v8 = vpack.c.bf16 %v1513_v40, %v1511_v47  ;;  %v1462_v13 = vadd.f32 %v1461_v7, %v6291_v2  ;;  %v1514_v29 = vmax.f32 %v1460_v16, 0.0 }
 0x29d   : > { %v1463_v11 = vpop.f32.mrf.mxu1 }
 0x29e   : > { %v1464_v15 = vadd.f32 %v1463_v11, %v6294_v6  ;;  %1812 = vmatprep.mubr.bf16.mxu0 %v1537_v8  ;;  %v1515_v26 = vmax.f32 %v1462_v13, 0.0 }
 0x29f   : > { %v1465_v25 = vpop.f32.mrf.mxu1  ;;  %1813 = vmatmul.mubr.bf16.gmra.mxu0 %v1536_v9 }
 0x2a0   : > { %v1466_v23 = vadd.f32 %v1465_v25, %v6291_v2  ;;  %v1516_v21 = vmax.f32 %v1464_v15, 0.0 }
 0x2a1   : > { %v1469_v22 = vpop.f32.mrf.mxu1 }
 0x2a2   : > { %v1517_v27 = vmax.f32 %v1466_v23, 0.0  ;;  %v1538_v33 = vpack.c.bf16 %v1516_v21, %v1514_v29  ;;  %v1470_v39 = vadd.f32 %v1469_v22, %v6294_v6 }
 0x2a3   : > { %v1471_v30 = vpop.f32.mrf.mxu1 }
 0x2a4   : > { %v1539_v32 = vpack.c.bf16 %v1517_v27, %v1515_v26  ;;  %v1472_v36 = vadd.f32 %v1471_v30, %v6291_v2  ;;  %v1518_v7 = vmax.f32 %v1470_v39, 0.0 }
 0x2a5   : > { %v1473_v35 = vpop.f32.mrf.mxu1 }
 0x2a6   : > { %v1474_v38 = vadd.f32 %v1473_v35, %v6294_v6  ;;  %1822 = vmatprep.mubr.bf16.mxu0 %v1539_v32  ;;  %v1519_v40 = vmax.f32 %v1472_v36, 0.0 }
 0x2a7   : > { %v1475_v43 = vpop.f32.mrf.mxu1  ;;  %1823 = vmatmul.mubr.bf16.gmra.mxu0 %v1538_v33 }
 0x2a8   : > { %v1476_v44 = vadd.f32 %v1475_v43, %v6291_v2  ;;  %v1520_v46 = vmax.f32 %v1474_v38, 0.0 }
 0x2a9   : > { %v1479_v47 = vpop.f32.mrf.mxu1 }
 0x2aa   : > { %v1521_v51 = vmax.f32 %v1476_v44, 0.0  ;;  %v1540_v11 = vpack.c.bf16 %v1520_v46, %v1518_v7  ;;  %v1480_v25 = vadd.f32 %v1479_v47, %v6294_v6 }
 0x2ab   : > { %v1481_v8 = vpop.f32.mrf.mxu1 }
 0x2ac   : > { %v1541_v9 = vpack.c.bf16 %v1521_v51, %v1519_v40  ;;  %v1482_v15 = vadd.f32 %v1481_v8, %v6291_v2  ;;  %v1522_v30 = vmax.f32 %v1480_v25, 0.0  ;;  %v5275_v25 = vld [vmem:[%s7186_s3 + $0x368] ss:$60 sps:$4 sm:$0xff]  }
 0x2ad   : > { %v1483_v13 = vpop.f32.mrf.mxu1 }
 0x2ae   : > { %v1484_v16 = vadd.f32 %v1483_v13, %v6294_v6  ;;  %1832 = vmatprep.mubr.bf16.mxu0 %v1541_v9  ;;  %v1523_v27 = vmax.f32 %v1482_v15, 0.0  ;;  %v5269_v13 = vld [vmem:[%s7186_s3 + $0x450] ss:$60 sps:$4 sm:$0xff]   ;;  %v5274_v15 = vld [vmem:[%s7186_s3 + $0x3dc] ss:$60 sps:$4 sm:$0xff]  }
 0x2af   : > { %v1485_v23 = vpop.f32.mrf.mxu1  ;;  %1833 = vmatmul.mubr.bf16.gmra.mxu0 %v1540_v11  ;;  %v5268_v11 = vld [vmem:[%s7186_s3 + $0x4cc] ss:$60 sps:$4 sm:$0xff]  }
 0x2b0   : > { %v1486_v21 = vadd.f32 %v1485_v23, %v6291_v2  ;;  %v1524_v22 = vmax.f32 %v1484_v16, 0.0  ;;  %2129 = vmatprep.subr.bf16.mxu1 %v5268_v11  ;;  %v5272_v16 = vld [vmem:[%s7186_s3 + $0x3d8] ss:$60 sps:$4 sm:$0xff]   ;;  %v5277_v23 = vld [vmem:[%s7186_s3 + $0x36c] ss:$60 sps:$4 sm:$0xff]  }
 0x2b1   : > { %v1489_v26 = vpop.f32.mrf.mxu1  ;;  %2512 = vmatprep.subr.bf16.mxu0 %v5277_v23  ;;  %v5308_v11 = vld [vmem:[%s7186_s3 + $0x5c0] ss:$60 sps:$4 sm:$0xff]  }
 0x2b2   : > { %v1525_v29 = vmax.f32 %v1486_v21, 0.0  ;;  %v1542_v35 = vpack.c.bf16 %v1524_v22, %v1522_v30  ;;  %v1490_v43 = vadd.f32 %v1489_v26, %v6294_v6  ;;  %v5280_v21 = vld [vmem:[%s7186_s3 + $0x2f4] ss:$60 sps:$4 sm:$0xff]   ;;  %2513 = vmatpush1.bf16.msra.mxu0 %v5275_v25  ;;  %v5283_v26 = vld [vmem:[%s7186_s3 + $0x27c] ss:$60 sps:$4 sm:$0xff]  }
 0x2b3   : > { %v1491_v32 = vpop.f32.mrf.mxu1  ;;  %v5278_v22 = vld [vmem:[%s7186_s3 + $0x2f0] ss:$60 sps:$4 sm:$0xff]   ;;  %2514 = vmatprep.subr.bf16.mxu0 %v5280_v21  ;;  %v5284_v30 = vld [vmem:[%s7186_s3 + $0x200] ss:$60 sps:$4 sm:$0xff]  }
 0x2b4   : > { %v1543_v33 = vpack.c.bf16 %v1525_v29, %v1523_v27  ;;  %v1492_v38 = vadd.f32 %v1491_v32, %v6291_v2  ;;  %v1526_v7 = vmax.f32 %v1490_v43, 0.0  ;;  %v5281_v27 = vld [vmem:[%s7186_s3 + $0x278] ss:$60 sps:$4 sm:$0xff]   ;;  %v5286_v29 = vld [vmem:[%s7186_s3 + $0x204] ss:$60 sps:$4 sm:$0xff]  }
 0x2b5   : > { %v1493_v36 = vpop.f32.mrf.mxu1  ;;  %v5289_v32 = vld [vmem:[%s7186_s3 + $0x18c] ss:$60 sps:$4 sm:$0xff]   ;;  %v5298_v43 = vld [vmem:[%s7186_s3 + $0x24] ss:$60 sps:$4 sm:$0xff]  }
 0x2b6   : > { %v1494_v39 = vadd.f32 %v1493_v36, %v6294_v6  ;;  %1842 = vmatprep.mubr.bf16.mxu0 %v1543_v33  ;;  %v1527_v40 = vmax.f32 %v1492_v38, 0.0  ;;  %v5266_v6 = vld [vmem:[%s7186_s3 + $0x4c8] ss:$60 sps:$4 sm:$0xff]   ;;  %2515 = vmatpush1.bf16.msra.mxu0 %v5278_v22  ;;  %v5290_v36 = vld [vmem:[%s7186_s3 + $0x110] ss:$60 sps:$4 sm:$0xff]  }
 0x2b7   : > { %v1495_v44 = vpop.f32.mrf.mxu1  ;;  %1843 = vmatmul.mubr.bf16.gmra.mxu0 %v1542_v35  ;;  %2130 = vmatpush2.bf16.msra.mxu1 %v5266_v6  ;;  %v5287_v33 = vld [vmem:[%s7186_s3 + $0x188] ss:$60 sps:$4 sm:$0xff]   ;;  %v5292_v35 = vld [vmem:[%s7186_s3 + $0x114] ss:$60 sps:$4 sm:$0xff]   ;;  %v5295_v38 = vld [vmem:[%s7186_s3 + $0x9c] ss:$60 sps:$4 sm:$0xff]  }
 0x2b8   : > { %v1496_v46 = vadd.f32 %v1495_v44, %v6291_v2  ;;  %v1528_v47 = vmax.f32 %v1494_v39, 0.0  ;;  %v5271_v2 = vld [vmem:[%s7186_s3 + $0x454] ss:$60 sps:$4 sm:$0xff]   ;;  %2516 = vmatprep.subr.bf16.mxu0 %v5283_v26  ;;  %v5296_v44 = vld [vmem:[%s7186_s3 + $0x20] ss:$60 sps:$4 sm:$0xff]  }
 0x2b9   : > { %2131 = vmatprep.subr.bf16.mxu1 %v5271_v2  ;;  %v5293_v39 = vld [vmem:[%s7186_s3 + $0x98] ss:$60 sps:$4 sm:$0xff]   ;;  %v5313_v6 = vld [vmem:[%s7186_s3 + $0x54c] ss:$60 sps:$4 sm:$0xff]  }
 0x2ba   : > { %v1529_v51 = vmax.f32 %v1496_v46, 0.0  ;;  %v1544_v9 = vpack.c.bf16 %v1528_v47, %v1526_v7  ;;  %2517 = vmatpush1.bf16.msra.mxu0 %v5281_v27  ;;  %v5301_v46 = vld [vmem:[%s7186_s3 + $0x72c] ss:$60 sps:$4 sm:$0xff]   ;;  %v5307_v7 = vld [vmem:[%s7186_s3 + $0x63c] ss:$60 sps:$4 sm:$0xff]  }
 0x2bb   : > { %2132 = vmatpush2.bf16.msra.mxu1 %v5269_v13  ;;  %2518 = vmatprep.subr.bf16.mxu0 %v5286_v29  ;;  %v5299_v47 = vld [vmem:[%s7186_s3 + $0x728] ss:$60 sps:$4 sm:$0xff]  }
 0x2bc   : > { %v1545_v8 = vpack.c.bf16 %v1529_v51, %v1527_v40  ;;  %2133 = vmatprep.subr.bf16.mxu1 %v5274_v15  ;;  %v5304_v40 = vld [vmem:[%s7186_s3 + $0x6b4] ss:$60 sps:$4 sm:$0xff]   ;;  %v5311_v2 = vld [vmem:[%s7186_s3 + $0x548] ss:$60 sps:$4 sm:$0xff]  }
 0x2bd   : > { %v5302_v51 = vld [vmem:[%s7186_s3 + $0x6b0] ss:$60 sps:$4 sm:$0xff]   ;;  %v1578_v13 = vld [vmem:[%s7189_s6 + $0x6] sm:$0x3] }
 0x2be   : > { %1852 = vmatprep.mubr.bf16.mxu0 %v1545_v8  ;;  %2519 = vmatpush1.bf16.msra.mxu0 %v5284_v30  ;;  %v5305_v8 = vld [vmem:[%s7186_s3 + $0x638] ss:$60 sps:$4 sm:$0xff]   ;;  %v6431_v25 = vrot.slane %v1578_v13, %v5927_v19 }
 0x2bf   : > { %1853 = vmatmul.mubr.bf16.gmra.mxu0 %v1544_v9  ;;  %2134 = vmatpush2.bf16.msra.mxu1 %v5272_v16  ;;  %v5310_v9 = vld [vmem:[%s7186_s3 + $0x5c4] ss:$60 sps:$4 sm:$0xff]   ;;  %v6428_v16 = vrot.slane %v1578_v13, %v5922_v17 }
 0x2c0   : > { %2520 = vmatprep.subr.bf16.mxu0 %v5289_v32 }
 0x2c2   : > { %2521 = vmatpush1.bf16.msra.mxu0 %v5287_v33 }
 0x2c3   : > { %2522 = vmatprep.subr.bf16.mxu0 %v5292_v35 }
 0x2c6   : > { %2523 = vmatpush1.bf16.msra.mxu0 %v5290_v36 }
 0x2c7   : > { %2524 = vmatprep.subr.bf16.mxu0 %v5295_v38 }
 0x2ca   : > { %2525 = vmatpush1.bf16.msra.mxu0 %v5293_v39 }
 0x2cb   : > { %2526 = vmatprep.subr.bf16.mxu0 %v5298_v43 }
 0x2ce   : > { %2527 = vmatpush1.bf16.msra.mxu0 %v5296_v44 }
 0x2cf   : > { %2528 = vmatprep.subr.bf16.mxu0 %v5301_v46 }
 0x2d2   : > { %2529 = vmatpush2.bf16.msra.mxu0 %v5299_v47 }
 0x2d3   : > { %2530 = vmatprep.subr.bf16.mxu0 %v5304_v40 }
 0x2d6   : > { %2531 = vmatpush2.bf16.msra.mxu0 %v5302_v51 }
 0x2d7   : > { %2532 = vmatprep.subr.bf16.mxu0 %v5307_v7 }
 0x2da   : > { %2533 = vmatpush2.bf16.msra.mxu0 %v5305_v8 }
 0x2db   : > { %2534 = vmatprep.subr.bf16.mxu0 %v5310_v9 }
 0x2de   : > { %2535 = vmatpush2.bf16.msra.mxu0 %v5308_v11 }
 0x2df   : > { %2536 = vmatprep.subr.bf16.mxu0 %v5313_v6 }
 0x2e2   : > { %2537 = vmatpush2.bf16.msra.mxu0 %v5311_v2 }
 0x347   : > { %v1784_v15 = vpop.f32.mrf.mxu0 }
 0x348   : > { %v1785_v27 = vadd.f32 %v1784_v15, %v6431_v25 }
 0x349   : > { %v1786_v23 = vpop.f32.mrf.mxu0 }
 0x34a   : > { %v1787_v22 = vadd.f32 %v1786_v23, %v6428_v16  ;;  %v1863_v38 = vmax.f32 %v1785_v27, 0.0 }
 0x34b   : > { %v1788_v21 = vpop.f32.mrf.mxu0 }
 0x34c   : > { %v1789_v26 = vadd.f32 %v1788_v21, %v6431_v25  ;;  %v1864_v35 = vmax.f32 %v1787_v22, 0.0 }
 0x34d   : > { %v1790_v29 = vpop.f32.mrf.mxu0 }
 0x34e   : > { %v1791_v30 = vadd.f32 %v1790_v29, %v6428_v16  ;;  %v1865_v32 = vmax.f32 %v1789_v26, 0.0 }
 0x34f   : > { %v1794_v33 = vpop.f32.mrf.mxu0 }
 0x350   : > { %v1866_v36 = vmax.f32 %v1791_v30, 0.0  ;;  %v1895_v44 = vpack.c.bf16 %v1865_v32, %v1863_v38  ;;  %v1795_v51 = vadd.f32 %v1794_v33, %v6431_v25 }
 0x351   : > { %v1796_v39 = vpop.f32.mrf.mxu0 }
 0x352   : > { %v1896_v43 = vpack.c.bf16 %v1866_v36, %v1864_v35  ;;  %v1797_v47 = vadd.f32 %v1796_v39, %v6428_v16  ;;  %v1867_v13 = vmax.f32 %v1795_v51, 0.0 }
 0x353   : > { %v1798_v46 = vpop.f32.mrf.mxu0 }
 0x354   : > { %v1799_v40 = vadd.f32 %v1798_v46, %v6431_v25  ;;  %2135 = vmatprep.mubr.bf16.mxu1 %v1896_v43  ;;  %v1868_v6 = vmax.f32 %v1797_v47, 0.0 }
 0x355   : > { %v1800_v7 = vpop.f32.mrf.mxu0  ;;  %2136 = vmatmul.mubr.bf16.vlgmr.msra.gmra.mxu1 %v1895_v44 }
 0x356   : > { %v1801_v8 = vadd.f32 %v1800_v7, %v6428_v16  ;;  %v1869_v9 = vmax.f32 %v1799_v40, 0.0 }
 0x357   : > { %v1804_v11 = vpop.f32.mrf.mxu0 }
 0x358   : > { %v1870_v2 = vmax.f32 %v1801_v8, 0.0  ;;  %v1897_v21 = vpack.c.bf16 %v1869_v9, %v1867_v13  ;;  %v1805_v29 = vadd.f32 %v1804_v11, %v6431_v25 }
 0x359   : > { %v1806_v15 = vpop.f32.mrf.mxu0 }
 0x35a   : > { %v1898_v23 = vpack.c.bf16 %v1870_v2, %v1868_v6  ;;  %v1807_v26 = vadd.f32 %v1806_v15, %v6428_v16  ;;  %v1871_v39 = vmax.f32 %v1805_v29, 0.0 }
 0x35b   : > { %v1808_v22 = vpop.f32.mrf.mxu0 }
 0x35c   : > { %v1809_v27 = vadd.f32 %v1808_v22, %v6431_v25  ;;  %2145 = vmatprep.mubr.bf16.mxu1 %v1898_v23  ;;  %v1872_v36 = vmax.f32 %v1807_v26, 0.0 }
 0x35d   : > { %v1810_v30 = vpop.f32.mrf.mxu0  ;;  %2146 = vmatmul.mubr.bf16.gmra.mxu1 %v1897_v21 }
 0x35e   : > { %v1811_v32 = vadd.f32 %v1810_v30, %v6428_v16  ;;  %v1873_v33 = vmax.f32 %v1809_v27, 0.0 }
 0x35f   : > { %v1814_v35 = vpop.f32.mrf.mxu0 }
 0x360   : > { %v1874_v38 = vmax.f32 %v1811_v32, 0.0  ;;  %v1899_v46 = vpack.c.bf16 %v1873_v33, %v1871_v39  ;;  %v1815_v7 = vadd.f32 %v1814_v35, %v6431_v25 }
 0x361   : > { %v1816_v43 = vpop.f32.mrf.mxu0 }
 0x362   : > { %v1900_v44 = vpack.c.bf16 %v1874_v38, %v1872_v36  ;;  %v1817_v40 = vadd.f32 %v1816_v43, %v6428_v16  ;;  %v1875_v15 = vmax.f32 %v1815_v7, 0.0 }
 0x363   : > { %v1818_v47 = vpop.f32.mrf.mxu0 }
 0x364   : > { %v1819_v51 = vadd.f32 %v1818_v47, %v6431_v25  ;;  %2155 = vmatprep.mubr.bf16.mxu1 %v1900_v44  ;;  %v1876_v2 = vmax.f32 %v1817_v40, 0.0 }
 0x365   : > { %v1820_v8 = vpop.f32.mrf.mxu0  ;;  %2156 = vmatmul.mubr.bf16.gmra.mxu1 %v1899_v46 }
 0x366   : > { %v1821_v9 = vadd.f32 %v1820_v8, %v6428_v16  ;;  %v1877_v11 = vmax.f32 %v1819_v51, 0.0 }
 0x367   : > { %v1824_v6 = vpop.f32.mrf.mxu0 }
 0x368   : > { %v1878_v13 = vmax.f32 %v1821_v9, 0.0  ;;  %v1901_v22 = vpack.c.bf16 %v1877_v11, %v1875_v15  ;;  %v1825_v30 = vadd.f32 %v1824_v6, %v6431_v25 }
 0x369   : > { %v1826_v23 = vpop.f32.mrf.mxu0 }
 0x36a   : > { %v1902_v21 = vpack.c.bf16 %v1878_v13, %v1876_v2  ;;  %v1827_v27 = vadd.f32 %v1826_v23, %v6428_v16  ;;  %v1879_v43 = vmax.f32 %v1825_v30, 0.0 }
 0x36b   : > { %v1828_v26 = vpop.f32.mrf.mxu0 }
 0x36c   : > { %v1829_v29 = vadd.f32 %v1828_v26, %v6431_v25  ;;  %2165 = vmatprep.mubr.bf16.mxu1 %v1902_v21  ;;  %v1880_v38 = vmax.f32 %v1827_v27, 0.0 }
 0x36d   : > { %v1830_v32 = vpop.f32.mrf.mxu0  ;;  %2166 = vmatmul.mubr.bf16.gmra.mxu1 %v1901_v22 }
 0x36e   : > { %v1831_v33 = vadd.f32 %v1830_v32, %v6428_v16  ;;  %v1881_v35 = vmax.f32 %v1829_v29, 0.0 }
 0x36f   : > { %v1834_v36 = vpop.f32.mrf.mxu0 }
 0x370   : > { %v1882_v39 = vmax.f32 %v1831_v33, 0.0  ;;  %v1903_v47 = vpack.c.bf16 %v1881_v35, %v1879_v43  ;;  %v1835_v8 = vadd.f32 %v1834_v36, %v6431_v25 }
 0x371   : > { %v1836_v44 = vpop.f32.mrf.mxu0 }
 0x372   : > { %v1904_v46 = vpack.c.bf16 %v1882_v39, %v1880_v38  ;;  %v1837_v51 = vadd.f32 %v1836_v44, %v6428_v16  ;;  %v1883_v23 = vmax.f32 %v1835_v8, 0.0 }
 0x373   : > { %v1838_v40 = vpop.f32.mrf.mxu0 }
 0x374   : > { %v1839_v7 = vadd.f32 %v1838_v40, %v6431_v25  ;;  %2175 = vmatprep.mubr.bf16.mxu1 %v1904_v46  ;;  %v1884_v13 = vmax.f32 %v1837_v51, 0.0 }
 0x375   : > { %v1840_v9 = vpop.f32.mrf.mxu0  ;;  %2176 = vmatmul.mubr.bf16.gmra.mxu1 %v1903_v47 }
 0x376   : > { %v1841_v11 = vadd.f32 %v1840_v9, %v6428_v16  ;;  %v1885_v6 = vmax.f32 %v1839_v7, 0.0 }
 0x377   : > { %v1844_v2 = vpop.f32.mrf.mxu0 }
 0x378   : > { %v1886_v15 = vmax.f32 %v1841_v11, 0.0  ;;  %v1905_v26 = vpack.c.bf16 %v1885_v6, %v1883_v23  ;;  %v1845_v32 = vadd.f32 %v1844_v2, %v6431_v25 }
 0x379   : > { %v1846_v21 = vpop.f32.mrf.mxu0 }
 0x37a   : > { %v1906_v22 = vpack.c.bf16 %v1886_v15, %v1884_v13  ;;  %v1847_v29 = vadd.f32 %v1846_v21, %v6428_v16  ;;  %v1887_v44 = vmax.f32 %v1845_v32, 0.0  ;;  %v5323_v32 = vld [vmem:[%s7186_s3 + $0x370] ss:$60 sps:$4 sm:$0xff]  }
 0x37b   : > { %v1848_v27 = vpop.f32.mrf.mxu0 }
 0x37c   : > { %v1849_v30 = vadd.f32 %v1848_v27, %v6431_v25  ;;  %2185 = vmatprep.mubr.bf16.mxu1 %v1906_v22  ;;  %v1888_v39 = vmax.f32 %v1847_v29, 0.0  ;;  %v5317_v27 = vld [vmem:[%s7186_s3 + $0x458] ss:$60 sps:$4 sm:$0xff]   ;;  %v5322_v29 = vld [vmem:[%s7186_s3 + $0x3e4] ss:$60 sps:$4 sm:$0xff]  }
 0x37d   : > { %v1850_v33 = vpop.f32.mrf.mxu0  ;;  %2186 = vmatmul.mubr.bf16.gmra.mxu1 %v1905_v26  ;;  %v5316_v26 = vld [vmem:[%s7186_s3 + $0x4d4] ss:$60 sps:$4 sm:$0xff]  }
 0x37e   : > { %v1851_v35 = vadd.f32 %v1850_v33, %v6428_v16  ;;  %v1889_v36 = vmax.f32 %v1849_v30, 0.0  ;;  %2538 = vmatprep.subr.bf16.mxu0 %v5316_v26  ;;  %v5320_v30 = vld [vmem:[%s7186_s3 + $0x3e0] ss:$60 sps:$4 sm:$0xff]   ;;  %v5325_v33 = vld [vmem:[%s7186_s3 + $0x374] ss:$60 sps:$4 sm:$0xff]  }
 0x37f   : > { %v1854_v38 = vpop.f32.mrf.mxu0  ;;  %2877 = vmatprep.subr.bf16.mxu1 %v5325_v33  ;;  %v5356_v26 = vld [vmem:[%s7186_s3 + $0x5c8] ss:$60 sps:$4 sm:$0xff]  }
 0x380   : > { %v1890_v43 = vmax.f32 %v1851_v35, 0.0  ;;  %v1907_v40 = vpack.c.bf16 %v1889_v36, %v1887_v44  ;;  %v1855_v9 = vadd.f32 %v1854_v38, %v6431_v25  ;;  %v5328_v35 = vld [vmem:[%s7186_s3 + $0x2fc] ss:$60 sps:$4 sm:$0xff]   ;;  %2878 = vmatpush1.bf16.msra.mxu1 %v5323_v32  ;;  %v5331_v38 = vld [vmem:[%s7186_s3 + $0x284] ss:$60 sps:$4 sm:$0xff]  }
 0x381   : > { %v1856_v46 = vpop.f32.mrf.mxu0  ;;  %v5326_v36 = vld [vmem:[%s7186_s3 + $0x2f8] ss:$60 sps:$4 sm:$0xff]   ;;  %2879 = vmatprep.subr.bf16.mxu1 %v5328_v35  ;;  %v5332_v44 = vld [vmem:[%s7186_s3 + $0x208] ss:$60 sps:$4 sm:$0xff]  }
 0x382   : > { %v1908_v47 = vpack.c.bf16 %v1890_v43, %v1888_v39  ;;  %v1857_v7 = vadd.f32 %v1856_v46, %v6428_v16  ;;  %v1891_v23 = vmax.f32 %v1855_v9, 0.0  ;;  %v5329_v39 = vld [vmem:[%s7186_s3 + $0x280] ss:$60 sps:$4 sm:$0xff]   ;;  %v5334_v43 = vld [vmem:[%s7186_s3 + $0x20c] ss:$60 sps:$4 sm:$0xff]  }
 0x383   : > { %v1858_v51 = vpop.f32.mrf.mxu0  ;;  %v5337_v46 = vld [vmem:[%s7186_s3 + $0x194] ss:$60 sps:$4 sm:$0xff]   ;;  %v5346_v9 = vld [vmem:[%s7186_s3 + $0x2c] ss:$60 sps:$4 sm:$0xff]  }
 0x384   : > { %v1859_v8 = vadd.f32 %v1858_v51, %v6431_v25  ;;  %2195 = vmatprep.mubr.bf16.mxu1 %v1908_v47  ;;  %v1892_v13 = vmax.f32 %v1857_v7, 0.0  ;;  %v5314_v25 = vld [vmem:[%s7186_s3 + $0x4d0] ss:$60 sps:$4 sm:$0xff]   ;;  %2880 = vmatpush1.bf16.msra.mxu1 %v5326_v36  ;;  %v5338_v51 = vld [vmem:[%s7186_s3 + $0x118] ss:$60 sps:$4 sm:$0xff]  }
 0x385   : > { %v1860_v11 = vpop.f32.mrf.mxu0  ;;  %2196 = vmatmul.mubr.bf16.gmra.mxu1 %v1907_v40  ;;  %2539 = vmatpush2.bf16.msra.mxu0 %v5314_v25  ;;  %v5335_v47 = vld [vmem:[%s7186_s3 + $0x190] ss:$60 sps:$4 sm:$0xff]   ;;  %v5340_v40 = vld [vmem:[%s7186_s3 + $0x11c] ss:$60 sps:$4 sm:$0xff]   ;;  %v5343_v7 = vld [vmem:[%s7186_s3 + $0xa4] ss:$60 sps:$4 sm:$0xff]  }
 0x386   : > { %v1861_v6 = vadd.f32 %v1860_v11, %v6428_v16  ;;  %v1893_v2 = vmax.f32 %v1859_v8, 0.0  ;;  %v5319_v16 = vld [vmem:[%s7186_s3 + $0x45c] ss:$60 sps:$4 sm:$0xff]   ;;  %2881 = vmatprep.subr.bf16.mxu1 %v5331_v38  ;;  %v5344_v11 = vld [vmem:[%s7186_s3 + $0x28] ss:$60 sps:$4 sm:$0xff]  }
 0x387   : > { %2540 = vmatprep.subr.bf16.mxu0 %v5319_v16  ;;  %v5341_v8 = vld [vmem:[%s7186_s3 + $0xa0] ss:$60 sps:$4 sm:$0xff]   ;;  %v5361_v25 = vld [vmem:[%s7186_s3 + $0x554] ss:$60 sps:$4 sm:$0xff]  }
 0x388   : > { %v1894_v15 = vmax.f32 %v1861_v6, 0.0  ;;  %v1909_v22 = vpack.c.bf16 %v1893_v2, %v1891_v23  ;;  %2882 = vmatpush1.bf16.msra.mxu1 %v5329_v39  ;;  %v5349_v6 = vld [vmem:[%s7186_s3 + $0x734] ss:$60 sps:$4 sm:$0xff]   ;;  %v5355_v23 = vld [vmem:[%s7186_s3 + $0x644] ss:$60 sps:$4 sm:$0xff]  }
 0x389   : > { %2541 = vmatpush2.bf16.msra.mxu0 %v5317_v27  ;;  %2883 = vmatprep.subr.bf16.mxu1 %v5334_v43  ;;  %v5347_v2 = vld [vmem:[%s7186_s3 + $0x730] ss:$60 sps:$4 sm:$0xff]  }
 0x38a   : > { %v1910_v21 = vpack.c.bf16 %v1894_v15, %v1892_v13  ;;  %2542 = vmatprep.subr.bf16.mxu0 %v5322_v29  ;;  %v5352_v13 = vld [vmem:[%s7186_s3 + $0x6bc] ss:$60 sps:$4 sm:$0xff]   ;;  %v5359_v16 = vld [vmem:[%s7186_s3 + $0x550] ss:$60 sps:$4 sm:$0xff]   ;;  %v2216_v29 = vld [vmem:[%s7189_s6 + $0x8] sm:$0x3] }
 0x38b   : > { %v5350_v15 = vld [vmem:[%s7186_s3 + $0x6b8] ss:$60 sps:$4 sm:$0xff]   ;;  %v6566_v33 = vrot.slane %v2216_v29, %v5922_v17  ;;  %v6570_v36 = vrot.slane %v2216_v29, %v5927_v19 }
 0x38c   : > { %2205 = vmatprep.mubr.bf16.mxu1 %v1910_v21  ;;  %2884 = vmatpush1.bf16.msra.mxu1 %v5332_v44  ;;  %v5353_v21 = vld [vmem:[%s7186_s3 + $0x640] ss:$60 sps:$4 sm:$0xff]  }
 0x38d   : > { %2206 = vmatmul.mubr.bf16.gmra.mxu1 %v1909_v22  ;;  %2543 = vmatpush2.bf16.msra.mxu0 %v5320_v30  ;;  %v5358_v22 = vld [vmem:[%s7186_s3 + $0x5cc] ss:$60 sps:$4 sm:$0xff]  }
 0x38e   : > { %2885 = vmatprep.subr.bf16.mxu1 %v5337_v46 }
 0x390   : > { %2886 = vmatpush1.bf16.msra.mxu1 %v5335_v47 }
 0x391   : > { %2887 = vmatprep.subr.bf16.mxu1 %v5340_v40 }
 0x394   : > { %2888 = vmatpush1.bf16.msra.mxu1 %v5338_v51 }
 0x395   : > { %2889 = vmatprep.subr.bf16.mxu1 %v5343_v7 }
 0x398   : > { %2890 = vmatpush1.bf16.msra.mxu1 %v5341_v8 }
 0x399   : > { %2891 = vmatprep.subr.bf16.mxu1 %v5346_v9 }
 0x39c   : > { %2892 = vmatpush1.bf16.msra.mxu1 %v5344_v11 }
 0x39d   : > { %2893 = vmatprep.subr.bf16.mxu1 %v5349_v6 }
 0x3a0   : > { %2894 = vmatpush2.bf16.msra.mxu1 %v5347_v2 }
 0x3a1   : > { %2895 = vmatprep.subr.bf16.mxu1 %v5352_v13 }
 0x3a4   : > { %2896 = vmatpush2.bf16.msra.mxu1 %v5350_v15 }
 0x3a5   : > { %2897 = vmatprep.subr.bf16.mxu1 %v5355_v23 }
 0x3a8   : > { %2898 = vmatpush2.bf16.msra.mxu1 %v5353_v21 }
 0x3a9   : > { %2899 = vmatprep.subr.bf16.mxu1 %v5358_v22 }
 0x3ac   : > { %2900 = vmatpush2.bf16.msra.mxu1 %v5356_v26 }
 0x3ad   : > { %2901 = vmatprep.subr.bf16.mxu1 %v5361_v25 }
 0x3b0   : > { %2902 = vmatpush2.bf16.msra.mxu1 %v5359_v16 }
 0x415   : > { %v2137_v27 = vpop.f32.mrf.mxu1 }
 0x416   : > { %v2138_v35 = vadd.f32 %v2137_v27, %v6133_v49 }
 0x417   : > { %v2139_v30 = vpop.f32.mrf.mxu1 }
 0x418   : > { %v2140_v32 = vadd.f32 %v2139_v30, %v6141_v50  ;;  %v2228_v50 = vadd.f32 %v6570_v36, %v2138_v35 }
 0x419   : > { %v2141_v38 = vpop.f32.mrf.mxu1 }
 0x41a   : > { %v2142_v39 = vadd.f32 %v2141_v38, %v6149_v52  ;;  %v2229_v44 = vadd.f32 %v6566_v33, %v2140_v32  ;;  %v2260_v6 = vmax.f32 %v2228_v50, 0.0 }
 0x41b   : > { %v2143_v43 = vpop.f32.mrf.mxu1 }
 0x41c   : > { %v2230_v46 = vadd.f32 %v6570_v36, %v2142_v39  ;;  %v2144_v47 = vadd.f32 %v2143_v43, %v6151_v55  ;;  %v2261_v8 = vmax.f32 %v2229_v44, 0.0 }
 0x41d   : > { %v2147_v40 = vpop.f32.mrf.mxu1 }
 0x41e   : > { %v2231_v51 = vadd.f32 %v6566_v33, %v2144_v47  ;;  %v2262_v7 = vmax.f32 %v2230_v46, 0.0  ;;  %v2148_v52 = vadd.f32 %v2147_v40, %v6153_v56 }
 0x41f   : > { %v2149_v49 = vpop.f32.mrf.mxu1 }
 0x420   : > { %v2263_v9 = vmax.f32 %v2231_v51, 0.0  ;;  %v2150_v11 = vadd.f32 %v2149_v49, %v6155_v57  ;;  %v2292_v23 = vpack.c.bf16 %v2262_v7, %v2260_v6  ;;  %v2232_v25 = vadd.f32 %v6570_v36, %v2148_v52 }
 0x421   : > { %v2151_v2 = vpop.f32.mrf.mxu1 }
 0x422   : > { %v2152_v13 = vadd.f32 %v2151_v2, %v6157_v58  ;;  %v2293_v15 = vpack.c.bf16 %v2263_v9, %v2261_v8  ;;  %v2233_v21 = vadd.f32 %v6566_v33, %v2150_v11  ;;  %v2264_v32 = vmax.f32 %v2232_v25, 0.0 }
 0x423   : > { %v2153_v55 = vpop.f32.mrf.mxu1 }
 0x424   : > { %v2234_v22 = vadd.f32 %v6570_v36, %v2152_v13  ;;  %v2154_v26 = vadd.f32 %v2153_v55, %v6159_v59  ;;  %2544 = vmatprep.mubr.bf16.mxu0 %v2293_v15  ;;  %v2265_v29 = vmax.f32 %v2233_v21, 0.0 }
 0x425   : > { %v2157_v16 = vpop.f32.mrf.mxu1  ;;  %2545 = vmatmul.mubr.bf16.vlgmr.msra.gmra.mxu0 %v2292_v23 }
 0x426   : > { %v2235_v57 = vadd.f32 %v6566_v33, %v2154_v26  ;;  %v2266_v56 = vmax.f32 %v2234_v22, 0.0  ;;  %v2158_v35 = vadd.f32 %v2157_v16, %v6161_v60 }
 0x427   : > { %v2159_v27 = vpop.f32.mrf.mxu1 }
 0x428   : > { %v2267_v58 = vmax.f32 %v2235_v57, 0.0  ;;  %v2160_v30 = vadd.f32 %v2159_v27, %v6163_v61  ;;  %v2294_v44 = vpack.c.bf16 %v2266_v56, %v2264_v32  ;;  %v2236_v40 = vadd.f32 %v6570_v36, %v2158_v35 }
 0x429   : > { %v2161_v38 = vpop.f32.mrf.mxu1 }
 0x42a   : > { %v2162_v39 = vadd.f32 %v2161_v38, %v6165_v62  ;;  %v2295_v59 = vpack.c.bf16 %v2267_v58, %v2265_v29  ;;  %v2237_v46 = vadd.f32 %v6566_v33, %v2160_v30  ;;  %v2268_v9 = vmax.f32 %v2236_v40, 0.0 }
 0x42b   : > { %v2163_v43 = vpop.f32.mrf.mxu1 }
 0x42c   : > { %v2238_v47 = vadd.f32 %v6570_v36, %v2162_v39  ;;  %v2164_v50 = vadd.f32 %v2163_v43, %v6167_v63  ;;  %2554 = vmatprep.mubr.bf16.mxu0 %v2295_v59  ;;  %v2269_v49 = vmax.f32 %v2237_v46, 0.0 }
 0x42d   : > { %v2167_v51 = vpop.f32.mrf.mxu1  ;;  %2555 = vmatmul.mubr.bf16.gmra.mxu0 %v2294_v44 }
 0x42e   : > { %v2239_v61 = vadd.f32 %v6566_v33, %v2164_v50  ;;  %v2270_v60 = vmax.f32 %v2238_v47, 0.0  ;;  %v2168_v11 = vadd.f32 %v2167_v51, %v6169_v42 }
 0x42f   : > { %v2169_v7 = vpop.f32.mrf.mxu1 }
 0x430   : > { %v2271_v62 = vmax.f32 %v2239_v61, 0.0  ;;  %v2170_v8 = vadd.f32 %v2169_v7, %v6171_v0  ;;  %v2296_v13 = vpack.c.bf16 %v2270_v60, %v2268_v9  ;;  %v2240_v21 = vadd.f32 %v6570_v36, %v2168_v11 }
 0x431   : > { %v2171_v6 = vpop.f32.mrf.mxu1 }
 0x432   : > { %v2172_v52 = vadd.f32 %v2171_v6, %v6173_v1  ;;  %v2297_v63 = vpack.c.bf16 %v2271_v62, %v2269_v49  ;;  %v2241_v15 = vadd.f32 %v6566_v33, %v2170_v8  ;;  %v2272_v57 = vmax.f32 %v2240_v21, 0.0 }
 0x433   : > { %v2173_v2 = vpop.f32.mrf.mxu1 }
 0x434   : > { %v2242_v23 = vadd.f32 %v6570_v36, %v2172_v52  ;;  %v2174_v55 = vadd.f32 %v2173_v2, %v6175_v3  ;;  %2564 = vmatprep.mubr.bf16.mxu0 %v2297_v63  ;;  %v2273_v25 = vmax.f32 %v2241_v15, 0.0 }
 0x435   : > { %v2177_v22 = vpop.f32.mrf.mxu1  ;;  %2565 = vmatmul.mubr.bf16.gmra.mxu0 %v2296_v13 }
 0x436   : > { %v2243_v0 = vadd.f32 %v6566_v33, %v2174_v55  ;;  %v2274_v42 = vmax.f32 %v2242_v23, 0.0  ;;  %v2178_v56 = vadd.f32 %v2177_v22, %v6177_v4 }
 0x437   : > { %v2179_v26 = vpop.f32.mrf.mxu1 }
 0x438   : > { %v2275_v1 = vmax.f32 %v2243_v0, 0.0  ;;  %v2180_v16 = vadd.f32 %v2179_v26, %v6179_v5  ;;  %v2298_v30 = vpack.c.bf16 %v2274_v42, %v2272_v57  ;;  %v2244_v39 = vadd.f32 %v6570_v36, %v2178_v56 }
 0x439   : > { %v2181_v27 = vpop.f32.mrf.mxu1 }
 0x43a   : > { %v2182_v29 = vadd.f32 %v2181_v27, %v6193_v10  ;;  %v2299_v3 = vpack.c.bf16 %v2275_v1, %v2273_v25  ;;  %v2245_v32 = vadd.f32 %v6566_v33, %v2180_v16  ;;  %v2276_v47 = vmax.f32 %v2244_v39, 0.0 }
 0x43b   : > { %v2183_v58 = vpop.f32.mrf.mxu1 }
 0x43c   : > { %v2246_v35 = vadd.f32 %v6570_v36, %v2182_v29  ;;  %v2184_v38 = vadd.f32 %v2183_v58, %v6201_v14  ;;  %2574 = vmatprep.mubr.bf16.mxu0 %v2299_v3  ;;  %v2277_v44 = vmax.f32 %v2245_v32, 0.0 }
 0x43d   : > { %v2187_v59 = vpop.f32.mrf.mxu1  ;;  %2575 = vmatmul.mubr.bf16.gmra.mxu0 %v2298_v30 }
 0x43e   : > { %v2247_v5 = vadd.f32 %v6566_v33, %v2184_v38  ;;  %v2278_v4 = vmax.f32 %v2246_v35, 0.0  ;;  %v2188_v50 = vadd.f32 %v2187_v59, %v6209_v18 }
 0x43f   : > { %v2189_v43 = vpop.f32.mrf.mxu1 }
 0x440   : > { %v2279_v10 = vmax.f32 %v2247_v5, 0.0  ;;  %v2190_v46 = vadd.f32 %v2189_v43, %v6217_v20  ;;  %v2300_v61 = vpack.c.bf16 %v2278_v4, %v2276_v47  ;;  %v2248_v8 = vadd.f32 %v6570_v36, %v2188_v50  ;;  %v5364_v43 = vld [vmem:[%s7186_s3 + $0x4dc] ss:$60 sps:$4 sm:$0xff]   ;;  %v5376_v50 = vld [vmem:[%s7186_s3 + $0x304] ss:$60 sps:$4 sm:$0xff]  }
 0x441   : > { %v2191_v40 = vpop.f32.mrf.mxu1  ;;  %2903 = vmatprep.subr.bf16.mxu1 %v5364_v43  ;;  %v5373_v47 = vld [vmem:[%s7186_s3 + $0x37c] ss:$60 sps:$4 sm:$0xff]  }
 0x442   : > { %v2192_v51 = vadd.f32 %v2191_v40, %v6225_v24  ;;  %v2301_v14 = vpack.c.bf16 %v2279_v10, %v2277_v44  ;;  %v2249_v7 = vadd.f32 %v6566_v33, %v2190_v46  ;;  %v2280_v63 = vmax.f32 %v2248_v8, 0.0  ;;  %v5370_v44 = vld [vmem:[%s7186_s3 + $0x3ec] ss:$60 sps:$4 sm:$0xff]   ;;  %v5371_v46 = vld [vmem:[%s7186_s3 + $0x378] ss:$60 sps:$4 sm:$0xff]   ;;  %3242 = vmatprep.subr.bf16.mxu0 %v5373_v47 }
 0x443   : > { %v2193_v60 = vpop.f32.mrf.mxu1  ;;  %v5368_v10 = vld [vmem:[%s7186_s3 + $0x3e8] ss:$60 sps:$4 sm:$0xff]   ;;  %3243 = vmatpush1.bf16.msra.mxu0 %v5371_v46  ;;  %v5374_v40 = vld [vmem:[%s7186_s3 + $0x300] ss:$60 sps:$4 sm:$0xff]  }
 0x444   : > { %v2250_v49 = vadd.f32 %v6570_v36, %v2192_v51  ;;  %v2194_v62 = vadd.f32 %v2193_v60, %v6233_v28  ;;  %2584 = vmatprep.mubr.bf16.mxu0 %v2301_v14  ;;  %v2281_v6 = vmax.f32 %v2249_v7, 0.0  ;;  %3244 = vmatprep.subr.bf16.mxu0 %v5376_v50  ;;  %v5379_v51 = vld [vmem:[%s7186_s3 + $0x28c] ss:$60 sps:$4 sm:$0xff]   ;;  %v5385_v7 = vld [vmem:[%s7186_s3 + $0x19c] ss:$60 sps:$4 sm:$0xff]  }
 0x445   : > { %v2197_v9 = vpop.f32.mrf.mxu1  ;;  %2585 = vmatmul.mubr.bf16.gmra.mxu0 %v2300_v61  ;;  %v5377_v14 = vld [vmem:[%s7186_s3 + $0x288] ss:$60 sps:$4 sm:$0xff]   ;;  %v5382_v61 = vld [vmem:[%s7186_s3 + $0x214] ss:$60 sps:$4 sm:$0xff]   ;;  %v5386_v8 = vld [vmem:[%s7186_s3 + $0x120] ss:$60 sps:$4 sm:$0xff]  }
 0x446   : > { %v2251_v20 = vadd.f32 %v6566_v33, %v2194_v62  ;;  %v2282_v18 = vmax.f32 %v2250_v49, 0.0  ;;  %v2198_v2 = vadd.f32 %v2197_v9, %v6241_v31  ;;  %v5380_v60 = vld [vmem:[%s7186_s3 + $0x210] ss:$60 sps:$4 sm:$0xff]   ;;  %v5383_v49 = vld [vmem:[%s7186_s3 + $0x198] ss:$60 sps:$4 sm:$0xff]  }
 0x447   : > { %v2199_v11 = vpop.f32.mrf.mxu1  ;;  %3245 = vmatpush1.bf16.msra.mxu0 %v5374_v40  ;;  %v5388_v62 = vld [vmem:[%s7186_s3 + $0x124] ss:$60 sps:$4 sm:$0xff]   ;;  %v5391_v9 = vld [vmem:[%s7186_s3 + $0xac] ss:$60 sps:$4 sm:$0xff]  }
 0x448   : > { %v2283_v24 = vmax.f32 %v2251_v20, 0.0  ;;  %v2200_v52 = vadd.f32 %v2199_v11, %v6249_v34  ;;  %v2302_v23 = vpack.c.bf16 %v2282_v18, %v2280_v63  ;;  %v2252_v42 = vadd.f32 %v6570_v36, %v2198_v2  ;;  %3246 = vmatprep.subr.bf16.mxu0 %v5379_v51  ;;  %v5389_v20 = vld [vmem:[%s7186_s3 + $0xa8] ss:$60 sps:$4 sm:$0xff]   ;;  %v5394_v18 = vld [vmem:[%s7186_s3 + $0x34] ss:$60 sps:$4 sm:$0xff]  }
 0x449   : > { %v2201_v13 = vpop.f32.mrf.mxu1  ;;  %v5392_v11 = vld [vmem:[%s7186_s3 + $0x30] ss:$60 sps:$4 sm:$0xff]   ;;  %v5398_v63 = vld [vmem:[%s7186_s3 + $0x6c0] ss:$60 sps:$4 sm:$0xff]  }
 0x44a   : > { %v2202_v15 = vadd.f32 %v2201_v13, %v6257_v37  ;;  %v2303_v28 = vpack.c.bf16 %v2283_v24, %v2281_v6  ;;  %v2253_v21 = vadd.f32 %v6566_v33, %v2200_v52  ;;  %v2284_v57 = vmax.f32 %v2252_v42, 0.0  ;;  %v5397_v6 = vld [vmem:[%s7186_s3 + $0x73c] ss:$60 sps:$4 sm:$0xff]   ;;  %v5400_v52 = vld [vmem:[%s7186_s3 + $0x6c4] ss:$60 sps:$4 sm:$0xff]  }
 0x44b   : > { %v2203_v55 = vpop.f32.mrf.mxu1  ;;  %3247 = vmatpush1.bf16.msra.mxu0 %v5377_v14  ;;  %v5395_v24 = vld [vmem:[%s7186_s3 + $0x738] ss:$60 sps:$4 sm:$0xff]   ;;  %v5403_v2 = vld [vmem:[%s7186_s3 + $0x64c] ss:$60 sps:$4 sm:$0xff]  }
 0x44c   : > { %v2254_v22 = vadd.f32 %v6570_v36, %v2202_v15  ;;  %v2204_v0 = vadd.f32 %v2203_v55, %v6265_v41  ;;  %2594 = vmatprep.mubr.bf16.mxu0 %v2303_v28  ;;  %v2285_v1 = vmax.f32 %v2253_v21, 0.0  ;;  %3248 = vmatprep.subr.bf16.mxu0 %v5382_v61  ;;  %v5401_v13 = vld [vmem:[%s7186_s3 + $0x648] ss:$60 sps:$4 sm:$0xff]   ;;  %v5406_v15 = vld [vmem:[%s7186_s3 + $0x5d4] ss:$60 sps:$4 sm:$0xff]  }
 0x44d   : > { %v2207_v26 = vpop.f32.mrf.mxu1  ;;  %2595 = vmatmul.mubr.bf16.gmra.mxu0 %v2302_v23  ;;  %v5404_v28 = vld [vmem:[%s7186_s3 + $0x5d0] ss:$60 sps:$4 sm:$0xff]   ;;  %v5409_v23 = vld [vmem:[%s7186_s3 + $0x55c] ss:$60 sps:$4 sm:$0xff]   ;;  %v2340_v21 = vld [vmem:[%s7189_s6 + $0xa] sm:$0x3] }
 0x44e   : > { %v2255_v34 = vadd.f32 %v6566_v33, %v2204_v0  ;;  %v2286_v31 = vmax.f32 %v2254_v22, 0.0  ;;  %v2208_v56 = vadd.f32 %v2207_v26, %v6273_v45  ;;  %v5407_v55 = vld [vmem:[%s7186_s3 + $0x558] ss:$60 sps:$4 sm:$0xff]   ;;  %v6734_v0 = vrot.slane %v2340_v21, %v5922_v17 }
 0x44f   : > { %v2209_v25 = vpop.f32.mrf.mxu1  ;;  %3249 = vmatpush1.bf16.msra.mxu0 %v5380_v60  ;;  %v6737_v42 = vrot.slane %v2340_v21, %v5927_v19 }
 0x450   : > { %v2287_v37 = vmax.f32 %v2255_v34, 0.0  ;;  %v2210_v16 = vadd.f32 %v2209_v25, %v6281_v48  ;;  %v2304_v3 = vpack.c.bf16 %v2286_v31, %v2284_v57  ;;  %v2256_v38 = vadd.f32 %v6570_v36, %v2208_v56  ;;  %3250 = vmatprep.subr.bf16.mxu0 %v5385_v7 }
 0x451   : > { %v2211_v27 = vpop.f32.mrf.mxu1 }
 0x452   : > { %v2212_v29 = vadd.f32 %v2211_v27, %v6283_v54  ;;  %v2305_v41 = vpack.c.bf16 %v2287_v37, %v2285_v1  ;;  %v2257_v30 = vadd.f32 %v6566_v33, %v2210_v16  ;;  %v2288_v5 = vmax.f32 %v2256_v38, 0.0 }
 0x453   : > { %v2213_v58 = vpop.f32.mrf.mxu1  ;;  %3251 = vmatpush1.bf16.msra.mxu0 %v5383_v49 }
 0x454   : > { %v2258_v32 = vadd.f32 %v6570_v36, %v2212_v29  ;;  %v2214_v35 = vadd.f32 %v2213_v58, %v6285_v53  ;;  %2604 = vmatprep.mubr.bf16.mxu0 %v2305_v41  ;;  %v2289_v45 = vmax.f32 %v2257_v30, 0.0  ;;  %v5362_v53 = vld [vmem:[%s7186_s3 + $0x4d8] ss:$60 sps:$4 sm:$0xff]   ;;  %v5365_v36 = vld [vmem:[%s7186_s3 + $0x460] ss:$60 sps:$4 sm:$0xff]   ;;  %3252 = vmatprep.subr.bf16.mxu0 %v5388_v62 }
 0x455   : > { %2605 = vmatmul.mubr.bf16.gmra.mxu0 %v2304_v3  ;;  %2904 = vmatpush2.bf16.msra.mxu1 %v5362_v53 }
 0x456   : > { %v2259_v48 = vadd.f32 %v6566_v33, %v2214_v35  ;;  %v2290_v39 = vmax.f32 %v2258_v32, 0.0  ;;  %v5367_v33 = vld [vmem:[%s7186_s3 + $0x464] ss:$60 sps:$4 sm:$0xff]  }
 0x457   : > { %2905 = vmatprep.subr.bf16.mxu1 %v5367_v33  ;;  %3253 = vmatpush1.bf16.msra.mxu0 %v5386_v8 }
 0x458   : > { %v2291_v59 = vmax.f32 %v2259_v48, 0.0  ;;  %v2306_v4 = vpack.c.bf16 %v2290_v39, %v2288_v5  ;;  %3254 = vmatprep.subr.bf16.mxu0 %v5391_v9 }
 0x459   : > { %2906 = vmatpush2.bf16.msra.mxu1 %v5365_v36 }
 0x45a   : > { %v2307_v54 = vpack.c.bf16 %v2291_v59, %v2289_v45  ;;  %2907 = vmatprep.subr.bf16.mxu1 %v5370_v44 }
 0x45b   : > { %3255 = vmatpush1.bf16.msra.mxu0 %v5389_v20 }
 0x45c   : > { %2614 = vmatprep.mubr.bf16.mxu0 %v2307_v54  ;;  %3256 = vmatprep.subr.bf16.mxu0 %v5394_v18 }
 0x45d   : > { %2615 = vmatmul.mubr.bf16.gmra.mxu0 %v2306_v4  ;;  %2908 = vmatpush2.bf16.msra.mxu1 %v5368_v10 }
 0x45f   : > { %3257 = vmatpush1.bf16.msra.mxu0 %v5392_v11 }
 0x460   : > { %3258 = vmatprep.subr.bf16.mxu0 %v5397_v6 }
 0x463   : > { %3259 = vmatpush2.bf16.msra.mxu0 %v5395_v24 }
 0x464   : > { %3260 = vmatprep.subr.bf16.mxu0 %v5400_v52 }
 0x467   : > { %3261 = vmatpush2.bf16.msra.mxu0 %v5398_v63 }
 0x468   : > { %3262 = vmatprep.subr.bf16.mxu0 %v5403_v2 }
 0x46b   : > { %3263 = vmatpush2.bf16.msra.mxu0 %v5401_v13 }
 0x46c   : > { %3264 = vmatprep.subr.bf16.mxu0 %v5406_v15 }
 0x46f   : > { %3265 = vmatpush2.bf16.msra.mxu0 %v5404_v28 }
 0x470   : > { %3266 = vmatprep.subr.bf16.mxu0 %v5409_v23 }
 0x473   : > { %3267 = vmatpush2.bf16.msra.mxu0 %v5407_v55 }
 0x4e5   : > { %v2546_v22 = vpop.f32.mrf.mxu0 }
 0x4e6   : > { %v2547_v1 = vadd.f32 %v2546_v22, %v6737_v42 }
 0x4e7   : > { %v2548_v26 = vpop.f32.mrf.mxu0 }
 0x4e8   : > { %v2549_v31 = vadd.f32 %v2548_v26, %v6734_v0  ;;  %v2625_v41 = vmax.f32 %v2547_v1, 0.0 }
 0x4e9   : > { %v2550_v34 = vpop.f32.mrf.mxu0 }
 0x4ea   : > { %v2551_v25 = vadd.f32 %v2550_v34, %v6737_v42  ;;  %v2626_v27 = vmax.f32 %v2549_v31, 0.0 }
 0x4eb   : > { %v2552_v37 = vpop.f32.mrf.mxu0 }
 0x4ec   : > { %v2553_v16 = vadd.f32 %v2552_v37, %v6734_v0  ;;  %v2627_v57 = vmax.f32 %v2551_v25, 0.0 }
 0x4ed   : > { %v2556_v56 = vpop.f32.mrf.mxu0 }
 0x4ee   : > { %v2628_v29 = vmax.f32 %v2553_v16, 0.0  ;;  %v2657_v30 = vpack.c.bf16 %v2627_v57, %v2625_v41  ;;  %v2557_v48 = vadd.f32 %v2556_v56, %v6737_v42 }
 0x4ef   : > { %v2558_v3 = vpop.f32.mrf.mxu0 }
 0x4f0   : > { %v2658_v58 = vpack.c.bf16 %v2628_v29, %v2626_v27  ;;  %v2559_v35 = vadd.f32 %v2558_v3, %v6734_v0  ;;  %v2629_v43 = vmax.f32 %v2557_v48, 0.0 }
 0x4f1   : > { %v2560_v32 = vpop.f32.mrf.mxu0 }
 0x4f2   : > { %v2561_v38 = vadd.f32 %v2560_v32, %v6737_v42  ;;  %2909 = vmatprep.mubr.bf16.mxu1 %v2658_v58  ;;  %v2630_v54 = vmax.f32 %v2559_v35, 0.0 }
 0x4f3   : > { %v2562_v39 = vpop.f32.mrf.mxu0  ;;  %2910 = vmatmul.mubr.bf16.vlgmr.msra.gmra.mxu1 %v2657_v30 }
 0x4f4   : > { %v2563_v45 = vadd.f32 %v2562_v39, %v6734_v0  ;;  %v2631_v59 = vmax.f32 %v2561_v38, 0.0 }
 0x4f5   : > { %v2566_v5 = vpop.f32.mrf.mxu0 }
 0x4f6   : > { %v2632_v4 = vmax.f32 %v2563_v45, 0.0  ;;  %v2659_v36 = vpack.c.bf16 %v2631_v59, %v2629_v43  ;;  %v2567_v47 = vadd.f32 %v2566_v5, %v6737_v42 }
 0x4f7   : > { %v2568_v53 = vpop.f32.mrf.mxu0 }
 0x4f8   : > { %v2660_v33 = vpack.c.bf16 %v2632_v4, %v2630_v54  ;;  %v2569_v10 = vadd.f32 %v2568_v53, %v6734_v0  ;;  %v2633_v7 = vmax.f32 %v2567_v47, 0.0 }
 0x4f9   : > { %v2570_v44 = vpop.f32.mrf.mxu0 }
 0x4fa   : > { %v2571_v46 = vadd.f32 %v2570_v44, %v6737_v42  ;;  %2919 = vmatprep.mubr.bf16.mxu1 %v2660_v33  ;;  %v2634_v61 = vmax.f32 %v2569_v10, 0.0 }
 0x4fb   : > { %v2572_v50 = vpop.f32.mrf.mxu0  ;;  %2920 = vmatmul.mubr.bf16.gmra.mxu1 %v2659_v36 }
 0x4fc   : > { %v2573_v40 = vadd.f32 %v2572_v50, %v6734_v0  ;;  %v2635_v51 = vmax.f32 %v2571_v46, 0.0 }
 0x4fd   : > { %v2576_v14 = vpop.f32.mrf.mxu0 }
 0x4fe   : > { %v2636_v60 = vmax.f32 %v2573_v40, 0.0  ;;  %v2661_v8 = vpack.c.bf16 %v2635_v51, %v2633_v7  ;;  %v2577_v11 = vadd.f32 %v2576_v14, %v6737_v42 }
 0x4ff   : > { %v2578_v49 = vpop.f32.mrf.mxu0 }
 0x500   : > { %v2662_v62 = vpack.c.bf16 %v2636_v60, %v2634_v61  ;;  %v2579_v20 = vadd.f32 %v2578_v49, %v6734_v0  ;;  %v2637_v15 = vmax.f32 %v2577_v11, 0.0 }
 0x501   : > { %v2580_v9 = vpop.f32.mrf.mxu0 }
 0x502   : > { %v2581_v18 = vadd.f32 %v2580_v9, %v6737_v42  ;;  %2929 = vmatprep.mubr.bf16.mxu1 %v2662_v62  ;;  %v2638_v2 = vmax.f32 %v2579_v20, 0.0 }
 0x503   : > { %v2582_v6 = vpop.f32.mrf.mxu0  ;;  %2930 = vmatmul.mubr.bf16.gmra.mxu1 %v2661_v8 }
 0x504   : > { %v2583_v24 = vadd.f32 %v2582_v6, %v6734_v0  ;;  %v2639_v52 = vmax.f32 %v2581_v18, 0.0 }
 0x505   : > { %v2586_v63 = vpop.f32.mrf.mxu0 }
 0x506   : > { %v2640_v13 = vmax.f32 %v2583_v24, 0.0  ;;  %v2663_v55 = vpack.c.bf16 %v2639_v52, %v2637_v15  ;;  %v2587_v34 = vadd.f32 %v2586_v63, %v6737_v42  ;;  %v5413_v15 = vld [vmem:[%s7186_s3 + $0x468] ss:$60 sps:$4 sm:$0xff]  }
 0x507   : > { %v2588_v28 = vpop.f32.mrf.mxu0 }
 0x508   : > { %v2664_v23 = vpack.c.bf16 %v2640_v13, %v2638_v2  ;;  %v2589_v22 = vadd.f32 %v2588_v28, %v6734_v0  ;;  %v2641_v56 = vmax.f32 %v2587_v34, 0.0  ;;  %v5412_v13 = vld [vmem:[%s7186_s3 + $0x4e4] ss:$60 sps:$4 sm:$0xff]   ;;  %v5418_v28 = vld [vmem:[%s7186_s3 + $0x3f4] ss:$60 sps:$4 sm:$0xff]  }
 0x509   : > { %v2590_v21 = vpop.f32.mrf.mxu0  ;;  %3268 = vmatprep.subr.bf16.mxu0 %v5412_v13 }
 0x50a   : > { %v2591_v26 = vadd.f32 %v2590_v21, %v6737_v42  ;;  %2939 = vmatprep.mubr.bf16.mxu1 %v2664_v23  ;;  %v2642_v16 = vmax.f32 %v2589_v22, 0.0  ;;  %v5416_v23 = vld [vmem:[%s7186_s3 + $0x3f0] ss:$60 sps:$4 sm:$0xff]   ;;  %v5420_v21 = vld [vmem:[%s7187_s4] sm:$0xff]  }
 0x50b   : > { %v2592_v31 = vpop.f32.mrf.mxu0  ;;  %2940 = vmatmul.mubr.bf16.gmra.mxu1 %v2663_v55  ;;  %v5419_v55 = vld [vmem:[%s7187_s4 + $0x8] sm:$0xff]  }
 0x50c   : > { %v2593_v25 = vadd.f32 %v2592_v31, %v6734_v0  ;;  %v2643_v1 = vmax.f32 %v2591_v26, 0.0  ;;  %4988 = vmatprep.subr.bf16.mxu1 %v5419_v55  ;;  %v2705_v22 = vld [vmem:[%s7189_s6 + $0xc] sm:$0x3] }
 0x50d   : > { %v2596_v37 = vpop.f32.mrf.mxu0  ;;  %4989 = vmatpush3.bf16.msra.mxu1 %v5419_v55  ;;  %v6799_v26 = vrot.slane %v2705_v22, %v5927_v19  ;;  %v6802_v31 = vrot.slane %v2705_v22, %v5922_v17 }
 0x50e   : > { %v2644_v57 = vmax.f32 %v2593_v25, 0.0  ;;  %v2665_v41 = vpack.c.bf16 %v2643_v1, %v2641_v56  ;;  %v2597_v32 = vadd.f32 %v2596_v37, %v6737_v42  ;;  %4990 = vmatprep.subr.bf16.mxu1 %v5420_v21 }
 0x50f   : > { %v2598_v27 = vpop.f32.mrf.mxu0 }
 0x510   : > { %v2666_v29 = vpack.c.bf16 %v2644_v57, %v2642_v16  ;;  %v2599_v58 = vadd.f32 %v2598_v27, %v6734_v0  ;;  %v2645_v5 = vmax.f32 %v2597_v32, 0.0 }
 0x511   : > { %v2600_v3 = vpop.f32.mrf.mxu0  ;;  %4991 = vmatpush3.bf16.msra.mxu1 %v5420_v21 }
 0x512   : > { %v2601_v30 = vadd.f32 %v2600_v3, %v6737_v42  ;;  %2949 = vmatprep.mubr.bf16.mxu1 %v2666_v29  ;;  %v2646_v45 = vmax.f32 %v2599_v58, 0.0  ;;  %v3387_v58 = vld [vmem:[%s7189_s6 + $0x12] sm:$0x3] }
 0x513   : > { %v2602_v35 = vpop.f32.mrf.mxu0  ;;  %2950 = vmatmul.mubr.bf16.gmra.mxu1 %v2665_v41 }
 0x514   : > { %v2603_v38 = vadd.f32 %v2602_v35, %v6734_v0  ;;  %v2647_v48 = vmax.f32 %v2601_v30, 0.0 }
 0x515   : > { %v2606_v39 = vpop.f32.mrf.mxu0 }
 0x516   : > { %v2648_v59 = vmax.f32 %v2603_v38, 0.0  ;;  %v2667_v43 = vpack.c.bf16 %v2647_v48, %v2645_v5  ;;  %v2607_v44 = vadd.f32 %v2606_v39, %v6737_v42  ;;  %v6816_v5 = vrot.slane %v3387_v58, %v5922_v17 }
 0x517   : > { %v2608_v54 = vpop.f32.mrf.mxu0 }
 0x518   : > { %v2668_v4 = vpack.c.bf16 %v2648_v59, %v2646_v45  ;;  %v2609_v33 = vadd.f32 %v2608_v54, %v6734_v0  ;;  %v2649_v14 = vmax.f32 %v2607_v44, 0.0  ;;  %v6813_v59 = vrot.slane %v3387_v58, %v5927_v19 }
 0x519   : > { %v2610_v53 = vpop.f32.mrf.mxu0 }
 0x51a   : > { %v2611_v36 = vadd.f32 %v2610_v53, %v6737_v42  ;;  %2959 = vmatprep.mubr.bf16.mxu1 %v2668_v4  ;;  %v2650_v40 = vmax.f32 %v2609_v33, 0.0 }
 0x51b   : > { %v2612_v10 = vpop.f32.mrf.mxu0  ;;  %2960 = vmatmul.mubr.bf16.gmra.mxu1 %v2667_v43 }
 0x51c   : > { %v2613_v46 = vadd.f32 %v2612_v10, %v6734_v0  ;;  %v2651_v47 = vmax.f32 %v2611_v36, 0.0 }
 0x51d   : > { %v2616_v50 = vpop.f32.mrf.mxu0 }
 0x51e   : > { %v2652_v51 = vmax.f32 %v2613_v46, 0.0  ;;  %v2669_v7 = vpack.c.bf16 %v2651_v47, %v2649_v14  ;;  %v2617_v9 = vadd.f32 %v2616_v50, %v6737_v42 }
 0x51f   : > { %v2618_v61 = vpop.f32.mrf.mxu0 }
 0x520   : > { %v2670_v60 = vpack.c.bf16 %v2652_v51, %v2650_v40  ;;  %v2619_v62 = vadd.f32 %v2618_v61, %v6734_v0  ;;  %v2653_v52 = vmax.f32 %v2617_v9, 0.0 }
 0x521   : > { %v2620_v49 = vpop.f32.mrf.mxu0 }
 0x522   : > { %v2621_v8 = vadd.f32 %v2620_v49, %v6737_v42  ;;  %2969 = vmatprep.mubr.bf16.mxu1 %v2670_v60  ;;  %v2654_v6 = vmax.f32 %v2619_v62, 0.0  ;;  %v5410_v42 = vld [vmem:[%s7186_s3 + $0x4e0] ss:$60 sps:$4 sm:$0xff]  }
 0x523   : > { %v2622_v20 = vpop.f32.mrf.mxu0  ;;  %2970 = vmatmul.mubr.bf16.gmra.mxu1 %v2669_v7  ;;  %3269 = vmatpush2.bf16.msra.mxu0 %v5410_v42 }
 0x524   : > { %v2623_v18 = vadd.f32 %v2622_v20, %v6734_v0  ;;  %v2655_v11 = vmax.f32 %v2621_v8, 0.0  ;;  %v5415_v0 = vld [vmem:[%s7186_s3 + $0x46c] ss:$60 sps:$4 sm:$0xff]  }
 0x525   : > { %3270 = vmatprep.subr.bf16.mxu0 %v5415_v0 }
 0x526   : > { %v2656_v24 = vmax.f32 %v2623_v18, 0.0  ;;  %v2671_v2 = vpack.c.bf16 %v2655_v11, %v2653_v52 }
 0x527   : > { %3271 = vmatpush2.bf16.msra.mxu0 %v5413_v15 }
 0x528   : > { %v2672_v63 = vpack.c.bf16 %v2656_v24, %v2654_v6  ;;  %3272 = vmatprep.subr.bf16.mxu0 %v5418_v28 }
 0x52a   : > { %2979 = vmatprep.mubr.bf16.mxu1 %v2672_v63 }
 0x52b   : > { %2980 = vmatmul.mubr.bf16.gmra.mxu1 %v2671_v2  ;;  %3273 = vmatpush2.bf16.msra.mxu0 %v5416_v23 }
 0x5b3   : > { %v2911_v34 = vpop.f32.mrf.mxu1 }
 0x5b4   : > { %v2912_v1 = vadd.f32 %v2911_v34, %v6799_v26 }
 0x5b5   : > { %v2913_v25 = vpop.f32.mrf.mxu1 }
 0x5b6   : > { %v2914_v16 = vadd.f32 %v2913_v25, %v6802_v31  ;;  %v2990_v27 = vmax.f32 %v2912_v1, 0.0 }
 0x5b7   : > { %v2915_v37 = vpop.f32.mrf.mxu1 }
 0x5b8   : > { %v2916_v57 = vadd.f32 %v2915_v37, %v6799_v26  ;;  %v2991_v30 = vmax.f32 %v2914_v16, 0.0 }
 0x5b9   : > { %v2917_v56 = vpop.f32.mrf.mxu1 }
 0x5ba   : > { %v2992_v29 = vmax.f32 %v2916_v57, 0.0  ;;  %v2918_v41 = vadd.f32 %v2917_v56, %v6802_v31 }
 0x5bb   : > { %v2921_v3 = vpop.f32.mrf.mxu1 }
 0x5bc   : > { %v3022_v32 = vpack.c.bf16 %v2992_v29, %v2990_v27  ;;  %v2993_v35 = vmax.f32 %v2918_v41, 0.0  ;;  %v2922_v38 = vadd.f32 %v2921_v3, %v6799_v26 }
 0x5bd   : > { %v2923_v48 = vpop.f32.mrf.mxu1 }
 0x5be   : > { %v3023_v39 = vpack.c.bf16 %v2993_v35, %v2991_v30  ;;  %v3355_v45 = vunpack.c.l.bf16 %v3022_v32  ;;  %v2924_v54 = vadd.f32 %v2923_v48, %v6802_v31  ;;  %v2994_v33 = vmax.f32 %v2922_v38, 0.0 }
 0x5bf   : > { %v2925_v4 = vpop.f32.mrf.mxu1  ;;  %v3357_v44 = vunpack.c.h.bf16 %v3022_v32 }
 0x5c0   : > { %v2926_v43 = vadd.f32 %v2925_v4, %v6799_v26  ;;  %3274 = vmatprep.mubr.bf16.mxu0 %v3023_v39  ;;  %v3356_v53 = vunpack.c.l.bf16 %v3023_v39  ;;  %v3358_v10 = vunpack.c.h.bf16 %v3023_v39  ;;  %v3399_v50 = vmul.f32 %v6813_v59, %v3355_v45 }
 0x5c1   : > { %v2927_v36 = vpop.f32.mrf.mxu1  ;;  %3275 = vmatmul.mubr.bf16.vlgmr.msra.gmra.mxu0 %v3022_v32  ;;  %v2995_v51 = vmax.f32 %v2924_v54, 0.0  ;;  %v3401_v20 = vmul.f32 %v6813_v59, %v3357_v44 }
 0x5c2   : > { %v2996_v46 = vmax.f32 %v2926_v43, 0.0  ;;  %v2928_v47 = vadd.f32 %v2927_v36, %v6802_v31  ;;  %v3400_v40 = vmul.f32 %v6816_v5, %v3356_v53  ;;  %v3402_v49 = vmul.f32 %v6816_v5, %v3358_v10 }
 0x5c3   : > { %v2931_v14 = vpop.f32.mrf.mxu1 }
 0x5c4   : > { %v3024_v61 = vpack.c.bf16 %v2996_v46, %v2994_v33  ;;  %v2997_v60 = vmax.f32 %v2928_v47, 0.0  ;;  %v3431_v7 = vadd.f32 %v3400_v40, %v3399_v50  ;;  %v2932_v62 = vadd.f32 %v2931_v14, %v6799_v26 }
 0x5c5   : > { %v2933_v8 = vpop.f32.mrf.mxu1  ;;  %v3434_v52 = vadd.f32 %v3402_v49, %v3401_v20 }
 0x5c6   : > { %v3025_v9 = vpack.c.bf16 %v2997_v60, %v2995_v51  ;;  %3432 = vadd.xlane.f32.xlu0 %v3431_v7  ;;  %v3359_v18 = vunpack.c.l.bf16 %v3024_v61  ;;  %v2934_v11 = vadd.f32 %v2933_v8, %v6802_v31  ;;  %v2998_v2 = vmax.f32 %v2932_v62, 0.0 }
 0x5c7   : > { %v2935_v6 = vpop.f32.mrf.mxu1  ;;  %v3361_v42 = vunpack.c.h.bf16 %v3024_v61 }
 0x5c8   : > { %v2936_v24 = vadd.f32 %v2935_v6, %v6799_v26  ;;  %3284 = vmatprep.mubr.bf16.mxu0 %v3025_v9  ;;  %v3360_v63 = vunpack.c.l.bf16 %v3025_v9  ;;  %v3362_v0 = vunpack.c.h.bf16 %v3025_v9  ;;  %v3403_v23 = vmul.f32 %v6813_v59, %v3359_v18 }
 0x5c9   : > { %v2937_v13 = vpop.f32.mrf.mxu1  ;;  %3285 = vmatmul.mubr.bf16.gmra.mxu0 %v3024_v61  ;;  %v2999_v21 = vmax.f32 %v2934_v11, 0.0  ;;  %v3405_v27 = vmul.f32 %v6813_v59, %v3361_v42 }
 0x5ca   : > { %v3000_v15 = vmax.f32 %v2936_v24, 0.0  ;;  %v2938_v28 = vadd.f32 %v2937_v13, %v6802_v31  ;;  %3435 = vadd.xlane.f32.xlu0 %v3434_v52  ;;  %v3404_v55 = vmul.f32 %v6816_v5, %v3360_v63  ;;  %v3406_v37 = vmul.f32 %v6816_v5, %v3362_v0 }
 0x5cb   : > { %v2941_v22 = vpop.f32.mrf.mxu1 }
 0x5cc   : > { %v3026_v34 = vpack.c.bf16 %v3000_v15, %v2998_v2  ;;  %v3001_v25 = vmax.f32 %v2938_v28, 0.0  ;;  %v3437_v1 = vadd.f32 %v3404_v55, %v3403_v23  ;;  %v2942_v16 = vadd.f32 %v2941_v22, %v6799_v26 }
 0x5cd   : > { %v2943_v57 = vpop.f32.mrf.mxu1  ;;  %v3440_v32 = vadd.f32 %v3406_v37, %v3405_v27 }
 0x5ce   : > { %v3027_v56 = vpack.c.bf16 %v3001_v25, %v2999_v21  ;;  %3438 = vadd.xlane.f32.xlu1 %v3437_v1  ;;  %v3365_v29 = vunpack.c.h.bf16 %v3026_v34  ;;  %v3363_v3 = vunpack.c.l.bf16 %v3026_v34  ;;  %v2944_v58 = vadd.f32 %v2943_v57, %v6802_v31 }
 0x5cf   : > { %v2945_v41 = vpop.f32.mrf.mxu1  ;;  %v3002_v38 = vmax.f32 %v2942_v16, 0.0 }
 0x5d0   : > { %v2946_v30 = vadd.f32 %v2945_v41, %v6799_v26  ;;  %3294 = vmatprep.mubr.bf16.mxu0 %v3027_v56  ;;  %v3366_v35 = vunpack.c.h.bf16 %v3027_v56  ;;  %v3364_v39 = vunpack.c.l.bf16 %v3027_v56  ;;  %v3409_v4 = vmul.f32 %v6813_v59, %v3365_v29 }
 0x5d1   : > { %v2947_v48 = vpop.f32.mrf.mxu1  ;;  %3295 = vmatmul.mubr.bf16.gmra.mxu0 %v3026_v34  ;;  %v3407_v33 = vmul.f32 %v6813_v59, %v3363_v3  ;;  %v3003_v44 = vmax.f32 %v2944_v58, 0.0 }
 0x5d2   : > { %v3004_v45 = vmax.f32 %v2946_v30, 0.0  ;;  %v2948_v54 = vadd.f32 %v2947_v48, %v6802_v31  ;;  %3441 = vadd.xlane.f32.xlu1 %v3440_v32  ;;  %v3410_v43 = vmul.f32 %v6816_v5, %v3366_v35  ;;  %v3408_v36 = vmul.f32 %v6816_v5, %v3364_v39 }
 0x5d3   : > { %v2951_v53 = vpop.f32.mrf.mxu1 }
 0x5d4   : > { %v3028_v10 = vpack.c.bf16 %v3004_v45, %v3002_v38  ;;  %v3005_v46 = vmax.f32 %v2948_v54, 0.0  ;;  %v3446_v47 = vadd.f32 %v3410_v43, %v3409_v4  ;;  %v2952_v50 = vadd.f32 %v2951_v53, %v6799_v26 }
 0x5d5   : > { %v2953_v40 = vpop.f32.mrf.mxu1  ;;  %v3443_v51 = vadd.f32 %v3408_v36, %v3407_v33 }
 0x5d6   : > { %v3029_v14 = vpack.c.bf16 %v3005_v46, %v3003_v44  ;;  %3447 = vadd.xlane.f32.xlu1 %v3446_v47  ;;  %v3369_v61 = vunpack.c.h.bf16 %v3028_v10  ;;  %v3367_v7 = vunpack.c.l.bf16 %v3028_v10  ;;  %v2954_v49 = vadd.f32 %v2953_v40, %v6802_v31  ;;  %v5421_v46 = vld [vmem:[%s6863_s11] sm:$0xff]  }
 0x5d7   : > { %3444 = vadd.xlane.f32.xlu0 %v3443_v51  ;;  %v2955_v60 = vpop.f32.mrf.mxu1  ;;  %v3006_v9 = vmax.f32 %v2952_v50, 0.0  ;;  %v5422_v51 = vld [vmem:[%s6863_s11 + $0x8] sm:$0xff]   ;;  %4992 = vmatprep.mubr.msk.bf16.mxu1 %vm3654_vm1, %v5421_v46 }
 0x5d8   : > { %v2956_v62 = vadd.f32 %v2955_v60, %v6799_v26  ;;  %3304 = vmatprep.mubr.bf16.mxu0 %v3029_v14  ;;  %v3370_v8 = vunpack.c.h.bf16 %v3029_v14  ;;  %v3368_v18 = vunpack.c.l.bf16 %v3029_v14  ;;  %v3413_v24 = vmul.f32 %v6813_v59, %v3369_v61  ;;  %4993 = vmatmul.mubr.msk.bf16.vlgmr.msra.gmra.mxu1 %vm3654_vm1, %v5422_v51  ;;  %v5434_v51 = vld [vmem:[%s7186_s3 + $0x218] ss:$60 sps:$4 sm:$0xff]  }
 0x5d9   : > { %v2957_v20 = vpop.f32.mrf.mxu1  ;;  %3305 = vmatmul.mubr.bf16.gmra.mxu0 %v3028_v10  ;;  %v3411_v2 = vmul.f32 %v6813_v59, %v3367_v7  ;;  %v3007_v42 = vmax.f32 %v2954_v49, 0.0 }
 0x5da   : > { %v3008_v11 = vmax.f32 %v2956_v62, 0.0  ;;  %v2958_v6 = vadd.f32 %v2957_v20, %v6802_v31  ;;  %v3414_v52 = vmul.f32 %v6816_v5, %v3370_v8  ;;  %v3412_v13 = vmul.f32 %v6816_v5, %v3368_v18 }
 0x5db   : > { %v2961_v63 = vpop.f32.mrf.mxu1 }
 0x5dc   : > { %v3030_v0 = vpack.c.bf16 %v3008_v11, %v3006_v9  ;;  %v3009_v15 = vmax.f32 %v2958_v6, 0.0  ;;  %v3452_v28 = vadd.f32 %v3414_v52, %v3413_v24  ;;  %v2962_v23 = vadd.f32 %v2961_v63, %v6799_v26 }
 0x5dd   : > { %v2963_v55 = vpop.f32.mrf.mxu1  ;;  %v3449_v21 = vadd.f32 %v3412_v13, %v3411_v2 }
 0x5de   : > { %v3031_v22 = vpack.c.bf16 %v3009_v15, %v3007_v42  ;;  %3453 = vadd.xlane.f32.xlu1 %v3452_v28  ;;  %v3373_v34 = vunpack.c.h.bf16 %v3030_v0  ;;  %v3371_v1 = vunpack.c.l.bf16 %v3030_v0  ;;  %v2964_v37 = vadd.f32 %v2963_v55, %v6802_v31  ;;  %v5423_v42 = vld [vmem:[%s7186_s3 + $0x740] ss:$60 sps:$4 sm:$0xff]  }
 0x5df   : > { %3450 = vadd.xlane.f32.xlu0 %v3449_v21  ;;  %v2965_v25 = vpop.f32.mrf.mxu1  ;;  %v3010_v56 = vmax.f32 %v2962_v23, 0.0  ;;  %4908 = vmatprep.subr.bf16.mxu1 %v5423_v42  ;;  %v5424_v55 = vld [vmem:[%s7186_s3 + $0x380] ss:$60 sps:$4 sm:$0xff]   ;;  %v5425_v21 = vld [vmem:[%s6863_s11 + $0x10] sm:$0xff]  }
 0x5e0   : > { %v2966_v16 = vadd.f32 %v2965_v25, %v6799_v26  ;;  %3314 = vmatprep.mubr.bf16.mxu0 %v3031_v22  ;;  %v3374_v57 = vunpack.c.h.bf16 %v3031_v22  ;;  %v3372_v29 = vunpack.c.l.bf16 %v3031_v22  ;;  %v3417_v58 = vmul.f32 %v6813_v59, %v3373_v34  ;;  %4909 = vmatpush3.bf16.msra.mxu1 %v5424_v55 }
 0x5e1   : > { %v2967_v27 = vpop.f32.mrf.mxu1  ;;  %3315 = vmatmul.mubr.bf16.gmra.mxu0 %v3030_v0  ;;  %v3415_v35 = vmul.f32 %v6813_v59, %v3371_v1  ;;  %v3011_v48 = vmax.f32 %v2964_v37, 0.0  ;;  %v5426_v1 = vld [vmem:[%s6863_s11 + $0x18] sm:$0xff]   ;;  %4996 = vmatprep.mubr.msk.bf16.mxu1 %vm3654_vm1, %v5425_v21 }
 0x5e2   : > { %v3012_v41 = vmax.f32 %v2966_v16, 0.0  ;;  %v2968_v3 = vadd.f32 %v2967_v27, %v6802_v31  ;;  %v3418_v30 = vmul.f32 %v6816_v5, %v3374_v57  ;;  %v3416_v38 = vmul.f32 %v6816_v5, %v3372_v29  ;;  %4997 = vmatmul.mubr.msk.bf16.gmra.mxu1 %vm3654_vm1, %v5426_v1 }
 0x5e3   : > { %v2971_v32 = vpop.f32.mrf.mxu1 }
 0x5e4   : > { %v3032_v39 = vpack.c.bf16 %v3012_v41, %v3010_v56  ;;  %v3013_v45 = vmax.f32 %v2968_v3, 0.0  ;;  %v3458_v54 = vadd.f32 %v3418_v30, %v3417_v58  ;;  %v2972_v4 = vadd.f32 %v2971_v32, %v6799_v26 }
 0x5e5   : > { %v2973_v43 = vpop.f32.mrf.mxu1  ;;  %v3455_v53 = vadd.f32 %v3416_v38, %v3415_v35 }
 0x5e6   : > { %v3033_v33 = vpack.c.bf16 %v3013_v45, %v3011_v48  ;;  %3459 = vadd.xlane.f32.xlu1 %v3458_v54  ;;  %v3377_v36 = vunpack.c.h.bf16 %v3032_v39  ;;  %v3375_v10 = vunpack.c.l.bf16 %v3032_v39  ;;  %v2974_v47 = vadd.f32 %v2973_v43, %v6802_v31  ;;  %v5430_v43 = vld [vmem:[%s7186_s3 + $0x290] ss:$60 sps:$4 sm:$0xff]  }
 0x5e7   : > { %3456 = vadd.xlane.f32.xlu0 %v3455_v53  ;;  %v2975_v44 = vpop.f32.mrf.mxu1  ;;  %v3014_v14 = vmax.f32 %v2972_v4, 0.0  ;;  %v5431_v53 = vld [vmem:[%s6863_s11 + $0x20] sm:$0xff]  }
 0x5e8   : > { %v2976_v50 = vadd.f32 %v2975_v44, %v6799_v26  ;;  %3324 = vmatprep.mubr.bf16.mxu0 %v3033_v33  ;;  %v3378_v40 = vunpack.c.h.bf16 %v3033_v33  ;;  %v3376_v60 = vunpack.c.l.bf16 %v3033_v33  ;;  %v3421_v62 = vmul.f32 %v6813_v59, %v3377_v36  ;;  %v5432_v44 = vld [vmem:[%s6863_s11 + $0x28] sm:$0xff]   ;;  %5000 = vmatprep.mubr.msk.bf16.mxu1 %vm3654_vm1, %v5431_v53 }
 0x5e9   : > { %v2977_v61 = vpop.f32.mrf.mxu1  ;;  %3325 = vmatmul.mubr.bf16.gmra.mxu0 %v3032_v39  ;;  %v3419_v20 = vmul.f32 %v6813_v59, %v3375_v10  ;;  %v3015_v11 = vmax.f32 %v2974_v47, 0.0  ;;  %v5429_v39 = vld [vmem:[%s7186_s3 + $0x650] ss:$60 sps:$4 sm:$0xff]  }
 0x5ea   : > { %v3016_v7 = vmax.f32 %v2976_v50, 0.0  ;;  %v2978_v49 = vadd.f32 %v2977_v61, %v6802_v31  ;;  %v3422_v8 = vmul.f32 %v6816_v5, %v3378_v40  ;;  %v3420_v18 = vmul.f32 %v6816_v5, %v3376_v60  ;;  %v5433_v40 = vld [vmem:[%s7186_s3 + $0x5d8] ss:$60 sps:$4 sm:$0xff]   ;;  %5001 = vmatmul.mubr.msk.bf16.gmra.mxu1 %vm3654_vm1, %v5432_v44 }
 0x5eb   : > { %v2981_v9 = vpop.f32.mrf.mxu1  ;;  %v5437_v60 = vld [vmem:[%s6863_s11 + $0x30] sm:$0xff]  }
 0x5ec   : > { %v3034_v6 = vpack.c.bf16 %v3016_v7, %v3014_v14  ;;  %v3017_v24 = vmax.f32 %v2978_v49, 0.0  ;;  %v3464_v52 = vadd.f32 %v3422_v8, %v3421_v62  ;;  %v2982_v63 = vadd.f32 %v2981_v9, %v6799_v26  ;;  %v5438_v7 = vld [vmem:[%s6863_s11 + $0x38] sm:$0xff]   ;;  %5004 = vmatprep.mubr.msk.bf16.mxu1 %vm3654_vm1, %v5437_v60  ;;  %v5439_v49 = vld [vmem:[%s7186_s3 + $0x4e8] ss:$60 sps:$4 sm:$0xff]   ;;  %v5441_v8 = vld [vmem:[%s7186_s3 + $0x470] ss:$60 sps:$4 sm:$0xff]  }
 0x5ed   : > { %v2983_v2 = vpop.f32.mrf.mxu1  ;;  %v3461_v13 = vadd.f32 %v3420_v18, %v3419_v20  ;;  %v5440_v62 = vld [vmem:[%s7186_s3 + $0x128] ss:$60 sps:$4 sm:$0xff]   ;;  %v5442_v9 = vld [vmem:[%s7186_s3 + $0xb0] ss:$60 sps:$4 sm:$0xff]   ;;  %v5443_v20 = vld [vmem:[%s7186_s3 + $0x3f8] ss:$60 sps:$4 sm:$0xff]  }
 0x5ee   : > { %v3035_v0 = vpack.c.bf16 %v3017_v24, %v3015_v11  ;;  %3465 = vadd.xlane.f32.xlu1 %v3464_v52  ;;  %v3381_v15 = vunpack.c.h.bf16 %v3034_v6  ;;  %v3379_v23 = vunpack.c.l.bf16 %v3034_v6  ;;  %v2984_v22 = vadd.f32 %v2983_v2, %v6802_v31  ;;  %v5444_v18 = vld [vmem:[%s7186_s3 + $0x38] ss:$60 sps:$4 sm:$0xff]  }
 0x5ef   : > { %3462 = vadd.xlane.f32.xlu0 %v3461_v13  ;;  %v2985_v28 = vpop.f32.mrf.mxu1  ;;  %v3018_v37 = vmax.f32 %v2982_v63, 0.0  ;;  %v6951_v11 = vld [vmem:[%s7189_s6 + $0x16] ss:$0 sm:$0xff] }
 0x5f0   : > { %v2986_v34 = vadd.f32 %v2985_v28, %v6799_v26  ;;  %3334 = vmatprep.mubr.bf16.mxu0 %v3035_v0  ;;  %v3382_v25 = vunpack.c.h.bf16 %v3035_v0  ;;  %v3380_v57 = vunpack.c.l.bf16 %v3035_v0  ;;  %v3425_v29 = vmul.f32 %v6813_v59, %v3381_v15  ;;  %v5427_v26 = vld [vmem:[%s7186_s3 + $0x6c8] ss:$60 sps:$4 sm:$0xff]  }
 0x5f1   : > { %v2987_v16 = vpop.f32.mrf.mxu1  ;;  %3335 = vmatmul.mubr.bf16.gmra.mxu0 %v3034_v6  ;;  %v3423_v3 = vmul.f32 %v6813_v59, %v3379_v23  ;;  %v3019_v30 = vmax.f32 %v2984_v22, 0.0  ;;  %4910 = vmatprep.subr.bf16.mxu1 %v5427_v26 }
 0x5f2   : > { %v3020_v56 = vmax.f32 %v2986_v34, 0.0  ;;  %v2988_v27 = vadd.f32 %v2987_v16, %v6802_v31  ;;  %v3426_v41 = vmul.f32 %v6816_v5, %v3382_v25  ;;  %v3424_v58 = vmul.f32 %v6816_v5, %v3380_v57  ;;  %v5428_v31 = vld [vmem:[%s7186_s3 + $0x308] ss:$60 sps:$4 sm:$0xff]   ;;  %5005 = vmatmul.mubr.msk.bf16.gmra.mxu1 %vm3654_vm1, %v5438_v7 }
 0x5f3   : > { %4911 = vmatpush3.bf16.msra.mxu1 %v5428_v31 }
 0x5f4   : > { %v3036_v32 = vpack.c.bf16 %v3020_v56, %v3018_v37  ;;  %v3021_v35 = vmax.f32 %v2988_v27, 0.0  ;;  %v3470_v38 = vadd.f32 %v3426_v41, %v3425_v29  ;;  %v3467_v48 = vadd.f32 %v3424_v58, %v3423_v3  ;;  %4912 = vmatprep.subr.bf16.mxu1 %v5429_v39 }
 0x5f6   : > { %v3037_v45 = vpack.c.bf16 %v3021_v35, %v3019_v30  ;;  %3471 = vadd.xlane.f32.xlu1 %v3470_v38  ;;  %v3385_v54 = vunpack.c.h.bf16 %v3036_v32  ;;  %v3383_v4 = vunpack.c.l.bf16 %v3036_v32  ;;  %3468 = vadd.xlane.f32.xlu0 %v3467_v48 }
 0x5f7   : > { %4913 = vmatpush3.bf16.msra.mxu1 %v5430_v43 }
 0x5f8   : > { %3344 = vmatprep.mubr.bf16.mxu0 %v3037_v45  ;;  %v3386_v33 = vunpack.c.h.bf16 %v3037_v45  ;;  %v3384_v36 = vunpack.c.l.bf16 %v3037_v45  ;;  %v3429_v10 = vmul.f32 %v6813_v59, %v3385_v54  ;;  %v3427_v47 = vmul.f32 %v6813_v59, %v3383_v4  ;;  %4914 = vmatprep.subr.bf16.mxu1 %v5433_v40  ;;  %v5435_v59 = vld [vmem:[%s7186_s3 + $0x560] ss:$60 sps:$4 sm:$0xff]  }
 0x5f9   : > { %3345 = vmatmul.mubr.bf16.gmra.mxu0 %v3036_v32 }
 0x5fa   : > { %v3430_v46 = vmul.f32 %v6816_v5, %v3386_v33  ;;  %v3428_v50 = vmul.f32 %v6816_v5, %v3384_v36  ;;  %v5436_v5 = vld [vmem:[%s7186_s3 + $0x1a0] ss:$60 sps:$4 sm:$0xff]   ;;  %v3070_v33 = vld [vmem:[%s7189_s6 + $0xe] sm:$0x3] }
 0x5fb   : > { %4915 = vmatpush3.bf16.msra.mxu1 %v5434_v51 }
 0x5fc   : > { %v3476_v14 = vadd.f32 %v3430_v46, %v3429_v10  ;;  %v3473_v61 = vadd.f32 %v3428_v50, %v3427_v47  ;;  %4916 = vmatprep.subr.bf16.mxu1 %v5435_v59  ;;  %v6971_v46 = vrot.slane %v3070_v33, %v5922_v17  ;;  %v6974_v50 = vrot.slane %v3070_v33, %v5927_v19 }
 0x5fe   : > { %3477 = vadd.xlane.f32.xlu1 %v3476_v14  ;;  %3474 = vadd.xlane.f32.xlu0 %v3473_v61 }
 0x5ff   : > { %4917 = vmatpush3.bf16.msra.mxu1 %v5436_v5 }
 0x600   : > { %4918 = vmatprep.subr.bf16.mxu1 %v5439_v49 }
 0x603   : > { %4919 = vmatpush3.bf16.msra.mxu1 %v5440_v62 }
 0x604   : > { %4920 = vmatprep.subr.bf16.mxu1 %v5441_v8 }
 0x607   : > { %4921 = vmatpush3.bf16.msra.mxu1 %v5442_v9 }
 0x608   : > { %4922 = vmatprep.subr.bf16.mxu1 %v5443_v20 }
 0x60b   : > { %4923 = vmatpush3.bf16.msra.mxu1 %v5444_v18 }
 0x64f   : > { %v3433_v6 = vpop.xlane.xlu0 %3432 }
 0x650   : > { %v3486_v24 = vadd.f32 %v6951_v11, %v3433_v6 }
 0x652   : > { %v3502_v52 = vmax.f32 %v3486_v24, 0.0 }
 0x653   : > { %v3436_v63 = vpop.xlane.xlu0 %3435 }
 0x654   : > { %v3487_v2 = vadd.f32 %v6951_v11, %v3436_v63  ;;  %4365 = vperm.xlu0 %5049, %v3502_v52  }
 0x656   : > { %v3503_v13 = vmax.f32 %v3487_v2, 0.0 }
 0x657   : > { %v3439_v42 = vpop.xlane.xlu1 %3438 }
 0x658   : > { %v3488_v0 = vadd.f32 %v6951_v11, %v3439_v42  ;;  %4370 = vperm.xlu1 %5050, %v3503_v13  }
 0x65a   : > { %v3504_v15 = vmax.f32 %v3488_v0, 0.0 }
 0x65b   : > { %v3442_v28 = vpop.xlane.xlu1 %3441 }
 0x65c   : > { %v3489_v23 = vadd.f32 %v6951_v11, %v3442_v28  ;;  %4375 = vperm.xlu1 %5050, %v3504_v15  }
 0x65e   : > { %v3505_v55 = vmax.f32 %v3489_v23, 0.0 }
 0x65f   : > { %v3448_v21 = vpop.xlane.xlu1 %3447 }
 0x660   : > { %v3445_v22 = vpop.xlane.xlu0 %3444  ;;  %4380 = vperm.xlu1 %5050, %v3505_v55   ;;  %v3491_v25 = vadd.f32 %v6951_v11, %v3448_v21 }
 0x661   : > { %v3490_v34 = vadd.f32 %v6951_v11, %v3445_v22 }
 0x662   : > { %v3507_v37 = vmax.f32 %v3491_v25, 0.0 }
 0x663   : > { %v3506_v1 = vmax.f32 %v3490_v34, 0.0 }
 0x665   : > { %4385 = vperm.xlu1 %5050, %v3506_v1  }
 0x667   : > { %v3454_v16 = vpop.xlane.xlu1 %3453 }
 0x668   : > { %v3451_v57 = vpop.xlane.xlu0 %3450  ;;  %v3493_v27 = vadd.f32 %v6951_v11, %v3454_v16 }
 0x669   : > { %v3492_v56 = vadd.f32 %v6951_v11, %v3451_v57  ;;  %4390 = vperm.xlu1 %5050, %v3507_v37  }
 0x66a   : > { %v3509_v41 = vmax.f32 %v3493_v27, 0.0 }
 0x66b   : > { %v3508_v29 = vmax.f32 %v3492_v56, 0.0 }
 0x66d   : > { %4395 = vperm.xlu1 %5050, %v3508_v29  }
 0x66f   : > { %v3460_v26 = vpop.xlane.xlu1 %3459 }
 0x670   : > { %v3495_v3 = vadd.f32 %v6951_v11, %v3460_v26  ;;  %v3457_v58 = vpop.xlane.xlu0 %3456 }
 0x671   : > { %v3494_v31 = vadd.f32 %v6951_v11, %v3457_v58  ;;  %4400 = vperm.xlu1 %5050, %v3509_v41  }
 0x672   : > { %v3511_v30 = vmax.f32 %v3495_v3, 0.0 }
 0x673   : > { %v3510_v32 = vmax.f32 %v3494_v31, 0.0 }
 0x674   : > { %4410 = vperm.xlu0 %5049, %v3511_v30  }
 0x675   : > { %4405 = vperm.xlu1 %5050, %v3510_v32  }
 0x677   : > { %v3466_v35 = vpop.xlane.xlu1 %3465 }
 0x678   : > { %v3497_v38 = vadd.f32 %v6951_v11, %v3466_v35  ;;  %v3463_v48 = vpop.xlane.xlu0 %3462 }
 0x679   : > { %v3496_v39 = vadd.f32 %v6951_v11, %v3463_v48 }
 0x67a   : > { %v3513_v45 = vmax.f32 %v3497_v38, 0.0 }
 0x67b   : > { %v3512_v54 = vmax.f32 %v3496_v39, 0.0 }
 0x67c   : > { %4420 = vperm.xlu0 %5049, %v3513_v45  }
 0x67d   : > { %4415 = vperm.xlu1 %5050, %v3512_v54  }
 0x67f   : > { %v3472_v4 = vpop.xlane.xlu1 %3471  ;;  %v3469_v53 = vpop.xlane.xlu0 %3468 }
 0x680   : > { %v3499_v43 = vadd.f32 %v6951_v11, %v3472_v4  ;;  %v3498_v36 = vadd.f32 %v6951_v11, %v3469_v53 }
 0x681   : > { %v3276_v44 = vpop.f32.mrf.mxu0 }
 0x682   : > { %v3515_v10 = vmax.f32 %v3499_v43, 0.0  ;;  %v3514_v47 = vmax.f32 %v3498_v36, 0.0  ;;  %v3277_v59 = vadd.f32 %v3276_v44, %v6974_v50 }
 0x683   : > { %v3278_v40 = vpop.f32.mrf.mxu0 }
 0x684   : > { %4430 = vperm.xlu0 %5049, %v3515_v10   ;;  %4425 = vperm.xlu1 %5050, %v3514_v47   ;;  %v3279_v14 = vadd.f32 %v3278_v40, %v6971_v46  ;;  %v3518_v6 = vmax.f32 %v3277_v59, 0.0 }
 0x685   : > { %v3280_v51 = vpop.f32.mrf.mxu0 }
 0x686   : > { %v3281_v61 = vadd.f32 %v3280_v51, %v6974_v50  ;;  %v3519_v9 = vmax.f32 %v3279_v14, 0.0 }
 0x687   : > { %v3282_v5 = vpop.f32.mrf.mxu0  ;;  %v3478_v60 = vpop.xlane.xlu1 %3477 }
 0x688   : > { %v3283_v7 = vadd.f32 %v3282_v5, %v6971_v46  ;;  %v3501_v17 = vadd.f32 %v6951_v11, %v3478_v60  ;;  %v3475_v49 = vpop.xlane.xlu0 %3474  ;;  %v3520_v62 = vmax.f32 %v3281_v61, 0.0 }
 0x689   : > { %v3500_v19 = vadd.f32 %v6951_v11, %v3475_v49  ;;  %v3286_v8 = vpop.f32.mrf.mxu0 }
 0x68a   : > { %v3521_v20 = vmax.f32 %v3283_v7, 0.0  ;;  %v3517_v18 = vmax.f32 %v3501_v17, 0.0  ;;  %v3550_v2 = vpack.c.bf16 %v3520_v62, %v3518_v6  ;;  %v3287_v15 = vadd.f32 %v3286_v8, %v6974_v50 }
 0x68b   : > { %v3516_v24 = vmax.f32 %v3500_v19, 0.0  ;;  %v3288_v52 = vpop.f32.mrf.mxu0 }
 0x68c   : > { %v3551_v63 = vpack.c.bf16 %v3521_v20, %v3519_v9  ;;  %4440 = vperm.xlu0 %5049, %v3517_v18   ;;  %v3289_v42 = vadd.f32 %v3288_v52, %v6971_v46  ;;  %v3522_v34 = vmax.f32 %v3287_v15, 0.0 }
 0x68d   : > { %4435 = vperm.xlu1 %5050, %v3516_v24   ;;  %v3290_v13 = vpop.f32.mrf.mxu0 }
 0x68e   : > { %v3291_v0 = vadd.f32 %v3290_v13, %v6974_v50  ;;  %3904 = vmatprep.mubr.bf16.mxu1 %v3551_v63  ;;  %v3523_v21 = vmax.f32 %v3289_v42, 0.0 }
 0x68f   : > { %v3292_v11 = vpop.f32.mrf.mxu0  ;;  %3905 = vmatmul.mubr.bf16.vlgmr.msra.gmra.mxu1 %v3550_v2 }
 0x690   : > { %v3293_v28 = vadd.f32 %v3292_v11, %v6971_v46  ;;  %v3524_v23 = vmax.f32 %v3291_v0, 0.0 }
 0x691   : > { %v3296_v55 = vpop.f32.mrf.mxu0 }
 0x692   : > { %v3525_v22 = vmax.f32 %v3293_v28, 0.0  ;;  %v3552_v37 = vpack.c.bf16 %v3524_v23, %v3522_v34  ;;  %v3297_v27 = vadd.f32 %v3296_v55, %v6974_v50 }
 0x693   : > { %v3298_v25 = vpop.f32.mrf.mxu0 }
 0x694   : > { %v3553_v1 = vpack.c.bf16 %v3525_v22, %v3523_v21  ;;  %v3299_v57 = vadd.f32 %v3298_v25, %v6971_v46  ;;  %v3526_v30 = vmax.f32 %v3297_v27, 0.0 }
 0x695   : > { %v3300_v16 = vpop.f32.mrf.mxu0 }
 0x696   : > { %v3301_v56 = vadd.f32 %v3300_v16, %v6974_v50  ;;  %3912 = vmatprep.mubr.bf16.mxu1 %v3553_v1  ;;  %v3527_v58 = vmax.f32 %v3299_v57, 0.0 }
 0x697   : > { %v3302_v29 = vpop.f32.mrf.mxu0  ;;  %3913 = vmatmul.mubr.bf16.gmra.mxu1 %v3552_v37 }
 0x698   : > { %v3303_v41 = vadd.f32 %v3302_v29, %v6971_v46  ;;  %v3528_v26 = vmax.f32 %v3301_v56, 0.0 }
 0x699   : > { %v3306_v3 = vpop.f32.mrf.mxu0 }
 0x69a   : > { %v3529_v31 = vmax.f32 %v3303_v41, 0.0  ;;  %v3554_v38 = vpack.c.bf16 %v3528_v26, %v3526_v30  ;;  %v3307_v54 = vadd.f32 %v3306_v3, %v6974_v50 }
 0x69b   : > { %v3308_v32 = vpop.f32.mrf.mxu0 }
 0x69c   : > { %v3555_v35 = vpack.c.bf16 %v3529_v31, %v3527_v58  ;;  %v3309_v39 = vadd.f32 %v3308_v32, %v6971_v46  ;;  %v3530_v10 = vmax.f32 %v3307_v54, 0.0 }
 0x69d   : > { %v3310_v48 = vpop.f32.mrf.mxu0 }
 0x69e   : > { %v3311_v45 = vadd.f32 %v3310_v48, %v6974_v50  ;;  %3920 = vmatprep.mubr.bf16.mxu1 %v3555_v35  ;;  %v3531_v36 = vmax.f32 %v3309_v39, 0.0 }
 0x69f   : > { %v3312_v4 = vpop.f32.mrf.mxu0  ;;  %3921 = vmatmul.mubr.bf16.gmra.mxu1 %v3554_v38 }
 0x6a0   : > { %v3313_v43 = vadd.f32 %v3312_v4, %v6971_v46  ;;  %v3532_v53 = vmax.f32 %v3311_v45, 0.0 }
 0x6a1   : > { %v3316_v33 = vpop.f32.mrf.mxu0 }
 0x6a2   : > { %v3533_v44 = vmax.f32 %v3313_v43, 0.0  ;;  %v3556_v51 = vpack.c.bf16 %v3532_v53, %v3530_v10  ;;  %v3317_v5 = vadd.f32 %v3316_v33, %v6974_v50  ;;  %v5445_v33 = vld [vmem:[%s7188_s5 + $0x38] sm:$0xff]   ;;  %v5450_v10 = vld [vmem:[%s7188_s5 + $0x10] sm:$0xff]  }
 0x6a3   : > { %v3318_v47 = vpop.f32.mrf.mxu0  ;;  %5008 = vmatprep.subr.bf16.mxu0 %v5445_v33 }
 0x6a4   : > { %v3557_v40 = vpack.c.bf16 %v3533_v44, %v3531_v36  ;;  %v3319_v61 = vadd.f32 %v3318_v47, %v6971_v46  ;;  %v3534_v8 = vmax.f32 %v3317_v5, 0.0  ;;  %5009 = vmatpush3.bf16.msra.mxu0 %v5445_v33  ;;  %v5448_v36 = vld [vmem:[%s7188_s5 + $0x20] sm:$0xff]   ;;  %v5449_v44 = vld [vmem:[%s7188_s5 + $0x18] sm:$0xff]   ;;  %v5451_v47 = vld [vmem:[%s7188_s5 + $0x8] sm:$0xff]  }
 0x6a5   : > { %v3320_v14 = vpop.f32.mrf.mxu0 }
 0x6a6   : > { %v3321_v59 = vadd.f32 %v3320_v14, %v6974_v50  ;;  %3928 = vmatprep.mubr.bf16.mxu1 %v3557_v40  ;;  %v3535_v62 = vmax.f32 %v3319_v61, 0.0  ;;  %v5452_v40 = vld [vmem:[%s7188_s5] sm:$0xff]  }
 0x6a7   : > { %v3322_v60 = vpop.f32.mrf.mxu0  ;;  %3929 = vmatmul.mubr.bf16.gmra.mxu1 %v3556_v51  ;;  %v4994_v51 = vpop.f32.mrf.mxu1 }
 0x6a8   : > { %v3323_v7 = vadd.f32 %v3322_v60, %v6971_v46  ;;  %v3536_v17 = vmax.f32 %v3321_v59, 0.0 }
 0x6a9   : > { %v3326_v49 = vpop.f32.mrf.mxu0  ;;  %v3713_v14 = vpop.f32.mrf.mxu1 }
 0x6aa   : > { %v3537_v19 = vmax.f32 %v3323_v7, 0.0  ;;  %v3558_v18 = vpack.c.bf16 %v3536_v17, %v3534_v8  ;;  %v3327_v63 = vadd.f32 %v3326_v49, %v6974_v50 }
 0x6ab   : > { %v3328_v9 = vpop.f32.mrf.mxu0  ;;  %v4995_v61 = vpop.f32.mrf.mxu1 }
 0x6ac   : > { %v3559_v20 = vpack.c.bf16 %v3537_v19, %v3535_v62  ;;  %v3329_v24 = vadd.f32 %v3328_v9, %v6971_v46  ;;  %v3538_v28 = vmax.f32 %v3327_v63, 0.0 }
 0x6ad   : > { %v3330_v6 = vpop.f32.mrf.mxu0  ;;  %v3716_v59 = vpop.f32.mrf.mxu1 }
 0x6ae   : > { %v3331_v52 = vadd.f32 %v3330_v6, %v6974_v50  ;;  %3936 = vmatprep.mubr.bf16.mxu1 %v3559_v20  ;;  %v3539_v15 = vmax.f32 %v3329_v24, 0.0 }
 0x6af   : > { %v3332_v2 = vpop.f32.mrf.mxu0  ;;  %3937 = vmatmul.mubr.bf16.gmra.mxu1 %v3558_v18  ;;  %v4998_v5 = vpop.f32.mrf.mxu1 }
 0x6b0   : > { %v3333_v13 = vadd.f32 %v3332_v2, %v6971_v46  ;;  %v3540_v42 = vmax.f32 %v3331_v52, 0.0  ;;  %v7055_v2 = vld [vmem:[%s7189_s6 + $0x10] ss:$0 sm:$0xff] }
 0x6b1   : > { %v3336_v0 = vpop.f32.mrf.mxu0  ;;  %v3729_v60 = vpop.f32.mrf.mxu1 }
 0x6b2   : > { %v3541_v11 = vmax.f32 %v3333_v13, 0.0  ;;  %v3560_v21 = vpack.c.bf16 %v3540_v42, %v3538_v28  ;;  %v3337_v1 = vadd.f32 %v3336_v0, %v6974_v50 }
 0x6b3   : > { %v3338_v23 = vpop.f32.mrf.mxu0  ;;  %v7034_v7 = vpop.f32.mrf.mxu1 }
 0x6b4   : > { %v3561_v55 = vpack.c.bf16 %v3541_v11, %v3539_v15  ;;  %v3339_v34 = vadd.f32 %v3338_v23, %v6971_v46  ;;  %v3542_v41 = vmax.f32 %v3337_v1, 0.0 }
 0x6b5   : > { %v3340_v22 = vpop.f32.mrf.mxu0  ;;  %v3732_v17 = vpop.f32.mrf.mxu1 }
 0x6b6   : > { %v3341_v25 = vadd.f32 %v3340_v22, %v6974_v50  ;;  %3944 = vmatprep.mubr.bf16.mxu1 %v3561_v55  ;;  %v3543_v27 = vmax.f32 %v3339_v34, 0.0 }
 0x6b7   : > { %v3342_v37 = vpop.f32.mrf.mxu0  ;;  %3945 = vmatmul.mubr.bf16.gmra.mxu1 %v3560_v21  ;;  %v7036_v49 = vpop.f32.mrf.mxu1 }
 0x6b8   : > { %v3343_v16 = vadd.f32 %v3342_v37, %v6971_v46  ;;  %v3544_v57 = vmax.f32 %v3341_v25, 0.0 }
 0x6b9   : > { %v3346_v56 = vpop.f32.mrf.mxu0  ;;  %v7038_v62 = vpop.f32.mrf.mxu1 }
 0x6ba   : > { %v3545_v29 = vmax.f32 %v3343_v16, 0.0  ;;  %v3562_v58 = vpack.c.bf16 %v3544_v57, %v3542_v41  ;;  %v3347_v35 = vadd.f32 %v3346_v56, %v6974_v50 }
 0x6bb   : > { %v3348_v26 = vpop.f32.mrf.mxu0  ;;  %v7040_v19 = vpop.f32.mrf.mxu1 }
 0x6bc   : > { %v3563_v3 = vpack.c.bf16 %v3545_v29, %v3543_v27  ;;  %v3349_v30 = vadd.f32 %v3348_v26, %v6971_v46  ;;  %v3546_v4 = vmax.f32 %v3347_v35, 0.0 }
 0x6bd   : > { %v3350_v31 = vpop.f32.mrf.mxu0  ;;  %v7042_v8 = vpop.f32.mrf.mxu1 }
 0x6be   : > { %v3351_v32 = vadd.f32 %v3350_v31, %v6974_v50  ;;  %3952 = vmatprep.mubr.bf16.mxu1 %v3563_v3  ;;  %v3547_v45 = vmax.f32 %v3349_v30, 0.0  ;;  %v5446_v50 = vld [vmem:[%s7188_s5 + $0x30] sm:$0xff]  }
 0x6bf   : > { %v3352_v38 = vpop.f32.mrf.mxu0  ;;  %3953 = vmatmul.mubr.bf16.gmra.mxu1 %v3562_v58  ;;  %5010 = vmatprep.subr.bf16.mxu0 %v5446_v50  ;;  %v7044_v9 = vpop.f32.mrf.mxu1 }
 0x6c0   : > { %v3353_v48 = vadd.f32 %v3352_v38, %v6971_v46  ;;  %v3548_v39 = vmax.f32 %v3351_v32, 0.0  ;;  %5011 = vmatpush3.bf16.msra.mxu0 %v5446_v50  ;;  %v5447_v46 = vld [vmem:[%s7188_s5 + $0x28] sm:$0xff]  }
 0x6c1   : > { %5012 = vmatprep.subr.bf16.mxu0 %v5447_v46  ;;  %v7046_v20 = vpop.f32.mrf.mxu1 }
 0x6c2   : > { %v3549_v54 = vmax.f32 %v3353_v48, 0.0  ;;  %v3564_v53 = vpack.c.bf16 %v3548_v39, %v3546_v4 }
 0x6c3   : > { %v7048_v18 = vpop.f32.mrf.mxu1 }
 0x6c4   : > { %v3565_v43 = vpack.c.bf16 %v3549_v54, %v3547_v45  ;;  %5013 = vmatpush3.bf16.msra.mxu0 %v5447_v46 }
 0x6c5   : > { %5014 = vmatprep.subr.bf16.mxu0 %v5448_v36  ;;  %v7050_v6 = vpop.f32.mrf.mxu1 }
 0x6c6   : > { %3960 = vmatprep.mubr.bf16.mxu1 %v3565_v43 }
 0x6c7   : > { %3961 = vmatmul.mubr.bf16.gmra.mxu1 %v3564_v53 }
 0x6c8   : > { %5015 = vmatpush3.bf16.msra.mxu0 %v5448_v36 }
 0x6c9   : > { %5016 = vmatprep.subr.bf16.mxu0 %v5449_v44 }
 0x6cc   : > { %5017 = vmatpush3.bf16.msra.mxu0 %v5449_v44 }
 0x6cd   : > { %5018 = vmatprep.subr.bf16.mxu0 %v5450_v10 }
 0x6d0   : > { %5019 = vmatpush3.bf16.msra.mxu0 %v5450_v10 }
 0x6d1   : > { %5020 = vmatprep.subr.bf16.mxu0 %v5451_v47 }
 0x6d4   : > { %5021 = vmatpush3.bf16.msra.mxu0 %v5451_v47 }
 0x6d5   : > { %5022 = vmatprep.subr.bf16.mxu0 %v5452_v40 }
 0x6d8   : > { %5023 = vmatpush3.bf16.msra.mxu0 %v5452_v40 }
 0x74f   : > { %v4924_v24 = vpop.f32.mrf.mxu1 }
 0x751   : > { %v4925_v52 = vpop.f32.mrf.mxu1 }
 0x752   : > { %v4926_v63 = vadd.f32 %v4925_v52, %v4924_v24 }
 0x753   : > { %v4927_v13 = vpop.f32.mrf.mxu1 }
 0x754   : > { %v3907_v42 = vadd.f32 %v4926_v63, %v3713_v14 }
 0x755   : > { %v4928_v0 = vpop.f32.mrf.mxu1 }
 0x756   : > { %v3976_v15 = vadd.f32 %v7055_v2, %v3907_v42  ;;  %v4929_v11 = vadd.f32 %v4928_v0, %v4927_v13 }
 0x757   : > { %v4930_v28 = vpop.f32.mrf.mxu1 }
 0x758   : > { %v4855_v23 = vmul.f32 -1.442695, %v3976_v15  ;;  %v3910_v55 = vadd.f32 %v4929_v11, %v3716_v59 }
 0x759   : > { %v4931_v21 = vpop.f32.mrf.mxu1 }
 0x75a   : > { %5453 = vpow2.f32 %v4855_v23  ;;  %v3977_v22 = vadd.f32 %v7055_v2, %v3910_v55  ;;  %v4932_v34 = vadd.f32 %v4931_v21, %v4930_v28 }
 0x75b   : > { %v4933_v25 = vpop.f32.mrf.mxu1 }
 0x75c   : > { %v4856_v1 = vmul.f32 -1.442695, %v3977_v22  ;;  %v3915_v37 = vadd.f32 %v4994_v51, %v4932_v34 }
 0x75d   : > { %v4934_v16 = vpop.f32.mrf.mxu1 }
 0x75e   : > { %5455 = vpow2.f32 %v4856_v1  ;;  %v3978_v57 = vadd.f32 %v7055_v2, %v3915_v37  ;;  %v4935_v56 = vadd.f32 %v4934_v16, %v4933_v25 }
 0x75f   : > { %v4936_v27 = vpop.f32.mrf.mxu1 }
 0x760   : > { %v4857_v29 = vmul.f32 -1.442695, %v3978_v57  ;;  %v3918_v41 = vadd.f32 %v4995_v61, %v4935_v56 }
 0x761   : > { %v4937_v26 = vpop.f32.mrf.mxu1 }
 0x762   : > { %5457 = vpow2.f32 %v4857_v29  ;;  %v3979_v3 = vadd.f32 %v7055_v2, %v3918_v41  ;;  %v4938_v58 = vadd.f32 %v4937_v26, %v4936_v27 }
 0x763   : > { %v4939_v31 = vpop.f32.mrf.mxu1 }
 0x764   : > { %v4858_v30 = vmul.f32 -1.442695, %v3979_v3  ;;  %v3923_v32 = vadd.f32 %v4938_v58, %v3729_v60 }
 0x765   : > { %v4940_v35 = vpop.f32.mrf.mxu1 }
 0x766   : > { %5459 = vpow2.f32 %v4858_v30  ;;  %v3980_v38 = vadd.f32 %v7055_v2, %v3923_v32  ;;  %v4941_v48 = vadd.f32 %v4940_v35, %v4939_v31 }
 0x767   : > { %v5454_v39 = vpop.eup %5453  ;;  %v4942_v45 = vpop.f32.mrf.mxu1 }
 0x768   : > { %v4859_v54 = vmul.f32 -1.442695, %v3980_v38  ;;  %v3926_v4 = vadd.f32 %v4941_v48, %v3732_v17  ;;  %v4040_v43 = vadd.f32 1.0, %v5454_v39 }
 0x769   : > { %v4943_v53 = vpop.f32.mrf.mxu1 }
 0x76a   : > { %v3981_v33 = vadd.f32 %v7055_v2, %v3926_v4  ;;  %v4944_v50 = vadd.f32 %v4943_v53, %v4942_v45  ;;  %5461 = vpow2.f32 %v4859_v54 }
 0x76b   : > { %v5456_v46 = vpop.eup %5455  ;;  %v4945_v36 = vpop.f32.mrf.mxu1  ;;  %5463 = vrcp.f32 %v4040_v43 }
 0x76c   : > { %v4041_v44 = vadd.f32 1.0, %v5456_v46  ;;  %v4860_v10 = vmul.f32 -1.442695, %v3981_v33  ;;  %v3931_v47 = vadd.f32 %v4998_v5, %v4944_v50 }
 0x76d   : > { %v4946_v40 = vpop.f32.mrf.mxu1 }
 0x76e   : > { %5465 = vrcp.f32 %v4041_v44  ;;  %v3982_v51 = vadd.f32 %v7055_v2, %v3931_v47  ;;  %v4947_v14 = vadd.f32 %v4946_v40, %v4945_v36 }
 0x76f   : > { %v5458_v61 = vpop.eup %5457  ;;  %5467 = vpow2.f32 %v4860_v10  ;;  %v4948_v59 = vpop.f32.mrf.mxu1 }
 0x770   : > { %v4861_v60 = vmul.f32 -1.442695, %v3982_v51  ;;  %v3934_v17 = vadd.f32 %v7034_v7, %v4947_v14  ;;  %v4042_v24 = vadd.f32 1.0, %v5458_v61 }
 0x771   : > { %v4949_v52 = vpop.f32.mrf.mxu1 }
 0x772   : > { %v3983_v63 = vadd.f32 %v7055_v2, %v3934_v17  ;;  %v4950_v13 = vadd.f32 %v4949_v52, %v4948_v59  ;;  %5469 = vpow2.f32 %v4861_v60 }
 0x773   : > { %v5460_v42 = vpop.eup %5459  ;;  %v4951_v5 = vpop.f32.mrf.mxu1  ;;  %5471 = vrcp.f32 %v4042_v24 }
 0x774   : > { %v4043_v0 = vadd.f32 1.0, %v5460_v42  ;;  %v4862_v15 = vmul.f32 -1.442695, %v3983_v63  ;;  %v3939_v11 = vadd.f32 %v4950_v13, %v7038_v62 }
 0x775   : > { %v4952_v28 = vpop.f32.mrf.mxu1 }
 0x776   : > { %5473 = vrcp.f32 %v4043_v0  ;;  %v3984_v23 = vadd.f32 %v7055_v2, %v3939_v11  ;;  %v4953_v55 = vadd.f32 %v4952_v28, %v4951_v5 }
 0x777   : > { %5475 = vpow2.f32 %v4862_v15  ;;  %v4954_v7 = vpop.f32.mrf.mxu1  ;;  %v5462_v21 = vpop.eup %5461 }
 0x778   : > { %v4863_v22 = vmul.f32 -1.442695, %v3984_v23  ;;  %v3942_v34 = vadd.f32 %v4953_v55, %v7042_v8  ;;  %v4044_v25 = vadd.f32 1.0, %v5462_v21  ;;  %v5464_v37 = vpop.eup %5463 }
 0x779   : > { %v4955_v1 = vpop.f32.mrf.mxu1 }
 0x77a   : > { %5477 = vpow2.f32 %v4863_v22  ;;  %v3985_v16 = vadd.f32 %v7055_v2, %v3942_v34  ;;  %v4956_v57 = vadd.f32 %v4955_v1, %v4954_v7 }
 0x77b   : > { %v5466_v62 = vpop.eup %5465  ;;  %v4957_v56 = vpop.f32.mrf.mxu1  ;;  %5479 = vrcp.f32 %v4044_v25 }
 0x77c   : > { %v5468_v27 = vpop.eup %5467  ;;  %v4864_v29 = vmul.f32 -1.442695, %v3985_v16  ;;  %v3947_v41 = vadd.f32 %v7036_v49, %v4956_v57  ;;  %v4088_v26 = vpack.c.bf16 %v5466_v62, %v5464_v37 }
 0x77d   : > { %v4045_v3 = vadd.f32 1.0, %v5468_v27  ;;  %v4958_v58 = vpop.f32.mrf.mxu1 }
 0x77e   : > { %5481 = vpow2.f32 %v4864_v29  ;;  %v3986_v8 = vadd.f32 %v7055_v2, %v3947_v41  ;;  %v4959_v31 = vadd.f32 %v4958_v58, %v4957_v56  ;;  %5024 = vmatprep.mubr.bf16.mxu0 %v4088_v26 }
 0x77f   : > { %5483 = vrcp.f32 %v4045_v3  ;;  %v4960_v30 = vpop.f32.mrf.mxu1  ;;  %v5470_v32 = vpop.eup %5469 }
 0x780   : > { %v4865_v35 = vmul.f32 -1.442695, %v3986_v8  ;;  %v3950_v38 = vadd.f32 %v7040_v19, %v4959_v31  ;;  %v4046_v48 = vadd.f32 1.0, %v5470_v32  ;;  %v5472_v45 = vpop.eup %5471 }
 0x781   : > { %v4961_v39 = vpop.f32.mrf.mxu1 }
 0x782   : > { %5485 = vpow2.f32 %v4865_v35  ;;  %v3987_v49 = vadd.f32 %v7055_v2, %v3950_v38  ;;  %v4962_v54 = vadd.f32 %v4961_v39, %v4960_v30 }
 0x783   : > { %v5474_v4 = vpop.eup %5473  ;;  %v4963_v43 = vpop.f32.mrf.mxu1  ;;  %5487 = vrcp.f32 %v4046_v48 }
 0x784   : > { %v5476_v53 = vpop.eup %5475  ;;  %v4866_v33 = vmul.f32 -1.442695, %v3987_v49  ;;  %v3955_v50 = vadd.f32 %v4962_v54, %v7046_v20  ;;  %v4089_v46 = vpack.c.bf16 %v5474_v4, %v5472_v45  ;;  %v7085_v45 = vld [vmem:[%s7189_s6 + $0x14] ss:$0 sm:$0xff] }
 0x785   : > { %v4047_v36 = vadd.f32 1.0, %v5476_v53  ;;  %v4964_v44 = vpop.f32.mrf.mxu1 }
 0x786   : > { %5489 = vpow2.f32 %v4866_v33  ;;  %v3988_v19 = vadd.f32 %v7055_v2, %v3955_v50  ;;  %v4965_v10 = vadd.f32 %v4964_v44, %v4963_v43  ;;  %5025 = vmatmul.mubr.bf16.vlgmr.msra.gmra.mxu0 %v4089_v46 }
 0x787   : > { %v5478_v47 = vpop.eup %5477  ;;  %5491 = vrcp.f32 %v4047_v36  ;;  %v4966_v40 = vpop.f32.mrf.mxu1 }
 0x788   : > { %v4867_v51 = vmul.f32 -1.442695, %v3988_v19  ;;  %v3958_v14 = vadd.f32 %v4965_v10, %v7050_v6  ;;  %v4048_v61 = vadd.f32 1.0, %v5478_v47  ;;  %v5480_v60 = vpop.eup %5479 }
 0x789   : > { %v4967_v59 = vpop.f32.mrf.mxu1 }
 0x78a   : > { %v3989_v20 = vadd.f32 %v7055_v2, %v3958_v14  ;;  %v4968_v17 = vadd.f32 %v4967_v59, %v4966_v40  ;;  %5493 = vpow2.f32 %v4867_v51  ;;  %v7092_v14 = vpop.permute.xlu1 %4370 }
 0x78b   : > { %v5482_v24 = vpop.eup %5481  ;;  %v4969_v52 = vpop.f32.mrf.mxu1  ;;  %5495 = vrcp.f32 %v4048_v61 }
 0x78c   : > { %v5484_v63 = vpop.eup %5483  ;;  %v4049_v13 = vadd.f32 1.0, %v5482_v24  ;;  %v4868_v42 = vmul.f32 -1.442695, %v3989_v20  ;;  %v3963_v5 = vadd.f32 %v7044_v9, %v4968_v17 }
 0x78d   : > { %v4970_v0 = vpop.f32.mrf.mxu1  ;;  %v4090_v15 = vpack.c.bf16 %v5484_v63, %v5480_v60 }
 0x78e   : > { %5497 = vrcp.f32 %v4049_v13  ;;  %v3990_v6 = vadd.f32 %v7055_v2, %v3963_v5  ;;  %v4971_v11 = vadd.f32 %v4970_v0, %v4969_v52 }
 0x78f   : > { %v5486_v28 = vpop.eup %5485  ;;  %5499 = vpow2.f32 %v4868_v42  ;;  %5028 = vmatprep.mubr.bf16.mxu0 %v4090_v15 }
 0x790   : > { %v4869_v23 = vmul.f32 -1.442695, %v3990_v6  ;;  %v3966_v55 = vadd.f32 %v7048_v18, %v4971_v11  ;;  %v4050_v7 = vadd.f32 1.0, %v5486_v28  ;;  %v5488_v21 = vpop.eup %5487  ;;  %v4376_v28 = vpop.permute.xlu1 %4375 }
 0x792   : > { %v3991_v22 = vadd.f32 %v7055_v2, %v3966_v55  ;;  %5501 = vpow2.f32 %v4869_v23 }
 0x793   : > { %v5490_v34 = vpop.eup %5489  ;;  %5503 = vrcp.f32 %v4050_v7  ;;  %v7098_v7 = vand.u32 127, %v726_v12 }
 0x794   : > { %v5492_v9 = vpop.eup %5491  ;;  %v4051_v25 = vadd.f32 1.0, %v5490_v34  ;;  %v4870_v1 = vmul.f32 -1.442695, %v3991_v22 }
 0x795   : > { %v4091_v37 = vpack.c.bf16 %v5492_v9, %v5488_v21  ;;  %v4381_v21 = vpop.permute.xlu1 %4380  ;;  %vm4362_vm2 = vcmp.eq.s32.totalorder %v7098_v7, 3 }
 0x796   : > { %5505 = vrcp.f32 %v4051_v25 }
 0x797   : > { %5507 = vpow2.f32 %v4870_v1  ;;  %5029 = vmatmul.mubr.bf16.gmra.mxu0 %v4091_v37  ;;  %v5494_v16 = vpop.eup %5493 }
 0x798   : > { %v5496_v57 = vpop.eup %5495  ;;  %v4052_v62 = vadd.f32 1.0, %v5494_v16 }
 0x79a   : > { %5509 = vrcp.f32 %v4052_v62  ;;  %v4366_v62 = vpop.permute.xlu0 %4365 }
 0x79b   : > { %v5498_v56 = vpop.eup %5497 }
 0x79c   : > { %v5500_v27 = vpop.eup %5499  ;;  %v4092_v18 = vpack.c.bf16 %v5498_v56, %v5496_v57 }
 0x79d   : > { %v4053_v29 = vadd.f32 1.0, %v5500_v27 }
 0x79e   : > { %5032 = vmatprep.mubr.bf16.mxu0 %v4092_v18 }
 0x79f   : > { %5511 = vrcp.f32 %v4053_v29  ;;  %v5502_v2 = vpop.eup %5501  ;;  %v4386_v29 = vpop.permute.xlu1 %4385 }
 0x7a0   : > { %v5504_v41 = vpop.eup %5503  ;;  %v4054_v26 = vadd.f32 1.0, %v5502_v2 }
 0x7a2   : > { %5513 = vrcp.f32 %v4054_v26 }
 0x7a3   : > { %v5506_v3 = vpop.eup %5505 }
 0x7a4   : > { %v5508_v58 = vpop.eup %5507  ;;  %v4093_v8 = vpack.c.bf16 %v5506_v3, %v5504_v41 }
 0x7a5   : > { %v4055_v31 = vadd.f32 1.0, %v5508_v58 }
 0x7a6   : > { %5033 = vmatmul.mubr.bf16.gmra.mxu0 %v4093_v8 }
 0x7a7   : > { %5515 = vrcp.f32 %v4055_v31  ;;  %v5510_v30 = vpop.eup %5509 }
 0x7ac   : > { %v5512_v32 = vpop.eup %5511 }
 0x7ad   : > { %v4094_v35 = vpack.c.bf16 %v5512_v32, %v5510_v30 }
 0x7af   : > { %5036 = vmatprep.mubr.bf16.mxu0 %v4094_v35  ;;  %v5514_v38 = vpop.eup %5513 }
 0x7b4   : > { %v5516_v48 = vpop.eup %5515 }
 0x7b5   : > { %v4095_v39 = vpack.c.bf16 %v5516_v48, %v5514_v38 }
 0x7b7   : > { %5037 = vmatmul.mubr.bf16.gmra.mxu0 %v4095_v39 }
 0x846   : > { %v5026_v49 = vpop.f32.mrf.mxu0 }
 0x847   : > { %v4210_v54 = vadd.f32 %v5026_v49, %v7085_v45 }
 0x848   : > { %v4201_v4 = vpop.f32.mrf.mxu0 }
 0x849   : > { %v4882_v43 = vmul.f32 -1.442695, %v4210_v54  ;;  %v4202_v53 = vadd.f32 %v7085_v45, %v4201_v4 }
 0x84a   : > { %v5027_v33 = vpop.f32.mrf.mxu0 }
 0x84b   : > { %5517 = vpow2.f32 %v4882_v43  ;;  %v4880_v50 = vmul.f32 -1.442695, %v4202_v53  ;;  %v4213_v46 = vadd.f32 %v5027_v33, %v7085_v45  ;;  %v4391_v43 = vpop.permute.xlu1 %4390 }
 0x84c   : > { %v4204_v36 = vpop.f32.mrf.mxu0 }
 0x84d   : > { %5519 = vpow2.f32 %v4880_v50  ;;  %v4883_v44 = vmul.f32 -1.442695, %v4213_v46  ;;  %v4205_v19 = vadd.f32 %v7085_v45, %v4204_v36 }
 0x84f   : > { %5521 = vpow2.f32 %v4883_v44  ;;  %v4881_v10 = vmul.f32 -1.442695, %v4205_v19  ;;  %v4396_v53 = vpop.permute.xlu1 %4395 }
 0x851   : > { %5523 = vpow2.f32 %v4881_v10 }
 0x857   : > { %v5030_v47 = vpop.f32.mrf.mxu0 }
 0x858   : > { %v5518_v40 = vpop.eup %5517  ;;  %v4226_v51 = vadd.f32 %v5030_v47, %v7085_v45 }
 0x859   : > { %v4314_v61 = vadd.f32 1.0, %v5518_v40  ;;  %v4217_v59 = vpop.f32.mrf.mxu0 }
 0x85a   : > { %v5520_v60 = vpop.eup %5519  ;;  %v4886_v20 = vmul.f32 -1.442695, %v4226_v51  ;;  %v4218_v17 = vadd.f32 %v7085_v45, %v4217_v59 }
 0x85b   : > { %5525 = vrcp.f32 %v4314_v61  ;;  %v4312_v24 = vadd.f32 1.0, %v5520_v60  ;;  %v5031_v52 = vpop.f32.mrf.mxu0 }
 0x85c   : > { %v5522_v63 = vpop.eup %5521  ;;  %5527 = vpow2.f32 %v4886_v20  ;;  %v4884_v13 = vmul.f32 -1.442695, %v4218_v17  ;;  %v4229_v42 = vadd.f32 %v5031_v52, %v7085_v45 }
 0x85d   : > { %5529 = vrcp.f32 %v4312_v24  ;;  %v4315_v5 = vadd.f32 1.0, %v5522_v63  ;;  %v4220_v0 = vpop.f32.mrf.mxu0  ;;  %v4401_v63 = vpop.permute.xlu1 %4400 }
 0x85e   : > { %v5524_v15 = vpop.eup %5523  ;;  %5531 = vpow2.f32 %v4884_v13  ;;  %v4887_v6 = vmul.f32 -1.442695, %v4229_v42  ;;  %v4221_v11 = vadd.f32 %v7085_v45, %v4220_v0 }
 0x85f   : > { %5533 = vrcp.f32 %v4315_v5  ;;  %v4313_v23 = vadd.f32 1.0, %v5524_v15 }
 0x860   : > { %5535 = vpow2.f32 %v4887_v6  ;;  %v4885_v55 = vmul.f32 -1.442695, %v4221_v11 }
 0x861   : > { %5537 = vrcp.f32 %v4313_v23 }
 0x862   : > { %5539 = vpow2.f32 %v4885_v55 }
 0x866   : > { %v5034_v22 = vpop.f32.mrf.mxu0 }
 0x867   : > { %v4242_v34 = vadd.f32 %v5034_v22, %v7085_v45 }
 0x868   : > { %v5526_v9 = vpop.eup %5525  ;;  %v4233_v25 = vpop.f32.mrf.mxu0 }
 0x869   : > { %v5528_v1 = vpop.eup %5527  ;;  %v4445_v12 = vsel %vm4362_vm2, %v4376_v28, %v5526_v9  ;;  %v4890_v37 = vmul.f32 -1.442695, %v4242_v34  ;;  %v4234_v16 = vadd.f32 %v7085_v45, %v4233_v25  ;;  %v4411_v34 = vpop.permute.xlu0 %4410 }
 0x86a   : > { %v5530_v57 = vpop.eup %5529  ;;  %4462 = vst.msk [vmem:[%s7105_s8 + $0x10] sm:$0xff] %vm4459_vm3, %v4445_v12  ;;  %v4318_v56 = vadd.f32 1.0, %v5528_v1  ;;  %v5035_v27 = vpop.f32.mrf.mxu0 }
 0x86b   : > { %v5532_v18 = vpop.eup %5531  ;;  %v4443_v2 = vsel %vm4362_vm2, %v4366_v62, %v5530_v57  ;;  %5541 = vpow2.f32 %v4890_v37  ;;  %v4888_v41 = vmul.f32 -1.442695, %v4234_v16  ;;  %v4245_v26 = vadd.f32 %v5035_v27, %v7085_v45 }
 0x86c   : > { %v5534_v3 = vpop.eup %5533  ;;  %4460 = vst.msk [vmem:[%s7105_s8] sm:$0xff] %vm4459_vm3, %v4443_v2  ;;  %5543 = vrcp.f32 %v4318_v56  ;;  %v4316_v58 = vadd.f32 1.0, %v5532_v18  ;;  %v4236_v8 = vpop.f32.mrf.mxu0 }
 0x86d   : > { %v5536_v31 = vpop.eup %5535  ;;  %v4446_v30 = vsel %vm4362_vm2, %v4381_v21, %v5534_v3  ;;  %5545 = vpow2.f32 %v4888_v41  ;;  %v4891_v32 = vmul.f32 -1.442695, %v4245_v26  ;;  %v4237_v35 = vadd.f32 %v7085_v45, %v4236_v8  ;;  %v4406_v21 = vpop.permute.xlu1 %4405 }
 0x86e   : > { %v5538_v38 = vpop.eup %5537  ;;  %4463 = vst.msk [vmem:[%s7105_s8 + $0x18] sm:$0xff] %vm4459_vm3, %v4446_v30  ;;  %5547 = vrcp.f32 %v4316_v58  ;;  %v4319_v48 = vadd.f32 1.0, %v5536_v31  ;;  %v4421_v62 = vpop.permute.xlu0 %4420 }
 0x86f   : > { %v5540_v39 = vpop.eup %5539  ;;  %v4444_v49 = vsel %vm4362_vm2, %v7092_v14, %v5538_v38  ;;  %5549 = vpow2.f32 %v4891_v32  ;;  %v4889_v54 = vmul.f32 -1.442695, %v4237_v35 }
 0x870   : > { %4461 = vst.msk [vmem:[%s7105_s8 + $0x8] sm:$0xff] %vm4459_vm3, %v4444_v49  ;;  %5551 = vrcp.f32 %v4319_v48  ;;  %v4317_v4 = vadd.f32 1.0, %v5540_v39 }
 0x871   : > { %5553 = vpow2.f32 %v4889_v54 }
 0x872   : > { %5555 = vrcp.f32 %v4317_v4  ;;  %v4431_v31 = vpop.permute.xlu0 %4430 }
 0x876   : > { %v4441_v39 = vpop.permute.xlu0 %4440 }
 0x877   : > { %v5038_v33 = vpop.f32.mrf.mxu0 }
 0x878   : > { %v5542_v50 = vpop.eup %5541  ;;  %v4258_v46 = vadd.f32 %v5038_v33, %v7085_v45 }
 0x879   : > { %v5544_v36 = vpop.eup %5543  ;;  %v4322_v44 = vadd.f32 1.0, %v5542_v50  ;;  %v4249_v19 = vpop.f32.mrf.mxu0 }
 0x87a   : > { %v5546_v10 = vpop.eup %5545  ;;  %v4449_v47 = vsel %vm4362_vm2, %v4396_v53, %v5544_v36  ;;  %v4894_v40 = vmul.f32 -1.442695, %v4258_v46  ;;  %v4250_v51 = vadd.f32 %v7085_v45, %v4249_v19 }
 0x87b   : > { %v5548_v14 = vpop.eup %5547  ;;  %4466 = vst.msk [vmem:[%s7105_s8 + $0x30] sm:$0xff] %vm4459_vm3, %v4449_v47  ;;  %5557 = vrcp.f32 %v4322_v44  ;;  %v4320_v61 = vadd.f32 1.0, %v5546_v10  ;;  %v5039_v59 = vpop.f32.mrf.mxu0 }
 0x87c   : > { %v5550_v60 = vpop.eup %5549  ;;  %v4447_v20 = vsel %vm4362_vm2, %v4386_v29, %v5548_v14  ;;  %5559 = vpow2.f32 %v4894_v40  ;;  %v4892_v17 = vmul.f32 -1.442695, %v4250_v51  ;;  %v4261_v24 = vadd.f32 %v5039_v59, %v7085_v45 }
 0x87d   : > { %v5552_v52 = vpop.eup %5551  ;;  %4464 = vst.msk [vmem:[%s7105_s8 + $0x20] sm:$0xff] %vm4459_vm3, %v4447_v20  ;;  %5561 = vrcp.f32 %v4320_v61  ;;  %v4323_v13 = vadd.f32 1.0, %v5550_v60  ;;  %v4252_v42 = vpop.f32.mrf.mxu0 }
 0x87e   : > { %v5554_v5 = vpop.eup %5553  ;;  %v4450_v0 = vsel %vm4362_vm2, %v4401_v63, %v5552_v52  ;;  %5563 = vpow2.f32 %v4892_v17  ;;  %v4895_v15 = vmul.f32 -1.442695, %v4261_v24  ;;  %v4253_v6 = vadd.f32 %v7085_v45, %v4252_v42  ;;  %v4416_v45 = vpop.permute.xlu1 %4415 }
 0x87f   : > { %v5556_v11 = vpop.eup %5555  ;;  %4467 = vst.msk [vmem:[%s7105_s8 + $0x38] sm:$0xff] %vm4459_vm3, %v4450_v0  ;;  %5565 = vrcp.f32 %v4323_v13  ;;  %v4321_v28 = vadd.f32 1.0, %v5554_v5 }
 0x880   : > { %v4448_v23 = vsel %vm4362_vm2, %v4391_v43, %v5556_v11  ;;  %5567 = vpow2.f32 %v4895_v15  ;;  %v4893_v55 = vmul.f32 -1.442695, %v4253_v6 }
 0x881   : > { %4465 = vst.msk [vmem:[%s7105_s8 + $0x28] sm:$0xff] %vm4459_vm3, %v4448_v23  ;;  %5569 = vrcp.f32 %v4321_v28 }
 0x882   : > { %5571 = vpow2.f32 %v4893_v55  ;;  %v4426_v58 = vpop.permute.xlu1 %4425 }
 0x886   : > { %v4436_v30 = vpop.permute.xlu1 %4435 }
 0x888   : > { %v5558_v22 = vpop.eup %5557 }
 0x889   : > { %v5560_v9 = vpop.eup %5559  ;;  %v4453_v25 = vsel %vm4362_vm2, %v4416_v45, %v5558_v22 }
 0x88a   : > { %v5562_v1 = vpop.eup %5561  ;;  %4470 = vst.msk [vmem:[%s7105_s8 + $0x50] sm:$0xff] %vm4459_vm3, %v4453_v25  ;;  %v4326_v12 = vadd.f32 1.0, %v5560_v9 }
 0x88b   : > { %v5564_v37 = vpop.eup %5563  ;;  %v4451_v16 = vsel %vm4362_vm2, %v4406_v21, %v5562_v1 }
 0x88c   : > { %v5566_v57 = vpop.eup %5565  ;;  %4468 = vst.msk [vmem:[%s7105_s8 + $0x40] sm:$0xff] %vm4459_vm3, %v4451_v16  ;;  %5573 = vrcp.f32 %v4326_v12  ;;  %v4324_v56 = vadd.f32 1.0, %v5564_v37 }
 0x88d   : > { %v5568_v27 = vpop.eup %5567  ;;  %v4454_v18 = vsel %vm4362_vm2, %v4421_v62, %v5566_v57 }
 0x88e   : > { %v5570_v29 = vpop.eup %5569  ;;  %4471 = vst.msk [vmem:[%s7105_s8 + $0x58] sm:$0xff] %vm4459_vm3, %v4454_v18  ;;  %5575 = vrcp.f32 %v4324_v56  ;;  %v4327_v2 = vadd.f32 1.0, %v5568_v27 }
 0x88f   : > { %v5572_v41 = vpop.eup %5571  ;;  %v4452_v26 = vsel %vm4362_vm2, %v4411_v34, %v5570_v29 }
 0x890   : > { %4469 = vst.msk [vmem:[%s7105_s8 + $0x48] sm:$0xff] %vm4459_vm3, %v4452_v26  ;;  %5577 = vrcp.f32 %v4327_v2  ;;  %v4325_v3 = vadd.f32 1.0, %v5572_v41 }
 0x892   : > { %5579 = vrcp.f32 %v4325_v3 }
 0x899   : > { %v5574_v8 = vpop.eup %5573 }
 0x89a   : > { %v4457_v32 = vsel %vm4362_vm2, %v4436_v30, %v5574_v8 }
 0x89b   : > { %v5576_v35 = vpop.eup %5575  ;;  %4474 = vst.msk [vmem:[%s7105_s8 + $0x70] sm:$0xff] %vm4459_vm3, %v4457_v32 }
 0x89c   : > { %v4455_v38 = vsel %vm4362_vm2, %v4426_v58, %v5576_v35 }
 0x89d   : > { %v5578_v48 = vpop.eup %5577  ;;  %4472 = vst.msk [vmem:[%s7105_s8 + $0x60] sm:$0xff] %vm4459_vm3, %v4455_v38 }
 0x89e   : > { %v4458_v49 = vsel %vm4362_vm2, %v4441_v39, %v5578_v48 }
 0x89f   : > { %v5580_v54 = vpop.eup %5579  ;;  %4475 = vst.msk [vmem:[%s7105_s8 + $0x78] sm:$0xff] %vm4459_vm3, %v4458_v49 }
 0x8a0   : > { %v4456_v4 = vsel %vm4362_vm2, %v4431_v31, %v5580_v54 }
 0x8a1   : > { %4473 = vst.msk [vmem:[%s7105_s8 + $0x68] sm:$0xff] %vm4459_vm3, %v4456_v4 }
 0x8a2 PF: > { %s17_s24 = sadd.s32 1, %s5587_s24  }
 0x8a3   : > { %p14_p4 = scmp.ge.s32.totalorder %s17_s24, 4  }
 0x8a5   :  { %16 = sbr.rel (!%p14_p4) target bundleno = 1 (0x1), region = 81 }

</bundles_post_ra>
